<compile_context>
chip_gen: v7x
topology: tpu7x:2x2x1
jax: 0.10.0
libtpu: 0.0.40
codegen_flags: <defaults>
</compile_context>

<pallas_src>
import functools

import jax
import jax.numpy as jnp
from jax import lax
from jax.experimental import pallas as pl
from jax.experimental.pallas import tpu as pltpu

_LN_EPS = 1e-5          # torch.nn.LayerNorm default
_NEG_INF = -1e30        # finite "minus infinity" for masked attention keys


# ----------------------------- math helpers ------------------------------

def _erf(x):
    # Abramowitz & Stegun 7.1.26 approximation of erf (max abs err ~1.5e-7).
    a1, a2, a3, a4, a5 = (0.254829592, -0.284496736, 1.421413741,
                          -1.453152027, 1.061405429)
    p = 0.3275911
    ax = jnp.abs(x)
    t = 1.0 / (1.0 + p * ax)
    poly = ((((a5 * t + a4) * t + a3) * t + a2) * t + a1) * t
    y = 1.0 - poly * jnp.exp(-ax * ax)
    return jnp.where(x >= 0, y, -y)


def _gelu_exact(x):
    # 0.5 * x * (1 + erf(x / sqrt(2)))  -- matches torch.nn.GELU() semantics.
    return 0.5 * x * (1.0 + _erf(x * 0.7071067811865476))


def _layernorm(v, g, b):
    mu = jnp.mean(v, axis=-1, keepdims=True)
    var = jnp.mean((v - mu) ** 2, axis=-1, keepdims=True)
    return (v - mu) * lax.rsqrt(var + _LN_EPS) * g + b


# ------------------------------ fused kernel ------------------------------

def _vit_kernel(patches_ref, pw_ref, pb_ref, cls_ref, pos_ref,
                ln1g_ref, ln1b_ref, wqkv_ref, wout_ref, bout_ref,
                ln2g_ref, ln2b_ref, w1_ref, b1_ref, w2_ref, b2_ref,
                hg_ref, hb_ref, hw_ref, hbias_ref,
                logits_ref, x_acc,
                *, heads, dim_head, n_tokens, pool, mxu_bf16):
    """Fused ViT forward.  grid = (batch_blocks, depth).

    The activation block lives in the VMEM scratch `x_acc` for the whole depth
    sweep (no HBM round-trip between layers).  Depth step 0 additionally runs
    patch-embed + cls token + positional embedding; the last depth step
    additionally runs pooling + LayerNorm + classifier head.
    """
    d = pl.program_id(1)
    n_layers = pl.num_programs(1)
    Bb, Np, D = x_acc.shape
    inner = heads * dim_head
    scale = dim_head ** -0.5
    mxu_t = jnp.bfloat16 if mxu_bf16 else jnp.float32

    def mm(a, b):  # MXU matmul with f32 accumulation
        return jnp.dot(a.astype(mxu_t), b.astype(mxu_t),
                       preferred_element_type=jnp.float32)

    # Token-index iota (cls slot / padding masks).
    tok = lax.broadcasted_iota(jnp.int32, (1, Np, 1), 1)

    # ---- depth step 0: patch embedding + cls + positional embedding ----
    @pl.when(d == 0)
    def _init():
        pf = patches_ref[...].astype(jnp.float32).reshape(Bb * Np, -1)
        emb = (mm(pf, pw_ref[...]) + pb_ref[...]).reshape(Bb, Np, D)
        x0 = jnp.where(tok == 0, cls_ref[0], emb)        # token 0 <- cls token
        x0 = jnp.where(tok < n_tokens, x0, 0.0)          # zero out padded tokens
        x_acc[...] = x0 + pos_ref[...]                   # pos is zero-padded

    # ---- one encoder layer (runs every depth step) ----
    # Np is a multiple of 8 and D <= 128, so this reshape is a tile-aligned
    # relabel of the VMEM-resident activation (no relayout copy).
    x2 = x_acc[...].reshape(Bb * Np, D)

    # PreNorm + multi-head self-attention + residual
    xn = _layernorm(x2, ln1g_ref[0], ln1b_ref[0])
    qkv = mm(xn, wqkv_ref[0]).reshape(Bb, Np, 3 * inner)

    kmask = lax.broadcasted_iota(jnp.int32, (1, 1, Np), 2) < n_tokens
    head_out = []
    for h in range(heads):   # static loop; score/AV are inherently per-head K=dh GEMMs
        q = qkv[:, :, h * dim_head:(h + 1) * dim_head]
        k = qkv[:, :, inner + h * dim_head:inner + (h + 1) * dim_head]
        v = qkv[:, :, 2 * inner + h * dim_head:2 * inner + (h + 1) * dim_head]
        s = jnp.einsum('bid,bjd->bij', q.astype(mxu_t), k.astype(mxu_t),
                       preferred_element_type=jnp.float32) * scale
        s = jnp.where(kmask, s, _NEG_INF)                # mask padded key columns
        s = s - jnp.max(s, axis=-1, keepdims=True)
        e = jnp.exp(s)
        p = e / jnp.sum(e, axis=-1, keepdims=True)       # exact divide (f32 parity)
        head_out.append(jnp.einsum('bij,bjd->bid', p.astype(mxu_t),
                                   v.astype(mxu_t),
                                   preferred_element_type=jnp.float32))
    # Single output projection against the full W_out (K=inner, not K=dim_head).
    o = jnp.concatenate(head_out, axis=-1).reshape(Bb * Np, inner)
    x2 = x2 + mm(o, wout_ref[0]) + bout_ref[0]

    # PreNorm + FeedForward (Linear -> GELU -> Linear) + residual
    xn2 = _layernorm(x2, ln2g_ref[0], ln2b_ref[0])
    h1 = _gelu_exact(mm(xn2, w1_ref[0]) + b1_ref[0])
    x2 = x2 + mm(h1, w2_ref[0]) + b2_ref[0]

    x3 = x2.reshape(Bb, Np, D)
    x_acc[...] = x3

    # ---- last depth step: pool + LayerNorm + classifier head ----
    @pl.when(d == n_layers - 1)
    def _head():
        if pool == "mean":
            xm = jnp.where(tok < n_tokens, x3, 0.0)
            pooled = jnp.sum(xm, axis=1) * (1.0 / n_tokens)   # (Bb, D)
        else:                                                  # 'cls'
            pooled = x3[:, 0, :]                               # (Bb, D)
        pn = _layernorm(pooled, hg_ref[...], hb_ref[...])
        logits = mm(pn, hw_ref[...]) + hbias_ref[...]
        logits_ref[...] = logits.reshape(1, Bb, -1).astype(logits_ref.dtype)


# ------------------------------ pallas wrapper ------------------------------

def fused_vit_forward(patches, pos, params, *, heads, dim_head, n_tokens,
                      pool="cls", batch_block=None, mxu_bf16=False):
    """Run the whole model (patch embed -> transformer -> head) in one pallas_call.

    patches: (B, Np, patch_dim) token-aligned, zero-padded (slot 0 = cls slot).
    pos:     (1, Np, dim) positional embedding, zero-padded past n_tokens.
    batch_block: batch elements per grid step.  Default B (one block; best on
                 single-TC v5e/v6e).  On v7x pass B//2 so the "parallel" batch
                 axis shards across both TensorCores.
    mxu_bf16: cast MXU operands to bf16 (recommended on v6e/v7x; keeps f32
              accumulation + f32 elementwise math).  False = full f32 parity.
    """
    B, Np, Pd = patches.shape
    lay = params["layers"]
    depth = lay["w_qkv"].shape[0]
    D = params["patch_w"].shape[1]
    inner = heads * dim_head
    mlp = lay["w1"].shape[2]
    C = params["head_w"].shape[1]
    assert depth >= 1, "fused kernel requires depth >= 1"

    bblk = B if batch_block is None else batch_block
    assert B % bblk == 0, "batch_block must divide batch"
    nbb = B // bblk

    def gspec(shape):                       # depth-invariant (global) param
        zeros = (0,) * len(shape)
        return pl.BlockSpec(shape, lambda bi, d: zeros)

    def lspec(shape):                       # per-layer stacked param, depth-indexed
        zeros = (0,) * len(shape)
        return pl.BlockSpec((1,) + shape, lambda bi, d: (d,) + zeros)

    kernel = functools.partial(_vit_kernel, heads=heads, dim_head=dim_head,
                               n_tokens=n_tokens, pool=pool, mxu_bf16=mxu_bf16)

    logits = pl.pallas_call(
        kernel,
        out_shape=jax.ShapeDtypeStruct((nbb, bblk, C), jnp.float32),
        grid=(nbb, depth),
        in_specs=[
            pl.BlockSpec((bblk, Np, Pd), lambda bi, d: (bi, 0, 0)),  # patches
            gspec((Pd, D)), gspec((1, D)),                           # patch emb w/b
            gspec((1, 1, D)), gspec((1, Np, D)),                     # cls, pos
            lspec((1, D)), lspec((1, D)),                            # ln1 gamma/beta
            lspec((D, 3 * inner)),                                   # to_qkv (no bias)
            lspec((inner, D)), lspec((1, D)),                        # to_out w/b
            lspec((1, D)), lspec((1, D)),                            # ln2 gamma/beta
            lspec((D, mlp)), lspec((1, mlp)),                        # ff w1/b1
            lspec((mlp, D)), lspec((1, D)),                          # ff w2/b2
            gspec((1, D)), gspec((1, D)),                            # head LN gamma/beta
            gspec((D, C)), gspec((1, C)),                            # head w/b
        ],
        out_specs=pl.BlockSpec((1, bblk, C), lambda bi, d: (bi, 0, 0)),
        scratch_shapes=[pltpu.VMEM((bblk, Np, D), jnp.float32)],     # resident activations
        compiler_params=pltpu.CompilerParams(
            dimension_semantics=("parallel", "arbitrary")),
    )(patches, params["patch_w"], params["patch_b"], params["cls"], pos,
      lay["ln1_g"], lay["ln1_b"], lay["w_qkv"], lay["w_out"], lay["b_out"],
      lay["ln2_g"], lay["ln2_b"], lay["w1"], lay["b1"], lay["w2"], lay["b2"],
      params["head_ln_g"], params["head_ln_b"], params["head_w"], params["head_b"])

    return logits.reshape(B, C)


# ------------------------------ model glue ------------------------------

def init_params(key, *, channels, fre_size, time_size, dim, depth, heads,
                dim_head, mlp_dim, num_classes, num_patches=150):
    assert depth >= 1
    patch_dim = channels * time_size * fre_size
    inner = heads * dim_head
    ks = jax.random.split(key, 4 + depth)

    def dense(k, fin, fout, bias=True):
        kw, kb = jax.random.split(k)
        lim = 1.0 / (fin ** 0.5)
        w = jax.random.uniform(kw, (fin, fout), jnp.float32, -lim, lim)
        if not bias:
            return w
        b = jax.random.uniform(kb, (1, fout), jnp.float32, -lim, lim)
        return w, b

    patch_w, patch_b = dense(ks[0], patch_dim, dim)
    pos = jax.random.normal(ks[1], (1, num_patches + 1, dim), jnp.float32)
    cls = jax.random.normal(ks[2], (1, 1, dim), jnp.float32)

    names = ("ln1_g", "ln1_b", "w_qkv", "w_out", "b_out",
             "ln2_g", "ln2_b", "w1", "b1", "w2", "b2")
    acc = {n: [] for n in names}
    for i in range(depth):
        lk = jax.random.split(ks[3 + i], 4)
        w_qkv = dense(lk[0], dim, 3 * inner, bias=False)
        w_out, b_out = dense(lk[1], inner, dim)
        w1, b1 = dense(lk[2], dim, mlp_dim)
        w2, b2 = dense(lk[3], mlp_dim, dim)
        acc["ln1_g"].append(jnp.ones((1, dim), jnp.float32))
        acc["ln1_b"].append(jnp.zeros((1, dim), jnp.float32))
        acc["w_qkv"].append(w_qkv)
        acc["w_out"].append(w_out)
        acc["b_out"].append(b_out)
        acc["ln2_g"].append(jnp.ones((1, dim), jnp.float32))
        acc["ln2_b"].append(jnp.zeros((1, dim), jnp.float32))
        acc["w1"].append(w1)
        acc["b1"].append(b1)
        acc["w2"].append(w2)
        acc["b2"].append(b2)
    layers = {n: jnp.stack(v, axis=0) for n, v in acc.items()}

    head_w, head_b = dense(ks[3 + depth], dim, num_classes)
    return dict(patch_w=patch_w, patch_b=patch_b, pos=pos, cls=cls,
                layers=layers, depth=depth,
                head_ln_g=jnp.ones((1, dim), jnp.float32),
                head_ln_b=jnp.zeros((1, dim), jnp.float32),
                head_w=head_w, head_b=head_b)


def trans_model_forward(img, params, *, fre_size, time_size, heads, dim_head,
                        pool="cls", batch_block=None, mxu_bf16=False):
    B, C, H, W = img.shape
    p1, p2 = fre_size, time_size
    hh, ww = H // p1, W // p2
    # einops: 'b c (h p1) (w p2) -> b (h w) (p1 p2 c)'  (pure layout, JAX glue)
    x = img.reshape(B, C, hh, p1, ww, p2).transpose(0, 2, 4, 3, 5, 1)
    n = hh * ww
    patch_dim = p1 * p2 * C
    patches = x.reshape(B, n, patch_dim)

    dim = params["patch_w"].shape[1]
    n_tokens = n + 1                                   # cls + patches
    n_pad = ((n_tokens + 7) // 8) * 8                  # sublane-aligned token count

    # Token-aligned, zero-padded patch tensor: slot 0 = cls slot, 1..n = patches.
    patches_pad = jnp.zeros((B, n_pad, patch_dim), jnp.float32)
    patches_pad = patches_pad.at[:, 1:n_tokens].set(patches.astype(jnp.float32))
    # Positional embedding sliced to the live tokens and zero-padded.
    pos_pad = jnp.zeros((1, n_pad, dim), jnp.float32)
    pos_pad = pos_pad.at[:, :n_tokens].set(params["pos"][:, :n_tokens])
    # emb dropout p=0.0 -> identity
    # NOTE: the (heads==1 and dim_head==dim) Identity-projection special case of
    # the PyTorch Attention is not specialized; to_out is always applied.

    return fused_vit_forward(patches_pad, pos_pad, params, heads=heads,
                             dim_head=dim_head, n_tokens=n_tokens, pool=pool,
                             batch_block=batch_block, mxu_bf16=mxu_bf16)


# ------------------------------ demo ------------------------------

if __name__ == "__main__":
    key = jax.random.PRNGKey(0)
    kp, kx = jax.random.split(key)

    # Small shapes consistent with the module (image_size=30 as asserted).
    B, C = 2, 4
    image_size = 30
    fre_size, time_size = 6, 3        # -> (30/6)*(30/3) = 50 patches (<= 150)
    dim, depth, heads, dim_head = 32, 2, 4, 8
    mlp_dim, num_classes = 64, 5

    params = init_params(kp, channels=C, fre_size=fre_size, time_size=time_size,
                         dim=dim, depth=depth, heads=heads, dim_head=dim_head,
                         mlp_dim=mlp_dim, num_classes=num_classes)

    img = jax.random.normal(kx, (B, C, image_size, image_size), jnp.float32)

    # Default: f32 MXU + batch_block=B (best on single-TC v5e/v6e; exact parity).
    # On v7x: trans_model_forward(..., batch_block=B//2, mxu_bf16=True).
    out = trans_model_forward(img, params, fre_size=fre_size,
                              time_size=time_size, heads=heads,
                              dim_head=dim_head, pool="cls")
    jax.block_until_ready(out)
    assert out.shape == (B, num_classes), out.shape
    print("KERNEL_OK")
</pallas_src>

<mosaic_0001>
module attributes {stable_mosaic.version = 11 : i64} {
  func.func @_vit_kernel(%arg0: i32, %arg1: i32, %arg2: memref<2x56x72xf32, #tpu.memory_space<vmem>>, %arg3: memref<72x32xf32, #tpu.memory_space<vmem>>, %arg4: memref<1x32xf32, #tpu.memory_space<vmem>>, %arg5: memref<1x1x32xf32, #tpu.memory_space<vmem>>, %arg6: memref<1x56x32xf32, #tpu.memory_space<vmem>>, %arg7: memref<1x1x32xf32, #tpu.memory_space<vmem>>, %arg8: memref<1x1x32xf32, #tpu.memory_space<vmem>>, %arg9: memref<1x32x96xf32, #tpu.memory_space<vmem>>, %arg10: memref<1x32x32xf32, #tpu.memory_space<vmem>>, %arg11: memref<1x1x32xf32, #tpu.memory_space<vmem>>, %arg12: memref<1x1x32xf32, #tpu.memory_space<vmem>>, %arg13: memref<1x1x32xf32, #tpu.memory_space<vmem>>, %arg14: memref<1x32x64xf32, #tpu.memory_space<vmem>>, %arg15: memref<1x1x64xf32, #tpu.memory_space<vmem>>, %arg16: memref<1x64x32xf32, #tpu.memory_space<vmem>>, %arg17: memref<1x1x32xf32, #tpu.memory_space<vmem>>, %arg18: memref<1x32xf32, #tpu.memory_space<vmem>>, %arg19: memref<1x32xf32, #tpu.memory_space<vmem>>, %arg20: memref<32x5xf32, #tpu.memory_space<vmem>>, %arg21: memref<1x5xf32, #tpu.memory_space<vmem>>, %arg22: memref<1x2x5xf32, #tpu.memory_space<vmem>>, %arg23: memref<2x56x32xf32, #tpu.memory_space<vmem>>) attributes {dimension_semantics = [#tpu.dimension_semantics<parallel>, #tpu.dimension_semantics<arbitrary>], iteration_bounds = array<i64: 1, 2>, scalar_prefetch = 0 : i64, scratch_operands = 1 : i64, tpu.core_type = #tpu.core_type<tc>, window_params = [{transform_indices = @transform_0, window_bounds = array<i64: 2, 56, 72>}, {pipeline_mode = #tpu.pipeline_mode<synchronous>, transform_indices = @transform_1, window_bounds = array<i64: 72, 32>}, {pipeline_mode = #tpu.pipeline_mode<synchronous>, transform_indices = @transform_2, window_bounds = array<i64: 1, 32>}, {pipeline_mode = #tpu.pipeline_mode<synchronous>, transform_indices = @transform_3, window_bounds = array<i64: 1, 1, 32>}, {pipeline_mode = #tpu.pipeline_mode<synchronous>, transform_indices = @transform_4, window_bounds = array<i64: 1, 56, 32>}, {transform_indices = @transform_5, window_bounds = array<i64: 1, 1, 32>}, {transform_indices = @transform_6, window_bounds = array<i64: 1, 1, 32>}, {transform_indices = @transform_7, window_bounds = array<i64: 1, 32, 96>}, {transform_indices = @transform_8, window_bounds = array<i64: 1, 32, 32>}, {transform_indices = @transform_9, window_bounds = array<i64: 1, 1, 32>}, {transform_indices = @transform_10, window_bounds = array<i64: 1, 1, 32>}, {transform_indices = @transform_11, window_bounds = array<i64: 1, 1, 32>}, {transform_indices = @transform_12, window_bounds = array<i64: 1, 32, 64>}, {transform_indices = @transform_13, window_bounds = array<i64: 1, 1, 64>}, {transform_indices = @transform_14, window_bounds = array<i64: 1, 64, 32>}, {transform_indices = @transform_15, window_bounds = array<i64: 1, 1, 32>}, {pipeline_mode = #tpu.pipeline_mode<synchronous>, transform_indices = @transform_16, window_bounds = array<i64: 1, 32>}, {pipeline_mode = #tpu.pipeline_mode<synchronous>, transform_indices = @transform_17, window_bounds = array<i64: 1, 32>}, {pipeline_mode = #tpu.pipeline_mode<synchronous>, transform_indices = @transform_18, window_bounds = array<i64: 32, 5>}, {pipeline_mode = #tpu.pipeline_mode<synchronous>, transform_indices = @transform_19, window_bounds = array<i64: 1, 5>}, {transform_indices = @transform_20, window_bounds = array<i64: 1, 2, 5>}]} {
    %0 = tpu.iota {dimensions = array<i32: 1>} : vector<1x56x1xi32>
    %c0_i32 = arith.constant 0 : i32
    %1 = arith.cmpi eq, %arg1, %c0_i32 : i32
    %2 = arith.extui %1 : i1 to i32
    %c0_i32_0 = arith.constant 0 : i32
    %3 = arith.cmpi ne, %2, %c0_i32_0 : i32
    scf.if %3 {
      %c0_92 = arith.constant 0 : index
      %c0_93 = arith.constant 0 : index
      %c0_94 = arith.constant 0 : index
      %215 = vector.load %arg2[%c0_92, %c0_93, %c0_94] : memref<2x56x72xf32, #tpu.memory_space<vmem>>, vector<2x56x72xf32>
      %216 = vector.shape_cast %215 : vector<2x56x72xf32> to vector<112x72xf32>
      %c0_95 = arith.constant 0 : index
      %c0_96 = arith.constant 0 : index
      %217 = vector.load %arg3[%c0_95, %c0_96] : memref<72x32xf32, #tpu.memory_space<vmem>>, vector<72x32xf32>
      %cst_97 = arith.constant dense<0.000000e+00> : vector<112x32xf32>
      %218 = tpu.matmul %216, %217, %cst_97 {dimension_numbers = #tpu.dot_dimension_numbers<[1], [0], [0], [1], [0, 0, 1, 1], [], []>} : vector<112x72xf32>, vector<72x32xf32>, vector<112x32xf32> -> vector<112x32xf32>
      %c0_98 = arith.constant 0 : index
      %c0_99 = arith.constant 0 : index
      %219 = vector.load %arg4[%c0_98, %c0_99] : memref<1x32xf32, #tpu.memory_space<vmem>>, vector<1x32xf32>
      %220 = vector.broadcast %219 : vector<1x32xf32> to vector<112x32xf32>
      %221 = arith.addf %218, %220 : vector<112x32xf32>
      %222 = vector.shape_cast %221 : vector<112x32xf32> to vector<2x56x32xf32>
      %c0_i32_100 = arith.constant 0 : i32
      %223 = vector.broadcast %c0_i32_100 : i32 to vector<1x56x1xi32>
      %224 = arith.cmpi eq, %0, %223 : vector<1x56x1xi32>
      %c0_101 = arith.constant 0 : index
      %c0_102 = arith.constant 0 : index
      %c0_103 = arith.constant 0 : index
      %225 = vector.load %arg5[%c0_101, %c0_102, %c0_103] : memref<1x1x32xf32, #tpu.memory_space<vmem>>, vector<1x1x32xf32>
      %226 = vector.shape_cast %225 : vector<1x1x32xf32> to vector<1x32xf32>
      %227 = vector.shape_cast %224 : vector<1x56x1xi1> to vector<1x56x1xi1>
      %228 = vector.broadcast %227 : vector<1x56x1xi1> to vector<2x56x32xi1>
      %229 = vector.shape_cast %226 : vector<1x32xf32> to vector<1x1x32xf32>
      %230 = vector.broadcast %229 : vector<1x1x32xf32> to vector<2x56x32xf32>
      %231 = arith.select %228, %230, %222 : vector<2x56x32xi1>, vector<2x56x32xf32>
      %c51_i32_104 = arith.constant 51 : i32
      %232 = vector.broadcast %c51_i32_104 : i32 to vector<1x56x1xi32>
      %233 = arith.cmpi slt, %0, %232 : vector<1x56x1xi32>
      %cst_105 = arith.constant 0.000000e+00 : f32
      %234 = vector.shape_cast %233 : vector<1x56x1xi1> to vector<1x56x1xi1>
      %235 = vector.broadcast %234 : vector<1x56x1xi1> to vector<2x56x32xi1>
      %236 = vector.broadcast %cst_105 : f32 to vector<2x56x32xf32>
      %237 = arith.select %235, %231, %236 : vector<2x56x32xi1>, vector<2x56x32xf32>
      %c0_106 = arith.constant 0 : index
      %c0_107 = arith.constant 0 : index
      %c0_108 = arith.constant 0 : index
      %238 = vector.load %arg6[%c0_106, %c0_107, %c0_108] : memref<1x56x32xf32, #tpu.memory_space<vmem>>, vector<1x56x32xf32>
      %239 = vector.broadcast %238 : vector<1x56x32xf32> to vector<2x56x32xf32>
      %240 = arith.addf %237, %239 : vector<2x56x32xf32>
      %c0_109 = arith.constant 0 : index
      %c0_110 = arith.constant 0 : index
      %c0_111 = arith.constant 0 : index
      %241 = vector.load %arg23[%c0_109, %c0_110, %c0_111] : memref<2x56x32xf32, #tpu.memory_space<vmem>>, vector<2x56x32xf32>
      tpu.vector_store %arg23[%c0_109, %c0_110, %c0_111], %240 {strides = array<i32>} : memref<2x56x32xf32, #tpu.memory_space<vmem>>, vector<2x56x32xf32>,
    } else {
    }
    %c0 = arith.constant 0 : index
    %c0_1 = arith.constant 0 : index
    %c0_2 = arith.constant 0 : index
    %4 = vector.load %arg23[%c0, %c0_1, %c0_2] : memref<2x56x32xf32, #tpu.memory_space<vmem>>, vector<2x56x32xf32>
    %5 = vector.shape_cast %4 : vector<2x56x32xf32> to vector<112x32xf32>
    %c0_3 = arith.constant 0 : index
    %c0_4 = arith.constant 0 : index
    %c0_5 = arith.constant 0 : index
    %6 = vector.load %arg7[%c0_3, %c0_4, %c0_5] : memref<1x1x32xf32, #tpu.memory_space<vmem>>, vector<1x1x32xf32>
    %7 = vector.shape_cast %6 : vector<1x1x32xf32> to vector<1x32xf32>
    %c0_6 = arith.constant 0 : index
    %c0_7 = arith.constant 0 : index
    %c0_8 = arith.constant 0 : index
    %8 = vector.load %arg8[%c0_6, %c0_7, %c0_8] : memref<1x1x32xf32, #tpu.memory_space<vmem>>, vector<1x1x32xf32>
    %9 = vector.shape_cast %8 : vector<1x1x32xf32> to vector<1x32xf32>
    %cst = arith.constant dense<0.000000e+00> : vector<112xf32>
    %10 = vector.multi_reduction <add>, %5, %cst [1] : vector<112x32xf32> to vector<112xf32>
    %11 = vector.shape_cast %10 : vector<112xf32> to vector<112x1xf32>
    %cst_9 = arith.constant 3.200000e+01 : f32
    %12 = vector.broadcast %cst_9 : f32 to vector<112x1xf32>
    %13 = arith.divf %11, %12 : vector<112x1xf32>
    %14 = vector.broadcast %13 : vector<112x1xf32> to vector<112x32xf32>
    %15 = arith.subf %5, %14 : vector<112x32xf32>
    %16 = arith.mulf %15, %15 : vector<112x32xf32>
    %cst_10 = arith.constant dense<0.000000e+00> : vector<112xf32>
    %17 = vector.multi_reduction <add>, %16, %cst_10 [1] : vector<112x32xf32> to vector<112xf32>
    %18 = vector.shape_cast %17 : vector<112xf32> to vector<112x1xf32>
    %cst_11 = arith.constant 3.200000e+01 : f32
    %19 = vector.broadcast %cst_11 : f32 to vector<112x1xf32>
    %20 = arith.divf %18, %19 : vector<112x1xf32>
    %21 = vector.broadcast %13 : vector<112x1xf32> to vector<112x32xf32>
    %22 = arith.subf %5, %21 : vector<112x32xf32>
    %cst_12 = arith.constant 9.99999974E-6 : f32
    %23 = vector.broadcast %cst_12 : f32 to vector<112x1xf32>
    %24 = arith.addf %20, %23 : vector<112x1xf32>
    %25 = math.rsqrt %24 : vector<112x1xf32>
    %26 = vector.broadcast %25 : vector<112x1xf32> to vector<112x32xf32>
    %27 = arith.mulf %22, %26 : vector<112x32xf32>
    %28 = vector.broadcast %7 : vector<1x32xf32> to vector<112x32xf32>
    %29 = arith.mulf %27, %28 : vector<112x32xf32>
    %30 = vector.broadcast %9 : vector<1x32xf32> to vector<112x32xf32>
    %31 = arith.addf %29, %30 : vector<112x32xf32>
    %c0_13 = arith.constant 0 : index
    %c0_14 = arith.constant 0 : index
    %c0_15 = arith.constant 0 : index
    %32 = vector.load %arg9[%c0_13, %c0_14, %c0_15] : memref<1x32x96xf32, #tpu.memory_space<vmem>>, vector<1x32x96xf32>
    %33 = vector.shape_cast %32 : vector<1x32x96xf32> to vector<32x96xf32>
    %cst_16 = arith.constant dense<0.000000e+00> : vector<112x96xf32>
    %34 = tpu.matmul %31, %33, %cst_16 {dimension_numbers = #tpu.dot_dimension_numbers<[1], [0], [0], [1], [0, 0, 1, 1], [], []>} : vector<112x32xf32>, vector<32x96xf32>, vector<112x96xf32> -> vector<112x96xf32>
    %35 = vector.shape_cast %34 : vector<112x96xf32> to vector<2x56x96xf32>
    %36 = tpu.iota {dimensions = array<i32: 2>} : vector<1x1x56xi32>
    %c51_i32 = arith.constant 51 : i32
    %37 = vector.broadcast %c51_i32 : i32 to vector<1x1x56xi32>
    %38 = arith.cmpi slt, %36, %37 : vector<1x1x56xi32>
    %39 = vector.extract_strided_slice %35 {offsets = [0, 0, 0], sizes = [2, 56, 8], strides = [1, 1, 1]} : vector<2x56x96xf32> to vector<2x56x8xf32>
    %40 = vector.extract_strided_slice %35 {offsets = [0, 0, 32], sizes = [2, 56, 8], strides = [1, 1, 1]} : vector<2x56x96xf32> to vector<2x56x8xf32>
    %41 = vector.extract_strided_slice %35 {offsets = [0, 0, 64], sizes = [2, 56, 8], strides = [1, 1, 1]} : vector<2x56x96xf32> to vector<2x56x8xf32>
    "tpu.trace_start"() <{level = 10 : i32, message = "bid,bjd->bij"}> : () -> ()
    %cst_17 = arith.constant dense<0.000000e+00> : vector<2x56x56xf32>
    %42 = tpu.matmul %39, %40, %cst_17 {dimension_numbers = #tpu.dot_dimension_numbers<[2], [2], [1], [1], [0, 0, 0, 1, 1, 1], [0], [0]>} : vector<2x56x8xf32>, vector<2x56x8xf32>, vector<2x56x56xf32> -> vector<2x56x56xf32>
    "tpu.trace_stop"() : () -> ()
    %cst_18 = arith.constant 0.353553385 : f32
    %43 = vector.broadcast %cst_18 : f32 to vector<2x56x56xf32>
    %44 = arith.mulf %42, %43 : vector<2x56x56xf32>
    %cst_19 = arith.constant -1.000000e+30 : f32
    %45 = vector.shape_cast %38 : vector<1x1x56xi1> to vector<1x1x56xi1>
    %46 = vector.broadcast %45 : vector<1x1x56xi1> to vector<2x56x56xi1>
    %47 = vector.broadcast %cst_19 : f32 to vector<2x56x56xf32>
    %48 = arith.select %46, %44, %47 : vector<2x56x56xi1>, vector<2x56x56xf32>
    %cst_20 = arith.constant dense<0xFF800000> : vector<2x56xf32>
    %49 = vector.multi_reduction <maximumf>, %48, %cst_20 [2] : vector<2x56x56xf32> to vector<2x56xf32>
    %50 = vector.shape_cast %49 : vector<2x56xf32> to vector<2x56x1xf32>
    %51 = vector.broadcast %50 : vector<2x56x1xf32> to vector<2x56x56xf32>
    %52 = arith.subf %48, %51 : vector<2x56x56xf32>
    %53 = math.exp %52 : vector<2x56x56xf32>
    %cst_21 = arith.constant dense<0.000000e+00> : vector<2x56xf32>
    %54 = vector.multi_reduction <add>, %53, %cst_21 [2] : vector<2x56x56xf32> to vector<2x56xf32>
    %55 = vector.shape_cast %54 : vector<2x56xf32> to vector<2x56x1xf32>
    %56 = vector.broadcast %55 : vector<2x56x1xf32> to vector<2x56x56xf32>
    %57 = arith.divf %53, %56 : vector<2x56x56xf32>
    "tpu.trace_start"() <{level = 10 : i32, message = "bij,bjd->bid"}> : () -> ()
    %cst_22 = arith.constant dense<0.000000e+00> : vector<2x56x8xf32>
    %58 = tpu.matmul %57, %41, %cst_22 {dimension_numbers = #tpu.dot_dimension_numbers<[2], [1], [1], [2], [0, 0, 0, 1, 1, 2], [0], [0]>} : vector<2x56x56xf32>, vector<2x56x8xf32>, vector<2x56x8xf32> -> vector<2x56x8xf32>
    "tpu.trace_stop"() : () -> ()
    %59 = vector.extract_strided_slice %35 {offsets = [0, 0, 8], sizes = [2, 56, 8], strides = [1, 1, 1]} : vector<2x56x96xf32> to vector<2x56x8xf32>
    %60 = vector.extract_strided_slice %35 {offsets = [0, 0, 40], sizes = [2, 56, 8], strides = [1, 1, 1]} : vector<2x56x96xf32> to vector<2x56x8xf32>
    %61 = vector.extract_strided_slice %35 {offsets = [0, 0, 72], sizes = [2, 56, 8], strides = [1, 1, 1]} : vector<2x56x96xf32> to vector<2x56x8xf32>
    "tpu.trace_start"() <{level = 10 : i32, message = "bid,bjd->bij"}> : () -> ()
    %cst_23 = arith.constant dense<0.000000e+00> : vector<2x56x56xf32>
    %62 = tpu.matmul %59, %60, %cst_23 {dimension_numbers = #tpu.dot_dimension_numbers<[2], [2], [1], [1], [0, 0, 0, 1, 1, 1], [0], [0]>} : vector<2x56x8xf32>, vector<2x56x8xf32>, vector<2x56x56xf32> -> vector<2x56x56xf32>
    "tpu.trace_stop"() : () -> ()
    %cst_24 = arith.constant 0.353553385 : f32
    %63 = vector.broadcast %cst_24 : f32 to vector<2x56x56xf32>
    %64 = arith.mulf %62, %63 : vector<2x56x56xf32>
    %cst_25 = arith.constant -1.000000e+30 : f32
    %65 = vector.shape_cast %38 : vector<1x1x56xi1> to vector<1x1x56xi1>
    %66 = vector.broadcast %65 : vector<1x1x56xi1> to vector<2x56x56xi1>
    %67 = vector.broadcast %cst_25 : f32 to vector<2x56x56xf32>
    %68 = arith.select %66, %64, %67 : vector<2x56x56xi1>, vector<2x56x56xf32>
    %cst_26 = arith.constant dense<0xFF800000> : vector<2x56xf32>
    %69 = vector.multi_reduction <maximumf>, %68, %cst_26 [2] : vector<2x56x56xf32> to vector<2x56xf32>
    %70 = vector.shape_cast %69 : vector<2x56xf32> to vector<2x56x1xf32>
    %71 = vector.broadcast %70 : vector<2x56x1xf32> to vector<2x56x56xf32>
    %72 = arith.subf %68, %71 : vector<2x56x56xf32>
    %73 = math.exp %72 : vector<2x56x56xf32>
    %cst_27 = arith.constant dense<0.000000e+00> : vector<2x56xf32>
    %74 = vector.multi_reduction <add>, %73, %cst_27 [2] : vector<2x56x56xf32> to vector<2x56xf32>
    %75 = vector.shape_cast %74 : vector<2x56xf32> to vector<2x56x1xf32>
    %76 = vector.broadcast %75 : vector<2x56x1xf32> to vector<2x56x56xf32>
    %77 = arith.divf %73, %76 : vector<2x56x56xf32>
    "tpu.trace_start"() <{level = 10 : i32, message = "bij,bjd->bid"}> : () -> ()
    %cst_28 = arith.constant dense<0.000000e+00> : vector<2x56x8xf32>
    %78 = tpu.matmul %77, %61, %cst_28 {dimension_numbers = #tpu.dot_dimension_numbers<[2], [1], [1], [2], [0, 0, 0, 1, 1, 2], [0], [0]>} : vector<2x56x56xf32>, vector<2x56x8xf32>, vector<2x56x8xf32> -> vector<2x56x8xf32>
    "tpu.trace_stop"() : () -> ()
    %79 = vector.extract_strided_slice %35 {offsets = [0, 0, 16], sizes = [2, 56, 8], strides = [1, 1, 1]} : vector<2x56x96xf32> to vector<2x56x8xf32>
    %80 = vector.extract_strided_slice %35 {offsets = [0, 0, 48], sizes = [2, 56, 8], strides = [1, 1, 1]} : vector<2x56x96xf32> to vector<2x56x8xf32>
    %81 = vector.extract_strided_slice %35 {offsets = [0, 0, 80], sizes = [2, 56, 8], strides = [1, 1, 1]} : vector<2x56x96xf32> to vector<2x56x8xf32>
    "tpu.trace_start"() <{level = 10 : i32, message = "bid,bjd->bij"}> : () -> ()
    %cst_29 = arith.constant dense<0.000000e+00> : vector<2x56x56xf32>
    %82 = tpu.matmul %79, %80, %cst_29 {dimension_numbers = #tpu.dot_dimension_numbers<[2], [2], [1], [1], [0, 0, 0, 1, 1, 1], [0], [0]>} : vector<2x56x8xf32>, vector<2x56x8xf32>, vector<2x56x56xf32> -> vector<2x56x56xf32>
    "tpu.trace_stop"() : () -> ()
    %cst_30 = arith.constant 0.353553385 : f32
    %83 = vector.broadcast %cst_30 : f32 to vector<2x56x56xf32>
    %84 = arith.mulf %82, %83 : vector<2x56x56xf32>
    %cst_31 = arith.constant -1.000000e+30 : f32
    %85 = vector.shape_cast %38 : vector<1x1x56xi1> to vector<1x1x56xi1>
    %86 = vector.broadcast %85 : vector<1x1x56xi1> to vector<2x56x56xi1>
    %87 = vector.broadcast %cst_31 : f32 to vector<2x56x56xf32>
    %88 = arith.select %86, %84, %87 : vector<2x56x56xi1>, vector<2x56x56xf32>
    %cst_32 = arith.constant dense<0xFF800000> : vector<2x56xf32>
    %89 = vector.multi_reduction <maximumf>, %88, %cst_32 [2] : vector<2x56x56xf32> to vector<2x56xf32>
    %90 = vector.shape_cast %89 : vector<2x56xf32> to vector<2x56x1xf32>
    %91 = vector.broadcast %90 : vector<2x56x1xf32> to vector<2x56x56xf32>
    %92 = arith.subf %88, %91 : vector<2x56x56xf32>
    %93 = math.exp %92 : vector<2x56x56xf32>
    %cst_33 = arith.constant dense<0.000000e+00> : vector<2x56xf32>
    %94 = vector.multi_reduction <add>, %93, %cst_33 [2] : vector<2x56x56xf32> to vector<2x56xf32>
    %95 = vector.shape_cast %94 : vector<2x56xf32> to vector<2x56x1xf32>
    %96 = vector.broadcast %95 : vector<2x56x1xf32> to vector<2x56x56xf32>
    %97 = arith.divf %93, %96 : vector<2x56x56xf32>
    "tpu.trace_start"() <{level = 10 : i32, message = "bij,bjd->bid"}> : () -> ()
    %cst_34 = arith.constant dense<0.000000e+00> : vector<2x56x8xf32>
    %98 = tpu.matmul %97, %81, %cst_34 {dimension_numbers = #tpu.dot_dimension_numbers<[2], [1], [1], [2], [0, 0, 0, 1, 1, 2], [0], [0]>} : vector<2x56x56xf32>, vector<2x56x8xf32>, vector<2x56x8xf32> -> vector<2x56x8xf32>
    "tpu.trace_stop"() : () -> ()
    %99 = vector.extract_strided_slice %35 {offsets = [0, 0, 24], sizes = [2, 56, 8], strides = [1, 1, 1]} : vector<2x56x96xf32> to vector<2x56x8xf32>
    %100 = vector.extract_strided_slice %35 {offsets = [0, 0, 56], sizes = [2, 56, 8], strides = [1, 1, 1]} : vector<2x56x96xf32> to vector<2x56x8xf32>
    %101 = vector.extract_strided_slice %35 {offsets = [0, 0, 88], sizes = [2, 56, 8], strides = [1, 1, 1]} : vector<2x56x96xf32> to vector<2x56x8xf32>
    "tpu.trace_start"() <{level = 10 : i32, message = "bid,bjd->bij"}> : () -> ()
    %cst_35 = arith.constant dense<0.000000e+00> : vector<2x56x56xf32>
    %102 = tpu.matmul %99, %100, %cst_35 {dimension_numbers = #tpu.dot_dimension_numbers<[2], [2], [1], [1], [0, 0, 0, 1, 1, 1], [0], [0]>} : vector<2x56x8xf32>, vector<2x56x8xf32>, vector<2x56x56xf32> -> vector<2x56x56xf32>
    "tpu.trace_stop"() : () -> ()
    %cst_36 = arith.constant 0.353553385 : f32
    %103 = vector.broadcast %cst_36 : f32 to vector<2x56x56xf32>
    %104 = arith.mulf %102, %103 : vector<2x56x56xf32>
    %cst_37 = arith.constant -1.000000e+30 : f32
    %105 = vector.shape_cast %38 : vector<1x1x56xi1> to vector<1x1x56xi1>
    %106 = vector.broadcast %105 : vector<1x1x56xi1> to vector<2x56x56xi1>
    %107 = vector.broadcast %cst_37 : f32 to vector<2x56x56xf32>
    %108 = arith.select %106, %104, %107 : vector<2x56x56xi1>, vector<2x56x56xf32>
    %cst_38 = arith.constant dense<0xFF800000> : vector<2x56xf32>
    %109 = vector.multi_reduction <maximumf>, %108, %cst_38 [2] : vector<2x56x56xf32> to vector<2x56xf32>
    %110 = vector.shape_cast %109 : vector<2x56xf32> to vector<2x56x1xf32>
    %111 = vector.broadcast %110 : vector<2x56x1xf32> to vector<2x56x56xf32>
    %112 = arith.subf %108, %111 : vector<2x56x56xf32>
    %113 = math.exp %112 : vector<2x56x56xf32>
    %cst_39 = arith.constant dense<0.000000e+00> : vector<2x56xf32>
    %114 = vector.multi_reduction <add>, %113, %cst_39 [2] : vector<2x56x56xf32> to vector<2x56xf32>
    %115 = vector.shape_cast %114 : vector<2x56xf32> to vector<2x56x1xf32>
    %116 = vector.broadcast %115 : vector<2x56x1xf32> to vector<2x56x56xf32>
    %117 = arith.divf %113, %116 : vector<2x56x56xf32>
    "tpu.trace_start"() <{level = 10 : i32, message = "bij,bjd->bid"}> : () -> ()
    %cst_40 = arith.constant dense<0.000000e+00> : vector<2x56x8xf32>
    %118 = tpu.matmul %117, %101, %cst_40 {dimension_numbers = #tpu.dot_dimension_numbers<[2], [1], [1], [2], [0, 0, 0, 1, 1, 2], [0], [0]>} : vector<2x56x56xf32>, vector<2x56x8xf32>, vector<2x56x8xf32> -> vector<2x56x8xf32>
    "tpu.trace_stop"() : () -> ()
    %119 = tpu.concatenate %58, %78, %98, %118 in 2 : vector<2x56x8xf32>, vector<2x56x8xf32>, vector<2x56x8xf32>, vector<2x56x8xf32> -> vector<2x56x32xf32>
    %120 = vector.shape_cast %119 : vector<2x56x32xf32> to vector<112x32xf32>
    %c0_41 = arith.constant 0 : index
    %c0_42 = arith.constant 0 : index
    %c0_43 = arith.constant 0 : index
    %121 = vector.load %arg10[%c0_41, %c0_42, %c0_43] : memref<1x32x32xf32, #tpu.memory_space<vmem>>, vector<1x32x32xf32>
    %122 = vector.shape_cast %121 : vector<1x32x32xf32> to vector<32x32xf32>
    %cst_44 = arith.constant dense<0.000000e+00> : vector<112x32xf32>
    %123 = tpu.matmul %120, %122, %cst_44 {dimension_numbers = #tpu.dot_dimension_numbers<[1], [0], [0], [1], [0, 0, 1, 1], [], []>} : vector<112x32xf32>, vector<32x32xf32>, vector<112x32xf32> -> vector<112x32xf32>
    %124 = arith.addf %5, %123 : vector<112x32xf32>
    %c0_45 = arith.constant 0 : index
    %c0_46 = arith.constant 0 : index
    %c0_47 = arith.constant 0 : index
    %125 = vector.load %arg11[%c0_45, %c0_46, %c0_47] : memref<1x1x32xf32, #tpu.memory_space<vmem>>, vector<1x1x32xf32>
    %126 = vector.shape_cast %125 : vector<1x1x32xf32> to vector<1x32xf32>
    %127 = vector.broadcast %126 : vector<1x32xf32> to vector<112x32xf32>
    %128 = arith.addf %124, %127 : vector<112x32xf32>
    %c0_48 = arith.constant 0 : index
    %c0_49 = arith.constant 0 : index
    %c0_50 = arith.constant 0 : index
    %129 = vector.load %arg12[%c0_48, %c0_49, %c0_50] : memref<1x1x32xf32, #tpu.memory_space<vmem>>, vector<1x1x32xf32>
    %130 = vector.shape_cast %129 : vector<1x1x32xf32> to vector<1x32xf32>
    %c0_51 = arith.constant 0 : index
    %c0_52 = arith.constant 0 : index
    %c0_53 = arith.constant 0 : index
    %131 = vector.load %arg13[%c0_51, %c0_52, %c0_53] : memref<1x1x32xf32, #tpu.memory_space<vmem>>, vector<1x1x32xf32>
    %132 = vector.shape_cast %131 : vector<1x1x32xf32> to vector<1x32xf32>
    %cst_54 = arith.constant dense<0.000000e+00> : vector<112xf32>
    %133 = vector.multi_reduction <add>, %128, %cst_54 [1] : vector<112x32xf32> to vector<112xf32>
    %134 = vector.shape_cast %133 : vector<112xf32> to vector<112x1xf32>
    %cst_55 = arith.constant 3.200000e+01 : f32
    %135 = vector.broadcast %cst_55 : f32 to vector<112x1xf32>
    %136 = arith.divf %134, %135 : vector<112x1xf32>
    %137 = vector.broadcast %136 : vector<112x1xf32> to vector<112x32xf32>
    %138 = arith.subf %128, %137 : vector<112x32xf32>
    %139 = arith.mulf %138, %138 : vector<112x32xf32>
    %cst_56 = arith.constant dense<0.000000e+00> : vector<112xf32>
    %140 = vector.multi_reduction <add>, %139, %cst_56 [1] : vector<112x32xf32> to vector<112xf32>
    %141 = vector.shape_cast %140 : vector<112xf32> to vector<112x1xf32>
    %cst_57 = arith.constant 3.200000e+01 : f32
    %142 = vector.broadcast %cst_57 : f32 to vector<112x1xf32>
    %143 = arith.divf %141, %142 : vector<112x1xf32>
    %144 = vector.broadcast %136 : vector<112x1xf32> to vector<112x32xf32>
    %145 = arith.subf %128, %144 : vector<112x32xf32>
    %cst_58 = arith.constant 9.99999974E-6 : f32
    %146 = vector.broadcast %cst_58 : f32 to vector<112x1xf32>
    %147 = arith.addf %143, %146 : vector<112x1xf32>
    %148 = math.rsqrt %147 : vector<112x1xf32>
    %149 = vector.broadcast %148 : vector<112x1xf32> to vector<112x32xf32>
    %150 = arith.mulf %145, %149 : vector<112x32xf32>
    %151 = vector.broadcast %130 : vector<1x32xf32> to vector<112x32xf32>
    %152 = arith.mulf %150, %151 : vector<112x32xf32>
    %153 = vector.broadcast %132 : vector<1x32xf32> to vector<112x32xf32>
    %154 = arith.addf %152, %153 : vector<112x32xf32>
    %c0_59 = arith.constant 0 : index
    %c0_60 = arith.constant 0 : index
    %c0_61 = arith.constant 0 : index
    %155 = vector.load %arg14[%c0_59, %c0_60, %c0_61] : memref<1x32x64xf32, #tpu.memory_space<vmem>>, vector<1x32x64xf32>
    %156 = vector.shape_cast %155 : vector<1x32x64xf32> to vector<32x64xf32>
    %cst_62 = arith.constant dense<0.000000e+00> : vector<112x64xf32>
    %157 = tpu.matmul %154, %156, %cst_62 {dimension_numbers = #tpu.dot_dimension_numbers<[1], [0], [0], [1], [0, 0, 1, 1], [], []>} : vector<112x32xf32>, vector<32x64xf32>, vector<112x64xf32> -> vector<112x64xf32>
    %c0_63 = arith.constant 0 : index
    %c0_64 = arith.constant 0 : index
    %c0_65 = arith.constant 0 : index
    %158 = vector.load %arg15[%c0_63, %c0_64, %c0_65] : memref<1x1x64xf32, #tpu.memory_space<vmem>>, vector<1x1x64xf32>
    %159 = vector.shape_cast %158 : vector<1x1x64xf32> to vector<1x64xf32>
    %160 = vector.broadcast %159 : vector<1x64xf32> to vector<112x64xf32>
    %161 = arith.addf %157, %160 : vector<112x64xf32>
    %cst_66 = arith.constant 5.000000e-01 : f32
    %162 = vector.broadcast %cst_66 : f32 to vector<112x64xf32>
    %163 = arith.mulf %162, %161 : vector<112x64xf32>
    %cst_67 = arith.constant 0.707106769 : f32
    %164 = vector.broadcast %cst_67 : f32 to vector<112x64xf32>
    %165 = arith.mulf %161, %164 : vector<112x64xf32>
    %166 = math.absf %165 : vector<112x64xf32>
    %cst_68 = arith.constant 0.327591091 : f32
    %167 = vector.broadcast %cst_68 : f32 to vector<112x64xf32>
    %168 = arith.mulf %167, %166 : vector<112x64xf32>
    %cst_69 = arith.constant 1.000000e+00 : f32
    %169 = vector.broadcast %cst_69 : f32 to vector<112x64xf32>
    %170 = arith.addf %169, %168 : vector<112x64xf32>
    %cst_70 = arith.constant 1.000000e+00 : f32
    %171 = vector.broadcast %cst_70 : f32 to vector<112x64xf32>
    %172 = arith.divf %171, %170 : vector<112x64xf32>
    %cst_71 = arith.constant 1.06140542 : f32
    %173 = vector.broadcast %cst_71 : f32 to vector<112x64xf32>
    %174 = arith.mulf %173, %172 : vector<112x64xf32>
    %cst_72 = arith.constant -1.45315206 : f32
    %175 = vector.broadcast %cst_72 : f32 to vector<112x64xf32>
    %176 = arith.addf %174, %175 : vector<112x64xf32>
    %177 = arith.mulf %176, %172 : vector<112x64xf32>
    %cst_73 = arith.constant 1.42141378 : f32
    %178 = vector.broadcast %cst_73 : f32 to vector<112x64xf32>
    %179 = arith.addf %177, %178 : vector<112x64xf32>
    %180 = arith.mulf %179, %172 : vector<112x64xf32>
    %cst_74 = arith.constant -0.284496725 : f32
    %181 = vector.broadcast %cst_74 : f32 to vector<112x64xf32>
    %182 = arith.addf %180, %181 : vector<112x64xf32>
    %183 = arith.mulf %182, %172 : vector<112x64xf32>
    %cst_75 = arith.constant 0.254829586 : f32
    %184 = vector.broadcast %cst_75 : f32 to vector<112x64xf32>
    %185 = arith.addf %183, %184 : vector<112x64xf32>
    %186 = arith.mulf %185, %172 : vector<112x64xf32>
    %cst_76 = arith.constant 0.000000e+00 : f32
    %187 = vector.broadcast %cst_76 : f32 to vector<112x64xf32>
    %188 = arith.subf %187, %166 : vector<112x64xf32>
    %189 = arith.mulf %188, %166 : vector<112x64xf32>
    %190 = math.exp %189 : vector<112x64xf32>
    %191 = arith.mulf %186, %190 : vector<112x64xf32>
    %cst_77 = arith.constant 1.000000e+00 : f32
    %192 = vector.broadcast %cst_77 : f32 to vector<112x64xf32>
    %193 = arith.subf %192, %191 : vector<112x64xf32>
    %cst_78 = arith.constant 0.000000e+00 : f32
    %194 = vector.broadcast %cst_78 : f32 to vector<112x64xf32>
    %195 = arith.cmpf oge, %165, %194 : vector<112x64xf32>
    %cst_79 = arith.constant 0.000000e+00 : f32
    %196 = vector.broadcast %cst_79 : f32 to vector<112x64xf32>
    %197 = arith.subf %196, %193 : vector<112x64xf32>
    %198 = arith.select %195, %193, %197 : vector<112x64xi1>, vector<112x64xf32>
    %cst_80 = arith.constant 1.000000e+00 : f32
    %199 = vector.broadcast %cst_80 : f32 to vector<112x64xf32>
    %200 = arith.addf %199, %198 : vector<112x64xf32>
    %201 = arith.mulf %163, %200 : vector<112x64xf32>
    %c0_81 = arith.constant 0 : index
    %c0_82 = arith.constant 0 : index
    %c0_83 = arith.constant 0 : index
    %202 = vector.load %arg16[%c0_81, %c0_82, %c0_83] : memref<1x64x32xf32, #tpu.memory_space<vmem>>, vector<1x64x32xf32>
    %203 = vector.shape_cast %202 : vector<1x64x32xf32> to vector<64x32xf32>
    %cst_84 = arith.constant dense<0.000000e+00> : vector<112x32xf32>
    %204 = tpu.matmul %201, %203, %cst_84 {dimension_numbers = #tpu.dot_dimension_numbers<[1], [0], [0], [1], [0, 0, 1, 1], [], []>} : vector<112x64xf32>, vector<64x32xf32>, vector<112x32xf32> -> vector<112x32xf32>
    %205 = arith.addf %128, %204 : vector<112x32xf32>
    %c0_85 = arith.constant 0 : index
    %c0_86 = arith.constant 0 : index
    %c0_87 = arith.constant 0 : index
    %206 = vector.load %arg17[%c0_85, %c0_86, %c0_87] : memref<1x1x32xf32, #tpu.memory_space<vmem>>, vector<1x1x32xf32>
    %207 = vector.shape_cast %206 : vector<1x1x32xf32> to vector<1x32xf32>
    %208 = vector.broadcast %207 : vector<1x32xf32> to vector<112x32xf32>
    %209 = arith.addf %205, %208 : vector<112x32xf32>
    %210 = vector.shape_cast %209 : vector<112x32xf32> to vector<2x56x32xf32>
    %c0_88 = arith.constant 0 : index
    %c0_89 = arith.constant 0 : index
    %c0_90 = arith.constant 0 : index
    %211 = vector.load %arg23[%c0_88, %c0_89, %c0_90] : memref<2x56x32xf32, #tpu.memory_space<vmem>>, vector<2x56x32xf32>
    tpu.vector_store %arg23[%c0_88, %c0_89, %c0_90], %210 {strides = array<i32>} : memref<2x56x32xf32, #tpu.memory_space<vmem>>, vector<2x56x32xf32>,
    %c1_i32 = arith.constant 1 : i32
    %212 = arith.cmpi eq, %arg1, %c1_i32 : i32
    %213 = arith.extui %212 : i1 to i32
    %c0_i32_91 = arith.constant 0 : i32
    %214 = arith.cmpi ne, %213, %c0_i32_91 : i32
    scf.if %214 {
      %215 = vector.extract_strided_slice %210 {offsets = [0, 0, 0], sizes = [2, 1, 32], strides = [1, 1, 1]} : vector<2x56x32xf32> to vector<2x1x32xf32>
      %216 = vector.shape_cast %215 : vector<2x1x32xf32> to vector<2x32xf32>
      %c0_92 = arith.constant 0 : index
      %c0_93 = arith.constant 0 : index
      %217 = vector.load %arg18[%c0_92, %c0_93] : memref<1x32xf32, #tpu.memory_space<vmem>>, vector<1x32xf32>
      %c0_94 = arith.constant 0 : index
      %c0_95 = arith.constant 0 : index
      %218 = vector.load %arg19[%c0_94, %c0_95] : memref<1x32xf32, #tpu.memory_space<vmem>>, vector<1x32xf32>
      %cst_96 = arith.constant dense<0.000000e+00> : vector<2xf32>
      %219 = vector.multi_reduction <add>, %216, %cst_96 [1] : vector<2x32xf32> to vector<2xf32>
      %220 = vector.shape_cast %219 : vector<2xf32> to vector<2x1xf32>
      %cst_97 = arith.constant 3.200000e+01 : f32
      %221 = vector.broadcast %cst_97 : f32 to vector<2x1xf32>
      %222 = arith.divf %220, %221 : vector<2x1xf32>
      %223 = vector.broadcast %222 : vector<2x1xf32> to vector<2x32xf32>
      %224 = arith.subf %216, %223 : vector<2x32xf32>
      %225 = arith.mulf %224, %224 : vector<2x32xf32>
      %cst_98 = arith.constant dense<0.000000e+00> : vector<2xf32>
      %226 = vector.multi_reduction <add>, %225, %cst_98 [1] : vector<2x32xf32> to vector<2xf32>
      %227 = vector.shape_cast %226 : vector<2xf32> to vector<2x1xf32>
      %cst_99 = arith.constant 3.200000e+01 : f32
      %228 = vector.broadcast %cst_99 : f32 to vector<2x1xf32>
      %229 = arith.divf %227, %228 : vector<2x1xf32>
      %230 = vector.broadcast %222 : vector<2x1xf32> to vector<2x32xf32>
      %231 = arith.subf %216, %230 : vector<2x32xf32>
      %cst_100 = arith.constant 9.99999974E-6 : f32
      %232 = vector.broadcast %cst_100 : f32 to vector<2x1xf32>
      %233 = arith.addf %229, %232 : vector<2x1xf32>
      %234 = math.rsqrt %233 : vector<2x1xf32>
      %235 = vector.broadcast %234 : vector<2x1xf32> to vector<2x32xf32>
      %236 = arith.mulf %231, %235 : vector<2x32xf32>
      %237 = vector.broadcast %217 : vector<1x32xf32> to vector<2x32xf32>
      %238 = arith.mulf %236, %237 : vector<2x32xf32>
      %239 = vector.broadcast %218 : vector<1x32xf32> to vector<2x32xf32>
      %240 = arith.addf %238, %239 : vector<2x32xf32>
      %c0_101 = arith.constant 0 : index
      %c0_102 = arith.constant 0 : index
      %241 = vector.load %arg20[%c0_101, %c0_102] : memref<32x5xf32, #tpu.memory_space<vmem>>, vector<32x5xf32>
      %cst_103 = arith.constant dense<0.000000e+00> : vector<2x5xf32>
      %242 = tpu.matmul %240, %241, %cst_103 {dimension_numbers = #tpu.dot_dimension_numbers<[1], [0], [0], [1], [0, 0, 1, 1], [], []>} : vector<2x32xf32>, vector<32x5xf32>, vector<2x5xf32> -> vector<2x5xf32>
      %c0_104 = arith.constant 0 : index
      %c0_105 = arith.constant 0 : index
      %243 = vector.load %arg21[%c0_104, %c0_105] : memref<1x5xf32, #tpu.memory_space<vmem>>, vector<1x5xf32>
      %244 = vector.broadcast %243 : vector<1x5xf32> to vector<2x5xf32>
      %245 = arith.addf %242, %244 : vector<2x5xf32>
      %246 = vector.shape_cast %245 : vector<2x5xf32> to vector<1x2x5xf32>
      %c0_106 = arith.constant 0 : index
      %c0_107 = arith.constant 0 : index
      %c0_108 = arith.constant 0 : index
      %247 = vector.load %arg22[%c0_106, %c0_107, %c0_108] : memref<1x2x5xf32, #tpu.memory_space<vmem>>, vector<1x2x5xf32>
      tpu.vector_store %arg22[%c0_106, %c0_107, %c0_108], %246 {strides = array<i32>} : memref<1x2x5xf32, #tpu.memory_space<vmem>>, vector<1x2x5xf32>,
    } else {
    }
    return
  }
  func.func @transform_0(%arg0: i32, %arg1: i32) -> (i32, i32, i32) {
    %c0_i32 = arith.constant 0 : i32
    %c0_i32_0 = arith.constant 0 : i32
    %c0_i32_1 = arith.constant 0 : i32
    return %arg0, %c0_i32, %c0_i32_0 : i32, i32, i32
  }
  func.func @transform_1(%arg0: i32, %arg1: i32) -> (i32, i32) {
    %c0_i32 = arith.constant 0 : i32
    %c0_i32_0 = arith.constant 0 : i32
    %c0_i32_1 = arith.constant 0 : i32
    return %c0_i32, %c0_i32_0 : i32, i32
  }
  func.func @transform_2(%arg0: i32, %arg1: i32) -> (i32, i32) {
    %c0_i32 = arith.constant 0 : i32
    %c0_i32_0 = arith.constant 0 : i32
    %c0_i32_1 = arith.constant 0 : i32
    return %c0_i32, %c0_i32_0 : i32, i32
  }
  func.func @transform_3(%arg0: i32, %arg1: i32) -> (i32, i32, i32) {
    %c0_i32 = arith.constant 0 : i32
    %c0_i32_0 = arith.constant 0 : i32
    %c0_i32_1 = arith.constant 0 : i32
    %c0_i32_2 = arith.constant 0 : i32
    return %c0_i32, %c0_i32_0, %c0_i32_1 : i32, i32, i32
  }
  func.func @transform_4(%arg0: i32, %arg1: i32) -> (i32, i32, i32) {
    %c0_i32 = arith.constant 0 : i32
    %c0_i32_0 = arith.constant 0 : i32
    %c0_i32_1 = arith.constant 0 : i32
    %c0_i32_2 = arith.constant 0 : i32
    return %c0_i32, %c0_i32_0, %c0_i32_1 : i32, i32, i32
  }
  func.func @transform_5(%arg0: i32, %arg1: i32) -> (i32, i32, i32) {
    %c0_i32 = arith.constant 0 : i32
    %c0_i32_0 = arith.constant 0 : i32
    %c0_i32_1 = arith.constant 0 : i32
    return %arg1, %c0_i32, %c0_i32_0 : i32, i32, i32
  }
  func.func @transform_6(%arg0: i32, %arg1: i32) -> (i32, i32, i32) {
    %c0_i32 = arith.constant 0 : i32
    %c0_i32_0 = arith.constant 0 : i32
    %c0_i32_1 = arith.constant 0 : i32
    return %arg1, %c0_i32, %c0_i32_0 : i32, i32, i32
  }
  func.func @transform_7(%arg0: i32, %arg1: i32) -> (i32, i32, i32) {
    %c0_i32 = arith.constant 0 : i32
    %c0_i32_0 = arith.constant 0 : i32
    %c0_i32_1 = arith.constant 0 : i32
    return %arg1, %c0_i32, %c0_i32_0 : i32, i32, i32
  }
  func.func @transform_8(%arg0: i32, %arg1: i32) -> (i32, i32, i32) {
    %c0_i32 = arith.constant 0 : i32
    %c0_i32_0 = arith.constant 0 : i32
    %c0_i32_1 = arith.constant 0 : i32
    return %arg1, %c0_i32, %c0_i32_0 : i32, i32, i32
  }
  func.func @transform_9(%arg0: i32, %arg1: i32) -> (i32, i32, i32) {
    %c0_i32 = arith.constant 0 : i32
    %c0_i32_0 = arith.constant 0 : i32
    %c0_i32_1 = arith.constant 0 : i32
    return %arg1, %c0_i32, %c0_i32_0 : i32, i32, i32
  }
  func.func @transform_10(%arg0: i32, %arg1: i32) -> (i32, i32, i32) {
    %c0_i32 = arith.constant 0 : i32
    %c0_i32_0 = arith.constant 0 : i32
    %c0_i32_1 = arith.constant 0 : i32
    return %arg1, %c0_i32, %c0_i32_0 : i32, i32, i32
  }
  func.func @transform_11(%arg0: i32, %arg1: i32) -> (i32, i32, i32) {
    %c0_i32 = arith.constant 0 : i32
    %c0_i32_0 = arith.constant 0 : i32
    %c0_i32_1 = arith.constant 0 : i32
    return %arg1, %c0_i32, %c0_i32_0 : i32, i32, i32
  }
  func.func @transform_12(%arg0: i32, %arg1: i32) -> (i32, i32, i32) {
    %c0_i32 = arith.constant 0 : i32
    %c0_i32_0 = arith.constant 0 : i32
    %c0_i32_1 = arith.constant 0 : i32
    return %arg1, %c0_i32, %c0_i32_0 : i32, i32, i32
  }
  func.func @transform_13(%arg0: i32, %arg1: i32) -> (i32, i32, i32) {
    %c0_i32 = arith.constant 0 : i32
    %c0_i32_0 = arith.constant 0 : i32
    %c0_i32_1 = arith.constant 0 : i32
    return %arg1, %c0_i32, %c0_i32_0 : i32, i32, i32
  }
  func.func @transform_14(%arg0: i32, %arg1: i32) -> (i32, i32, i32) {
    %c0_i32 = arith.constant 0 : i32
    %c0_i32_0 = arith.constant 0 : i32
    %c0_i32_1 = arith.constant 0 : i32
    return %arg1, %c0_i32, %c0_i32_0 : i32, i32, i32
  }
  func.func @transform_15(%arg0: i32, %arg1: i32) -> (i32, i32, i32) {
    %c0_i32 = arith.constant 0 : i32
    %c0_i32_0 = arith.constant 0 : i32
    %c0_i32_1 = arith.constant 0 : i32
    return %arg1, %c0_i32, %c0_i32_0 : i32, i32, i32
  }
  func.func @transform_16(%arg0: i32, %arg1: i32) -> (i32, i32) {
    %c0_i32 = arith.constant 0 : i32
    %c0_i32_0 = arith.constant 0 : i32
    %c0_i32_1 = arith.constant 0 : i32
    return %c0_i32, %c0_i32_0 : i32, i32
  }
  func.func @transform_17(%arg0: i32, %arg1: i32) -> (i32, i32) {
    %c0_i32 = arith.constant 0 : i32
    %c0_i32_0 = arith.constant 0 : i32
    %c0_i32_1 = arith.constant 0 : i32
    return %c0_i32, %c0_i32_0 : i32, i32
  }
  func.func @transform_18(%arg0: i32, %arg1: i32) -> (i32, i32) {
    %c0_i32 = arith.constant 0 : i32
    %c0_i32_0 = arith.constant 0 : i32
    %c0_i32_1 = arith.constant 0 : i32
    return %c0_i32, %c0_i32_0 : i32, i32
  }
  func.func @transform_19(%arg0: i32, %arg1: i32) -> (i32, i32) {
    %c0_i32 = arith.constant 0 : i32
    %c0_i32_0 = arith.constant 0 : i32
    %c0_i32_1 = arith.constant 0 : i32
    return %c0_i32, %c0_i32_0 : i32, i32
  }
  func.func @transform_20(%arg0: i32, %arg1: i32) -> (i32, i32, i32) {
    %c0_i32 = arith.constant 0 : i32
    %c0_i32_0 = arith.constant 0 : i32
    %c0_i32_1 = arith.constant 0 : i32
    return %arg0, %c0_i32, %c0_i32_0 : i32, i32, i32
  }
}

</mosaic_0001>

<bundles_post_ra>
// kernel: tpu_custom_call.1
= control target key start
LH: loop header
LB: loop body
LE: loop exit
PB: predicated region body
PF: predicated region fallthrough
CT: control target
= control target key end

     0   :  { %s11593_s0 = inlined_call_operand.vmem [shape: f32[2,56,72], index: 0, kind: input, shape index: {}]   ;;  %s11594_s1 = inlined_call_operand.vmem [shape: f32[72,32], index: 1, kind: input, shape index: {}]   ;;  %s11595_s2 = inlined_call_operand.vmem [shape: f32[1,32], index: 2, kind: input, shape index: {}]   ;;  %s11596_s3 = inlined_call_operand.vmem [shape: f32[1,1,32], index: 3, kind: input, shape index: {}]   ;;  %s11597_s4 = inlined_call_operand.vmem [shape: f32[1,56,32], index: 4, kind: input, shape index: {}]   ;;  %s11598_s5 = inlined_call_operand.vmem [shape: f32[2,1,32], index: 5, kind: input, shape index: {}]   ;;  %s11599_s6 = inlined_call_operand.vmem [shape: f32[2,1,32], index: 6, kind: input, shape index: {}]   ;;  %s11600_s7 = inlined_call_operand.vmem [shape: f32[2,32,96], index: 7, kind: input, shape index: {}]   ;;  %s11601_s8 = inlined_call_operand.vmem [shape: f32[2,32,32], index: 8, kind: input, shape index: {}]   ;;  %s11602_s9 = inlined_call_operand.vmem [shape: f32[2,1,32], index: 9, kind: input, shape index: {}]   ;;  %s11603_s10 = inlined_call_operand.vmem [shape: f32[2,1,32], index: 10, kind: input, shape index: {}]   ;;  %s11604_s11 = inlined_call_operand.vmem [shape: f32[2,1,32], index: 11, kind: input, shape index: {}]   ;;  %s11605_s12 = inlined_call_operand.vmem [shape: f32[2,32,64], index: 12, kind: input, shape index: {}]   ;;  %s11606_s13 = inlined_call_operand.vmem [shape: f32[2,1,64], index: 13, kind: input, shape index: {}]   ;;  %s11607_s14 = inlined_call_operand.vmem [shape: f32[2,64,32], index: 14, kind: input, shape index: {}]   ;;  %s11608_s15 = inlined_call_operand.vmem [shape: f32[2,1,32], index: 15, kind: input, shape index: {}]   ;;  %s11609_s16 = inlined_call_operand.vmem [shape: f32[1,32], index: 16, kind: input, shape index: {}]   ;;  %s11610_s17 = inlined_call_operand.vmem [shape: f32[1,32], index: 17, kind: input, shape index: {}]   ;;  %s11611_s18 = inlined_call_operand.vmem [shape: f32[32,5], index: 18, kind: input, shape index: {}]   ;;  %s11612_s19 = inlined_call_operand.vmem [shape: f32[1,5], index: 19, kind: input, shape index: {}]   ;;  %s11613_s20 = inlined_call_operand.hbm [shape: f32[1,2,5], index: 20, kind: output, shape index: {}]  }
   0x1   :  { %11624 = sst [smem:[#allocation31_spill]] %s11593_s0 }
   0x2   :  { %11625 = sst [smem:[#allocation32_spill]] %s11594_s1 }
   0x3   :  { %11626 = sst [smem:[#allocation33_spill]] %s11595_s2 }
   0x4   :  { %11627 = sst [smem:[#allocation34_spill]] %s11596_s3 }
   0x5   :  { %11628 = sst [smem:[#allocation35_spill]] %s11597_s4 }
   0x6   :  { %11629 = sst [smem:[#allocation36_spill]] %s11600_s7 }
   0x7   :  { %11630 = sst [smem:[#allocation37_spill]] %s11601_s8 }
   0x8   :  { %11631 = sst [smem:[#allocation38_spill]] %s11609_s16 }
   0x9   :  { %11632 = sst [smem:[#allocation39_spill]] %s11610_s17 }
   0xa   :  { %11633 = sst [smem:[#allocation40_spill]] %s11612_s19 }
   0xb   :  { %11634 = sst [smem:[#allocation41_spill]] %s11613_s20 }
   0xc   :  { %25 = vsyncpa [#allocation4], 0  ;;  %s8851_s1 = smov 0   ;;  %s8853_s22 = smov 0  }
   0xd   :  { %s8855_s23 = smov 0  }
   0xe LB: > { %11635 = sst [smem:[#allocation6_spill]] %s8719_s22  ;;  %s40_s2 = sadd.s32 1, %s8719_s22  ;;  %s8723_s23 = sphi %s8855_s23, %s31_s23   ;;  %s8719_s22 = sphi %s8853_s22, %s11706_s22   ;;  %s8715_s1 = sphi %s8851_s1, %s11705_s1  }
   0xf   : > { %11636 = sst [smem:[#allocation7_spill]] %s8723_s23  ;;  %p41_p0 = scmp.ge.s32.totalorder %s40_s2, 2 }
  0x10   : > { %p6452_p1 = scmp.ge.s32.totalorder %s8723_s23, 1  ;;  %p673_p2 = scmp.lt.s32.totalorder %s8723_s23, 3 }
  0x11   : > { %s11708_s2 = smov (%p41_p0, %s40_s2), 0 }
  0x12   : > { %11637 = sst [smem:[#allocation8_spill]] %s11708_s2  ;;  %p674_p3 = pnand %p6452_p1, %p673_p2 }
  0x14   : > { %677 = sbr.rel (%p674_p3) target bundleno = 5389 (0x150d), region = 100 }
  0x1b   : > { %p775_p4 = scmp.lt.s32.totalorder %s8715_s1, 1  ;;  %v816_v0 = vlaneseq  ;;  %s11638_s7 = sld [smem:[#allocation36_spill]] }
  0x1c   : > { %s11639_s8 = sld [smem:[#allocation37_spill]]  ;;  %p6461_p5 = scmp.ne.s32.totalorder %s8715_s1, 0 }
  0x1d   : > { %s8874_s25 = scalar_select %p775_p4, %s8715_s1, 1  ;;  %v8877_v1 = vshrl.u32 %v816_v0, 7 }
  0x1e   : > { %827 = sbr.rel (%p6461_p5) target bundleno = 293 (0x125), region = 104  ;;  %s11641_s21 = sld [smem:[#allocation31_spill]] (!%p6461_p5)  ;;  %vm858_vm0 = vcmask (!%p6461_p5), 588800   ;;  %vm1134_vm2 = vcmask (!%p6461_p5), 261120  }
  0x1f   : > { %v8888_v2 = vadd.s32 48, %v8877_v1  ;;  %s6718_s30 = sshll.u32 %s8874_s25, 5  ;;  %s799_s17 = scalar_lea.vmem %s11604_s11, %s8874_s25  ;;  %vm1036_vm1 = vcmp.eq.s32.totalorder (!%p6461_p5), %v8877_v1, 0 }
  0x20   : > { %s8916_s24 = scalar_lea.vmem %s11605_s12, %s6718_s30  ;;  %s6721_s23 = sshll.u32 %s8874_s25, 6 }
  0x21   : > { %s8898_s20 = scalar_lea.vmem %s11638_s7, %s6718_s30  ;;  %s807_s7 = scalar_lea.vmem %s11606_s13, %s8874_s25  ;;  %vm1084_vm3 = vcmp.lt.s32.totalorder (!%p6461_p5), %v8888_v2, 51 }
  0x22   : > { %s8903_s26 = scalar_lea.vmem %s11639_s8, %s6718_s30  ;;  %s815_s16 = scalar_lea.vmem %s11608_s15, %s8874_s25 }
  0x23   : > { %s8930_s29 = scalar_lea.vmem %s11607_s14, %s6721_s23  ;;  %s11640_s30 = sld [smem:[#allocation32_spill]] (!%p6461_p5) }
  0x24   : > { %v828_v11 = vld [vmem:[%s11641_s21] sm:$0xff] (!%p6461_p5)  ;;  %v829_v18 = vld [vmem:[%s11641_s21 + $0x8] sm:$0xff] (!%p6461_p5)  ;;  %v830_v20 = vld [vmem:[%s11641_s21 + $0x10] sm:$0xff] (!%p6461_p5)  ;;  %s11642_s23 = sld [smem:[#allocation33_spill]] (!%p6461_p5)  ;;  %s11643_s19 = sld [smem:[#allocation35_spill]] (!%p6461_p5) }
  0x25   : > { %v836_v12 = vld [vmem:[%s11641_s21 + $0x40] sm:$0xff]  ;;  %7068 = vmatprep.mubr.msk.f32.mxu0 %vm858_vm0, %v828_v11  ;;  %v837_v19 = vld [vmem:[%s11641_s21 + $0x48] sm:$0xff]  ;;  %v838_v21 = vld [vmem:[%s11641_s21 + $0x50] sm:$0xff]  ;;  %s11644_s8 = sld [smem:[#allocation34_spill]] }
  0x26   : > { %7080 = vmatprep.mubr.msk.f32.mxu1 %vm858_vm0, %v836_v12  ;;  %v831_v22 = vld [vmem:[%s11641_s21 + $0x18] sm:$0xff]  ;;  %v832_v24 = vld [vmem:[%s11641_s21 + $0x20] sm:$0xff]  ;;  %v833_v26 = vld [vmem:[%s11641_s21 + $0x28] sm:$0xff] }
  0x27   : > { %v839_v23 = vld [vmem:[%s11641_s21 + $0x58] sm:$0xff]  ;;  %v840_v25 = vld [vmem:[%s11641_s21 + $0x60] sm:$0xff]  ;;  %v841_v27 = vld [vmem:[%s11641_s21 + $0x68] sm:$0xff] }
  0x28   : > { %v834_v28 = vld [vmem:[%s11641_s21 + $0x30] sm:$0xff]  ;;  %v835_v29 = vld [vmem:[%s11641_s21 + $0x38] sm:$0xff] }
  0x29   : > { %v842_v3 = vld [vmem:[%s11640_s30] sm:$0xff]  ;;  %v843_v4 = vld [vmem:[%s11640_s30 + $0x8] sm:$0xff]  ;;  %v844_v5 = vld [vmem:[%s11640_s30 + $0x10] sm:$0xff] }
  0x2a   : > { %v7784_v6 = vpack.c.bf16 %v843_v4, %v842_v3  ;;  %v845_v7 = vld [vmem:[%s11640_s30 + $0x18] sm:$0xff]  ;;  %v846_v9 = vld [vmem:[%s11640_s30 + $0x20] sm:$0xff]  ;;  %v847_v10 = vld [vmem:[%s11640_s30 + $0x28] sm:$0xff] }
  0x2b   : > { %v7788_v8 = vpack.c.bf16 %v845_v7, %v844_v5  ;;  %v7792_v13 = vpack.c.bf16 %v847_v10, %v846_v9  ;;  %v848_v14 = vld [vmem:[%s11640_s30 + $0x30] sm:$0xff]  ;;  %v849_v15 = vld [vmem:[%s11640_s30 + $0x38] sm:$0xff]  ;;  %v850_v17 = vld [vmem:[%s11640_s30 + $0x40] sm:$0xff] }
  0x2c   : > { %7785 = vmatprep.subr.bf16.mxu0 %v7784_v6  ;;  %8014 = vmatprep.subr.bf16.mxu1 %v7784_v6  ;;  %v7796_v16 = vpack.c.bf16 %v849_v15, %v848_v14  ;;  %v9019_v30 = vld [vmem:[%s11642_s23] ss:$0 sm:$0xff]  ;;  %v1114_v32 = vld [vmem:[%s11643_s19 + $0x8] sm:$0xff]  ;;  %v1115_v34 = vld [vmem:[%s11643_s19 + $0x10] sm:$0xff] }
  0x2d   : > { %7787 = vmatpush3.bf16.msra.mxu0 %v7784_v6  ;;  %8019 = vmatpush3.bf16.msra.mxu1 %v7784_v6  ;;  %v6477_v37 = vld [vmem:[%s11644_s8] ss:$0 sm:$0xff]  ;;  %v1116_v47 = vld [vmem:[%s11643_s19 + $0x18] sm:$0xff]  ;;  %v1118_v62 = vld [vmem:[%s11643_s19 + $0x28] sm:$0xff] }
  0x2e   : > { %7789 = vmatprep.subr.bf16.mxu0 %v7788_v8  ;;  %8015 = vmatprep.subr.bf16.mxu1 %v7788_v8  ;;  %v1113_v41 = vld [vmem:[%s11643_s19] sm:$0xff]  ;;  %v1119_v7 = vld [vmem:[%s11643_s19 + $0x30] sm:$0xff] }
  0x2f   : > { %v1117_v50 = vld [vmem:[%s11643_s19 + $0x20] sm:$0xff] }
  0x31   : > { %7791 = vmatpush3.bf16.msra.mxu0 %v7788_v8  ;;  %8020 = vmatpush3.bf16.msra.mxu1 %v7788_v8 }
  0x32   : > { %7793 = vmatprep.subr.bf16.mxu0 %v7792_v13  ;;  %8016 = vmatprep.subr.bf16.mxu1 %v7792_v13 }
  0x35   : > { %7795 = vmatpush3.bf16.msra.mxu0 %v7792_v13  ;;  %8021 = vmatpush3.bf16.msra.mxu1 %v7792_v13 }
  0x36   : > { %7797 = vmatprep.subr.bf16.mxu0 %v7796_v16  ;;  %8017 = vmatprep.subr.bf16.mxu1 %v7796_v16 }
  0x39   : > { %7799 = vmatpush3.bf16.msra.mxu0 %v7796_v16  ;;  %8022 = vmatpush3.bf16.msra.mxu1 %v7796_v16 }
  0x3a   : > { %7066 = vmatprep.subr.mxu0 %v850_v17  ;;  %8018 = vmatprep.subr.mxu1 %v850_v17 }
  0x3d   : > { %7067 = vmatpush3.msra.mxu0 %v850_v17  ;;  %8023 = vmatpush3.msra.mxu1 %v850_v17 }
  0x3e   : > { %7069 = vmatmul.mubr.msk.f32.vlgmr.msra.gmra.mrb[0].mxu0 %vm858_vm0, %v829_v18  ;;  %7081 = vmatmul.mubr.msk.f32.vlgmr.msra.gmra.mrb[0].mxu1 %vm858_vm0, %v837_v19 }
  0x3f   : > { %7071 = vmatprep.mubr.msk.f32.mxu0 %vm858_vm0, %v830_v20  ;;  %7083 = vmatprep.mubr.msk.f32.mxu1 %vm858_vm0, %v838_v21 }
  0x42   : > { %7072 = vmatmul.mubr.msk.f32.gmra.mrb[2].mxu0 %vm858_vm0, %v831_v22  ;;  %7084 = vmatmul.mubr.msk.f32.gmra.mrb[2].mxu1 %vm858_vm0, %v839_v23 }
  0x43   : > { %7074 = vmatprep.mubr.msk.f32.mxu0 %vm858_vm0, %v832_v24  ;;  %7086 = vmatprep.mubr.msk.f32.mxu1 %vm858_vm0, %v840_v25 }
  0x46   : > { %7075 = vmatmul.mubr.msk.f32.gmra.mrb[4].mxu0 %vm858_vm0, %v833_v26  ;;  %7087 = vmatmul.mubr.msk.f32.gmra.mrb[4].mxu1 %vm858_vm0, %v841_v27 }
  0x47   : > { %7077 = vmatprep.mubr.msk.f32.mxu0 %vm858_vm0, %v834_v28 }
  0x4a   : > { %7078 = vmatmul.mubr.msk.f32.gmra.mrb[6].mxu0 %vm858_vm0, %v835_v29 }
 0x111   : > { %v7070_v31 = vpop.f32.mrb[0].mxu0  ;;  %v7082_v33 = vpop.f32.mrb[0].mxu1 }
 0x112   : > { %v973_v35 = vadd.f32 %v7070_v31, %v9019_v30  ;;  %v967_v36 = vpop.f32.mrb[1].mxu0  ;;  %v1013_v38 = vadd.f32 %v7082_v33, %v9019_v30  ;;  %v1007_v39 = vpop.f32.mrb[1].mxu1 }
 0x113   : > { %v968_v40 = vadd.f32 %v9019_v30, %v967_v36  ;;  %v1008_v42 = vadd.f32 %v9019_v30, %v1007_v39 }
 0x114   : > { %v1121_v43 = vadd.f32 %v1114_v32, %v973_v35  ;;  %v1129_v44 = vadd.f32 %v1115_v34, %v1013_v38 }
 0x115   : > { %v1064_v45 = vsel %vm1036_vm1, %v6477_v37, %v968_v40  ;;  %v7073_v46 = vpop.f32.mrb[2].mxu0  ;;  %v1128_v48 = vadd.f32 %v1114_v32, %v1008_v42  ;;  %v7085_v49 = vpop.f32.mrb[2].mxu1 }
 0x116   : > { %1136 = vst.msk [vmem:[#allocation2 + $0x8] sm:$0xff] %vm1134_vm2, %v1121_v43  ;;  %v1120_v51 = vadd.f32 %v1113_v41, %v1064_v45  ;;  %v983_v52 = vadd.f32 %v7073_v46, %v9019_v30  ;;  %1144 = vst.msk [vmem:[#allocation2 + $0x48] sm:$0xff] %vm1134_vm2, %v1129_v44  ;;  %v977_v53 = vpop.f32.mrb[3].mxu0  ;;  %v1023_v54 = vadd.f32 %v7085_v49, %v9019_v30  ;;  %v1017_v55 = vpop.f32.mrb[3].mxu1 }
 0x117   : > { %v978_v56 = vadd.f32 %v9019_v30, %v977_v53  ;;  %1143 = vst.msk [vmem:[#allocation2 + $0x40] sm:$0xff] %vm1134_vm2, %v1128_v48  ;;  %v1018_v57 = vadd.f32 %v9019_v30, %v1017_v55 }
 0x118   : > { %1135 = vst.msk [vmem:[#allocation2] sm:$0xff] %vm1134_vm2, %v1120_v51  ;;  %v1123_v58 = vadd.f32 %v1116_v47, %v983_v52  ;;  %v1131_v59 = vadd.f32 %v1117_v50, %v1023_v54 }
 0x119   : > { %v1122_v60 = vadd.f32 %v1115_v34, %v978_v56  ;;  %v7076_v61 = vpop.f32.mrb[4].mxu0  ;;  %v1130_v63 = vadd.f32 %v1116_v47, %v1018_v57  ;;  %v7088_v3 = vpop.f32.mrb[4].mxu1 }
 0x11a   : > { %1138 = vst.msk [vmem:[#allocation2 + $0x18] sm:$0xff] %vm1134_vm2, %v1123_v58  ;;  %v993_v4 = vadd.f32 %v7076_v61, %v9019_v30  ;;  %1146 = vst.msk [vmem:[#allocation2 + $0x58] sm:$0xff] %vm1134_vm2, %v1131_v59  ;;  %v987_v5 = vpop.f32.mrb[5].mxu0  ;;  %v1033_v6 = vadd.f32 %v7088_v3, %v9019_v30  ;;  %v1027_v8 = vpop.f32.mrb[5].mxu1 }
 0x11b   : > { %1137 = vst.msk [vmem:[#allocation2 + $0x10] sm:$0xff] %vm1134_vm2, %v1122_v60  ;;  %v988_v9 = vadd.f32 %v9019_v30, %v987_v5  ;;  %1145 = vst.msk [vmem:[#allocation2 + $0x50] sm:$0xff] %vm1134_vm2, %v1130_v63  ;;  %v1028_v10 = vadd.f32 %v9019_v30, %v1027_v8 }
 0x11c   : > { %v1125_v11 = vadd.f32 %v1118_v62, %v993_v4  ;;  %v1112_v12 = vsel %vm1084_vm3, %v1033_v6, 0.0 }
 0x11d   : > { %v1124_v13 = vadd.f32 %v1117_v50, %v988_v9  ;;  %v7079_v14 = vpop.f32.mrb[6].mxu0  ;;  %v1133_v15 = vadd.f32 %v1119_v7, %v1112_v12  ;;  %v1132_v16 = vadd.f32 %v1118_v62, %v1028_v10 }
 0x11e   : > { %1140 = vst.msk [vmem:[#allocation2 + $0x28] sm:$0xff] %vm1134_vm2, %v1125_v11  ;;  %v1003_v17 = vadd.f32 %v7079_v14, %v9019_v30  ;;  %v997_v18 = vpop.f32.mrb[7].mxu0 }
 0x11f   : > { %1139 = vst.msk [vmem:[#allocation2 + $0x20] sm:$0xff] %vm1134_vm2, %v1124_v13  ;;  %1148 = vst.msk [vmem:[#allocation2 + $0x68] sm:$0xff] %vm1134_vm2, %v1133_v15  ;;  %v998_v19 = vadd.f32 %v9019_v30, %v997_v18 }
 0x120   : > { %1147 = vst.msk [vmem:[#allocation2 + $0x60] sm:$0xff] %vm1134_vm2, %v1132_v16  ;;  %v1071_v20 = vsel %vm1036_vm1, %v6477_v37, %v1003_v17 }
 0x121   : > { %v1127_v21 = vadd.f32 %v1113_v41, %v1071_v20  ;;  %v1105_v22 = vsel %vm1084_vm3, %v998_v19, 0.0 }
 0x122   : > { %v1126_v23 = vadd.f32 %v1119_v7, %v1105_v22 }
 0x123   : > { %1142 = vst.msk [vmem:[#allocation2 + $0x38] sm:$0xff] %vm1134_vm2, %v1127_v21 }
 0x124   : > { %1141 = vst.msk [vmem:[#allocation2 + $0x30] sm:$0xff] %vm1134_vm2, %v1126_v23 }
 0x125 PF: > { %v1149_v24 = vld [vmem:[#allocation2] sm:$0xff]  ;;  %vm1165_vm4 = vcmask 261120   ;;  %v1151_v25 = vld [vmem:[#allocation2 + $0x10] sm:$0xff]  ;;  %v1150_v26 = vld [vmem:[#allocation2 + $0x8] sm:$0xff]  ;;  %s11645_s28 = scalar_lea.vmem %s11598_s5, %s8874_s25  ;;  %s11646_s0 = scalar_lea.vmem %s11599_s6, %s8874_s25  ;;  %vm8727_vm5 = vmmov 0   ;;  %vm1594_vm6 = vcmask 64512  }
 0x126   : > { %v1166_v27 = vsel %vm1165_vm4, %v1149_v24, 0.0  ;;  %v1172_v28 = vsel %vm1165_vm4, %v1151_v25, 0.0  ;;  %v1152_v1 = vld [vmem:[#allocation2 + $0x18] sm:$0xff]  ;;  %v1169_v2 = vsel %vm1165_vm4, %v1150_v26, 0.0  ;;  %v1153_v30 = vld [vmem:[#allocation2 + $0x20] sm:$0xff]  ;;  %v1154_v31 = vld [vmem:[#allocation2 + $0x28] sm:$0xff] }
 0x127   : > { %1167 = vadd.xlane.f32.xlu0 %v1166_v27  ;;  %1173 = vadd.xlane.f32.xlu1 %v1172_v28  ;;  %v1175_v29 = vsel %vm1165_vm4, %v1152_v1, 0.0  ;;  %v1178_v32 = vsel %vm1165_vm4, %v1153_v30, 0.0  ;;  %v1181_v33 = vsel %vm1165_vm4, %v1154_v31, 0.0  ;;  %v9091_v38 = vld [vmem:[#allocation2 + $0x40] sm:$0xff]  ;;  %v9093_v39 = vld [vmem:[#allocation2 + $0x48] sm:$0xff]  ;;  %v9099_v42 = vld [vmem:[#allocation2 + $0x50] sm:$0xff] }
 0x128   : > { %v1190_v40 = vsel %vm1165_vm4, %v9091_v38, 0.0  ;;  %v1193_v41 = vsel %vm1165_vm4, %v9093_v39, 0.0  ;;  %v9101_v43 = vld [vmem:[#allocation2 + $0x58] sm:$0xff]  ;;  %v1196_v44 = vsel %vm1165_vm4, %v9099_v42, 0.0  ;;  %v9107_v46 = vld [vmem:[#allocation2 + $0x60] sm:$0xff]  ;;  %v9109_v47 = vld [vmem:[#allocation2 + $0x68] sm:$0xff] }
 0x129   : > { %v1199_v45 = vsel %vm1165_vm4, %v9101_v43, 0.0  ;;  %v1202_v48 = vsel %vm1165_vm4, %v9107_v46, 0.0  ;;  %v1205_v49 = vsel %vm1165_vm4, %v9109_v47, 0.0  ;;  %s8726_s22 = smov 96   ;;  %s8729_s2 = smov 64   ;;  %vm9345_vm7 = vmpackc.low %vm1594_vm6, %vm1594_vm6  ;;  %vm1902_vm9 = vcmask 457728  }
 0x12a   : > { %v1156_v35 = vld [vmem:[#allocation2 + $0x38] sm:$0xff]  ;;  %s8730_s8 = smov 88   ;;  %s8731_s3 = smov 120   ;;  %vm4857_vm10 = vcmask 130048   ;;  %vm4872_vm11 = vcmask 195584   ;;  %vm5901_vm14 = vcmask 523264  }
 0x12b   : > { %1170 = vadd.xlane.f32.xlu0 %v1169_v2  ;;  %1176 = vadd.xlane.f32.xlu1 %v1175_v29  ;;  %v1155_v34 = vld [vmem:[#allocation2 + $0x30] sm:$0xff]  ;;  %v1187_v37 = vsel %vm1165_vm4, %v1156_v35, 0.0  ;;  %s8733_s23 = smov 80   ;;  %s8735_s4 = smov 48  }
 0x12c   : > { %v1184_v36 = vsel %vm1165_vm4, %v1155_v34, 0.0  ;;  %s8736_s27 = smov 72   ;;  %p6709_p6 = scmp.ne.s32.totalorder %s8715_s1, 1 }
 0x12f   : > { %1179 = vadd.xlane.f32.xlu0 %v1178_v32  ;;  %1182 = vadd.xlane.f32.xlu1 %v1181_v33 }
 0x133   : > { %1185 = vadd.xlane.f32.xlu0 %v1184_v36  ;;  %1188 = vadd.xlane.f32.xlu1 %v1187_v37 }
 0x137   : > { %1191 = vadd.xlane.f32.xlu0 %v1190_v40  ;;  %1194 = vadd.xlane.f32.xlu1 %v1193_v41 }
 0x13b   : > { %1197 = vadd.xlane.f32.xlu0 %v1196_v44  ;;  %1200 = vadd.xlane.f32.xlu1 %v1199_v45 }
 0x13f   : > { %1203 = vadd.xlane.f32.xlu0 %v1202_v48  ;;  %1206 = vadd.xlane.f32.xlu1 %v1205_v49 }
 0x1b4   : > { %v1168_v50 = vpop.xlane.xlu0 %1167  ;;  %v1174_v51 = vpop.xlane.xlu1 %1173 }
 0x1b5   : > { %v1209_v52 = vmul.f32 0.03125, %v1168_v50  ;;  %v1211_v53 = vmul.f32 0.03125, %v1174_v51 }
 0x1b7   : > { %v9115_v54 = vsub.f32 %v1149_v24, %v1209_v52  ;;  %v9117_v55 = vsub.f32 %v1151_v25, %v1211_v53 }
 0x1b8   : > { %v1171_v56 = vpop.xlane.xlu0 %1170  ;;  %v1177_v57 = vpop.xlane.xlu1 %1176 }
 0x1b9   : > { %v1210_v58 = vmul.f32 0.03125, %v1171_v56  ;;  %v1212_v59 = vmul.f32 0.03125, %v1177_v57  ;;  %v1237_v60 = vmul.f32 %v9115_v54, %v9115_v54  ;;  %v1239_v61 = vmul.f32 %v9117_v55, %v9117_v55 }
 0x1bb   : > { %v9123_v62 = vsub.f32 %v1150_v26, %v1210_v58  ;;  %v9125_v63 = vsub.f32 %v1152_v1, %v1212_v59  ;;  %v1251_v3 = vsel %vm1165_vm4, %v1237_v60, 0.0  ;;  %v1257_v6 = vsel %vm1165_vm4, %v1239_v61, 0.0  ;;  %v1389_v59 = vld [vmem:[%s8898_s20] sm:$0xff]  ;;  %v1390_v60 = vld [vmem:[%s8898_s20 + $0x8] sm:$0xff] }
 0x1bc   : > { %1252 = vadd.xlane.f32.xlu0 %v1251_v3  ;;  %v1180_v4 = vpop.xlane.xlu0 %1179  ;;  %v1183_v5 = vpop.xlane.xlu1 %1182  ;;  %v7800_v61 = vpack.c.bf16 %v1390_v60, %v1389_v59  ;;  %v1391_v3 = vld [vmem:[%s8898_s20 + $0x10] sm:$0xff] }
 0x1bd   : > { %v1213_v7 = vmul.f32 0.03125, %v1180_v4  ;;  %v1214_v8 = vmul.f32 0.03125, %v1183_v5  ;;  %v1238_v9 = vmul.f32 %v9123_v62, %v9123_v62  ;;  %v1240_v10 = vmul.f32 %v9125_v63, %v9125_v63  ;;  %v1392_v4 = vld [vmem:[%s8898_s20 + $0x18] sm:$0xff]  ;;  %s8732_s20 = smov 56  }
 0x1be   : > { %7801 = vmatprep.subr.bf16.mxu0 %v7800_v61  ;;  %v7804_v5 = vpack.c.bf16 %v1392_v4, %v1391_v3 }
 0x1bf   : > { %v9133_v11 = vsub.f32 %v1153_v30, %v1213_v7  ;;  %v9135_v12 = vsub.f32 %v1154_v31, %v1214_v8  ;;  %v1254_v13 = vsel %vm1165_vm4, %v1238_v9, 0.0  ;;  %v1260_v16 = vsel %vm1165_vm4, %v1240_v10, 0.0  ;;  %7803 = vmatpush3.bf16.msra.mxu0 %v7800_v61 }
 0x1c0   : > { %1258 = vadd.xlane.f32.xlu0 %v1257_v6  ;;  %1255 = vadd.xlane.f32.xlu1 %v1254_v13  ;;  %v1186_v14 = vpop.xlane.xlu0 %1185  ;;  %v1189_v15 = vpop.xlane.xlu1 %1188 }
 0x1c1   : > { %v1215_v17 = vmul.f32 0.03125, %v1186_v14  ;;  %v1216_v18 = vmul.f32 0.03125, %v1189_v15  ;;  %v1241_v19 = vmul.f32 %v9133_v11, %v9133_v11  ;;  %v1242_v20 = vmul.f32 %v9135_v12, %v9135_v12  ;;  %7805 = vmatprep.subr.bf16.mxu0 %v7804_v5 }
 0x1c3   : > { %v9143_v21 = vsub.f32 %v1155_v34, %v1215_v17  ;;  %v9145_v22 = vsub.f32 %v1156_v35, %v1216_v18  ;;  %v1263_v23 = vsel %vm1165_vm4, %v1241_v19, 0.0  ;;  %v1266_v26 = vsel %vm1165_vm4, %v1242_v20, 0.0  ;;  %7807 = vmatpush3.bf16.msra.mxu0 %v7804_v5 }
 0x1c4   : > { %1261 = vadd.xlane.f32.xlu1 %v1260_v16  ;;  %1264 = vadd.xlane.f32.xlu0 %v1263_v23  ;;  %v1192_v24 = vpop.xlane.xlu0 %1191  ;;  %v1195_v25 = vpop.xlane.xlu1 %1194 }
 0x1c5   : > { %v1217_v27 = vmul.f32 0.03125, %v1192_v24  ;;  %v1218_v28 = vmul.f32 0.03125, %v1195_v25  ;;  %v1243_v1 = vmul.f32 %v9143_v21, %v9143_v21  ;;  %v1244_v2 = vmul.f32 %v9145_v22, %v9145_v22 }
 0x1c7   : > { %v9154_v29 = vsub.f32 %v9091_v38, %v1217_v27  ;;  %v9157_v30 = vsub.f32 %v9093_v39, %v1218_v28  ;;  %v1269_v31 = vsel %vm1165_vm4, %v1243_v1, 0.0  ;;  %v1272_v34 = vsel %vm1165_vm4, %v1244_v2, 0.0 }
 0x1c8   : > { %1267 = vadd.xlane.f32.xlu1 %v1266_v26  ;;  %1270 = vadd.xlane.f32.xlu0 %v1269_v31  ;;  %v1198_v32 = vpop.xlane.xlu0 %1197  ;;  %v1201_v33 = vpop.xlane.xlu1 %1200 }
 0x1c9   : > { %v1219_v35 = vmul.f32 0.03125, %v1198_v32  ;;  %v1220_v36 = vmul.f32 0.03125, %v1201_v33  ;;  %v1245_v37 = vmul.f32 %v9154_v29, %v9154_v29  ;;  %v1246_v38 = vmul.f32 %v9157_v30, %v9157_v30  ;;  %v9200_v32 = vld [vmem:[%s11645_s28] ss:$0 sm:$0xff]  ;;  %s8734_s28 = smov 112  }
 0x1cb   : > { %v9166_v40 = vsub.f32 %v9099_v42, %v1219_v35  ;;  %v9169_v39 = vsub.f32 %v9101_v43, %v1220_v36  ;;  %v1275_v41 = vsel %vm1165_vm4, %v1245_v37, 0.0  ;;  %v1278_v48 = vsel %vm1165_vm4, %v1246_v38, 0.0  ;;  %v9208_v38 = vld [vmem:[%s11646_s0] ss:$0 sm:$0xff]  ;;  %s8737_s0 = smov 104  }
 0x1cc   : > { %1273 = vadd.xlane.f32.xlu1 %v1272_v34  ;;  %1276 = vadd.xlane.f32.xlu0 %v1275_v41  ;;  %v1204_v44 = vpop.xlane.xlu0 %1203  ;;  %v1207_v45 = vpop.xlane.xlu1 %1206 }
 0x1cd   : > { %v1221_v49 = vmul.f32 0.03125, %v1204_v44  ;;  %v1222_v50 = vmul.f32 0.03125, %v1207_v45  ;;  %v1247_v51 = vmul.f32 %v9166_v40, %v9166_v40  ;;  %v1248_v42 = vmul.f32 %v9169_v39, %v9169_v39 }
 0x1cf   : > { %v9178_v43 = vsub.f32 %v9107_v46, %v1221_v49  ;;  %v9181_v52 = vsub.f32 %v9109_v47, %v1222_v50  ;;  %v1281_v53 = vsel %vm1165_vm4, %v1247_v51, 0.0  ;;  %v1284_v56 = vsel %vm1165_vm4, %v1248_v42, 0.0 }
 0x1d0   : > { %1279 = vadd.xlane.f32.xlu1 %v1278_v48  ;;  %1282 = vadd.xlane.f32.xlu0 %v1281_v53 }
 0x1d1   : > { %v1249_v57 = vmul.f32 %v9178_v43, %v9178_v43  ;;  %v1250_v58 = vmul.f32 %v9181_v52, %v9181_v52 }
 0x1d3   : > { %v1287_v46 = vsel %vm1165_vm4, %v1249_v57, 0.0  ;;  %v1290_v47 = vsel %vm1165_vm4, %v1250_v58, 0.0 }
 0x1d4   : > { %1285 = vadd.xlane.f32.xlu1 %v1284_v56  ;;  %1288 = vadd.xlane.f32.xlu0 %v1287_v46 }
 0x1d8   : > { %1291 = vadd.xlane.f32.xlu1 %v1290_v47 }
 0x249   : > { %v1253_v6 = vpop.xlane.xlu0 %1252 }
 0x24a   : > { %v1293_v7 = vmul.f32 0.03125, %v1253_v6 }
 0x24c   : > { %v1307_v8 = vadd.f32 1e-05, %v1293_v7 }
 0x24d   : > { %v1256_v9 = vpop.xlane.xlu1 %1255  ;;  %v1259_v10 = vpop.xlane.xlu0 %1258 }
 0x24e   : > { %8319 = vrsqrt.f32 %v1307_v8  ;;  %v1294_v13 = vmul.f32 0.03125, %v1256_v9  ;;  %v1295_v14 = vmul.f32 0.03125, %v1259_v10 }
 0x250   : > { %v1308_v15 = vadd.f32 1e-05, %v1294_v13  ;;  %v1309_v16 = vadd.f32 1e-05, %v1295_v14 }
 0x251   : > { %v1262_v17 = vpop.xlane.xlu1 %1261  ;;  %v1265_v18 = vpop.xlane.xlu0 %1264 }
 0x252   : > { %8321 = vrsqrt.f32 %v1308_v15  ;;  %v1296_v19 = vmul.f32 0.03125, %v1262_v17  ;;  %v1297_v20 = vmul.f32 0.03125, %v1265_v18 }
 0x253   : > { %8323 = vrsqrt.f32 %v1309_v16 }
 0x254   : > { %v1310_v23 = vadd.f32 1e-05, %v1296_v19  ;;  %v1311_v24 = vadd.f32 1e-05, %v1297_v20 }
 0x255   : > { %v1268_v25 = vpop.xlane.xlu1 %1267  ;;  %v1271_v26 = vpop.xlane.xlu0 %1270 }
 0x256   : > { %8325 = vrsqrt.f32 %v1310_v23  ;;  %v1298_v27 = vmul.f32 0.03125, %v1268_v25  ;;  %v1299_v28 = vmul.f32 0.03125, %v1271_v26 }
 0x257   : > { %8327 = vrsqrt.f32 %v1311_v24 }
 0x258   : > { %v8320_v1 = vpop.eup %8319  ;;  %v1312_v2 = vadd.f32 1e-05, %v1298_v27  ;;  %v1313_v31 = vadd.f32 1e-05, %v1299_v28 }
 0x259   : > { %v1274_v33 = vpop.xlane.xlu1 %1273  ;;  %v1277_v34 = vpop.xlane.xlu0 %1276  ;;  %v1335_v35 = vmul.f32 %v8320_v1, %v9115_v54 }
 0x25a   : > { %8329 = vrsqrt.f32 %v1312_v2  ;;  %v1300_v36 = vmul.f32 0.03125, %v1274_v33  ;;  %v1301_v37 = vmul.f32 0.03125, %v1277_v34 }
 0x25b   : > { %8331 = vrsqrt.f32 %v1313_v31  ;;  %v1355_v41 = vmul.f32 %v9200_v32, %v1335_v35 }
 0x25c   : > { %v8322_v44 = vpop.eup %8321  ;;  %v1314_v45 = vadd.f32 1e-05, %v1300_v36  ;;  %v1315_v48 = vadd.f32 1e-05, %v1301_v37 }
 0x25d   : > { %v8324_v49 = vpop.eup %8323  ;;  %v1280_v50 = vpop.xlane.xlu1 %1279  ;;  %v1375_v54 = vadd.f32 %v9208_v38, %v1355_v41  ;;  %v1336_v42 = vmul.f32 %v8322_v44, %v9123_v62 }
 0x25e   : > { %v1283_v51 = vpop.xlane.xlu0 %1282  ;;  %8333 = vrsqrt.f32 %v1314_v45  ;;  %v1302_v53 = vmul.f32 0.03125, %v1280_v50  ;;  %v1337_v57 = vmul.f32 %v8324_v49, %v9117_v55 }
 0x25f   : > { %v1303_v56 = vmul.f32 0.03125, %v1283_v51  ;;  %8335 = vrsqrt.f32 %v1315_v48  ;;  %7097 = vmatprep.mubr.msk.f32.mxu0 %vm1165_vm4, %v1375_v54  ;;  %v1356_v58 = vmul.f32 %v9200_v32, %v1336_v42 }
 0x260   : > { %v8326_v46 = vpop.eup %8325  ;;  %v1316_v47 = vadd.f32 1e-05, %v1302_v53  ;;  %v1357_v60 = vmul.f32 %v9200_v32, %v1337_v57  ;;  %v11620_v57 = vmov 0.0|0.0  }
 0x261   : > { %v1317_v59 = vadd.f32 1e-05, %v1303_v56  ;;  %v8328_v61 = vpop.eup %8327  ;;  %v1286_v3 = vpop.xlane.xlu1 %1285  ;;  %v1376_v62 = vadd.f32 %v9208_v38, %v1356_v58  ;;  %v1338_v5 = vmul.f32 %v8326_v46, %v9125_v63  ;;  %7808 = vmatprep.subr.bf16.mxu1 %v11620_v57  ;;  %7820 = vmatprep.subr.bf16.mxu0 %v11620_v57 }
 0x262   : > { %v1289_v4 = vpop.xlane.xlu0 %1288  ;;  %8337 = vrsqrt.f32 %v1316_v47  ;;  %v1304_v6 = vmul.f32 0.03125, %v1286_v3  ;;  %v1377_v7 = vadd.f32 %v9208_v38, %v1357_v60  ;;  %v1339_v9 = vmul.f32 %v8328_v61, %v9133_v11 }
 0x263   : > { %v1305_v55 = vmul.f32 0.03125, %v1289_v4  ;;  %8339 = vrsqrt.f32 %v1317_v59  ;;  %7098 = vmatmul.mubr.msk.f32.vlgmr.msra.gmra.mrb[0].mxu0 %vm1165_vm4, %v1376_v62  ;;  %v1358_v8 = vmul.f32 %v9200_v32, %v1338_v5 }
 0x264   : > { %v8330_v10 = vpop.eup %8329  ;;  %v1318_v13 = vadd.f32 1e-05, %v1304_v6  ;;  %7100 = vmatprep.mubr.msk.f32.mxu0 %vm1165_vm4, %v1377_v7  ;;  %v1359_v17 = vmul.f32 %v9200_v32, %v1339_v9 }
 0x265   : > { %v1319_v14 = vadd.f32 1e-05, %v1305_v55  ;;  %v8332_v15 = vpop.eup %8331  ;;  %v1292_v16 = vpop.xlane.xlu1 %1291  ;;  %v1378_v63 = vadd.f32 %v9208_v38, %v1358_v8  ;;  %v1340_v18 = vmul.f32 %v8330_v10, %v9135_v12 }
 0x266   : > { %8341 = vrsqrt.f32 %v1318_v13  ;;  %v1306_v19 = vmul.f32 0.03125, %v1292_v16  ;;  %v1341_v20 = vmul.f32 %v8332_v15, %v9143_v21  ;;  %v1379_v11 = vadd.f32 %v9208_v38, %v1359_v17 }
 0x267   : > { %8343 = vrsqrt.f32 %v1319_v14  ;;  %7101 = vmatmul.mubr.msk.f32.gmra.mrb[2].mxu0 %vm1165_vm4, %v1378_v63  ;;  %v1360_v23 = vmul.f32 %v9200_v32, %v1340_v18  ;;  %v11622_v14 = vmov 0.0  }
 0x268   : > { %v8334_v24 = vpop.eup %8333  ;;  %v1320_v25 = vadd.f32 1e-05, %v1306_v19  ;;  %v1361_v26 = vmul.f32 %v9200_v32, %v1341_v20  ;;  %7103 = vmatprep.mubr.msk.f32.mxu0 %vm1165_vm4, %v1379_v11  ;;  %7132 = vmatprep.mubr.msk.f32.mxu1 %vm8727_vm5, %v11622_v14 }
 0x269   : > { %v8336_v27 = vpop.eup %8335  ;;  %v1380_v12 = vadd.f32 %v9208_v38, %v1360_v23  ;;  %v1342_v28 = vmul.f32 %v8334_v24, %v9145_v22 }
 0x26a   : > { %8345 = vrsqrt.f32 %v1320_v25  ;;  %v1381_v21 = vadd.f32 %v9208_v38, %v1361_v26  ;;  %v1343_v1 = vmul.f32 %v8336_v27, %v9154_v29 }
 0x26b   : > { %7104 = vmatmul.mubr.msk.f32.gmra.mrb[4].mxu0 %vm1165_vm4, %v1380_v12  ;;  %v1362_v2 = vmul.f32 %v9200_v32, %v1342_v28 }
 0x26c   : > { %v8338_v31 = vpop.eup %8337  ;;  %7106 = vmatprep.mubr.msk.f32.mxu0 %vm1165_vm4, %v1381_v21  ;;  %v1363_v33 = vmul.f32 %v9200_v32, %v1343_v1 }
 0x26d   : > { %v8340_v34 = vpop.eup %8339  ;;  %v1382_v35 = vadd.f32 %v9208_v38, %v1362_v2  ;;  %v1344_v36 = vmul.f32 %v8338_v31, %v9157_v30 }
 0x26e   : > { %v1383_v22 = vadd.f32 %v9208_v38, %v1363_v33  ;;  %v1345_v37 = vmul.f32 %v8340_v34, %v9166_v40 }
 0x26f   : > { %7107 = vmatmul.mubr.msk.f32.gmra.mrb[6].mxu0 %vm1165_vm4, %v1382_v35  ;;  %v1364_v29 = vmul.f32 %v9200_v32, %v1344_v36 }
 0x270   : > { %v8342_v41 = vpop.eup %8341  ;;  %7109 = vmatprep.mubr.msk.f32.mxu0 %vm1165_vm4, %v1383_v22  ;;  %v1365_v44 = vmul.f32 %v9200_v32, %v1345_v37 }
 0x271   : > { %v8344_v45 = vpop.eup %8343  ;;  %v1384_v48 = vadd.f32 %v9208_v38, %v1364_v29  ;;  %v1346_v49 = vmul.f32 %v8342_v41, %v9169_v39 }
 0x272   : > { %v1385_v30 = vadd.f32 %v9208_v38, %v1365_v44  ;;  %v1347_v50 = vmul.f32 %v8344_v45, %v9178_v43 }
 0x273   : > { %7110 = vmatmul.mubr.msk.f32.gmra.mrb[8].mxu0 %vm1165_vm4, %v1384_v48  ;;  %v1366_v40 = vmul.f32 %v9200_v32, %v1346_v49 }
 0x274   : > { %v8346_v51 = vpop.eup %8345  ;;  %7112 = vmatprep.mubr.msk.f32.mxu0 %vm1165_vm4, %v1385_v30  ;;  %v1367_v54 = vmul.f32 %v9200_v32, %v1347_v50 }
 0x275   : > { %v1386_v42 = vadd.f32 %v9208_v38, %v1366_v40  ;;  %v1348_v53 = vmul.f32 %v8346_v51, %v9181_v52 }
 0x276   : > { %v1387_v56 = vadd.f32 %v9208_v38, %v1367_v54 }
 0x277   : > { %7113 = vmatmul.mubr.msk.f32.gmra.mrb[10].mxu0 %vm1165_vm4, %v1386_v42  ;;  %v1368_v39 = vmul.f32 %v9200_v32, %v1348_v53 }
 0x278   : > { %7115 = vmatprep.mubr.msk.f32.mxu0 %vm1165_vm4, %v1387_v56 }
 0x279   : > { %v1388_v43 = vadd.f32 %v9208_v38, %v1368_v39 }
 0x27b   : > { %7116 = vmatmul.mubr.msk.f32.gmra.mrb[12].mxu0 %vm1165_vm4, %v1388_v43 }
 0x27c   : > { %7167 = vmatprep.mubr.msk.f32.mxu0 %vm8727_vm5, %v11622_v14 }
 0x336   : > { %v9267_v58 = vpop.f32.mrb[0].mxu0 }
 0x337   : > { %v9269_v52 = vpop.f32.mrb[1].mxu0 }
 0x338   : > { %v9273_v46 = vpack.i.bf16 %v9267_v58, %v9269_v52 }
 0x33a   : > { %8080 = vrot.lane.b32.xlu0 %v9273_v46, %s8726_s22  ;;  %v9276_v32 = vpop.f32.mrb[2].mxu0 }
 0x33b   : > { %v9278_v38 = vpop.f32.mrb[3].mxu0 }
 0x33c   : > { %v9282_v47 = vpack.i.bf16 %v9276_v32, %v9278_v38 }
 0x33e   : > { %8085 = vrot.lane.b32.xlu1 %v9282_v47, %s8726_s22  ;;  %v9285_v59 = vpop.f32.mrb[4].mxu0 }
 0x33f   : > { %v9287_v60 = vpop.f32.mrb[5].mxu0 }
 0x340   : > { %v9291_v61 = vpack.i.bf16 %v9285_v59, %v9287_v60 }
 0x342   : > { %v9293_v3 = vpop.f32.mrb[6].mxu0 }
 0x343   : > { %v9295_v4 = vpop.f32.mrb[7].mxu0 }
 0x346   : > { %v9297_v62 = vpop.f32.mrb[8].mxu0 }
 0x347   : > { %v9299_v5 = vpop.f32.mrb[9].mxu0 }
 0x348   : > { %v9303_v6 = vpack.i.bf16 %v9299_v5, %v9293_v3 }
 0x34a   : > { %8090 = vrot.lane.b32.xlu1 %v9303_v6, %s8726_s22  ;;  %v9306_v55 = vpop.f32.mrb[10].mxu0 }
 0x34b   : > { %v9308_v7 = vpop.f32.mrb[11].mxu0 }
 0x34c   : > { %v9312_v8 = vpack.i.bf16 %v9308_v7, %v9297_v62 }
 0x34e   : > { %8095 = vrot.lane.b32.xlu1 %v9291_v61, %s8726_s22  ;;  %8100 = vrot.lane.b32.xlu0 %v9312_v8, %s8726_s22  ;;  %v9316_v9 = vpop.f32.mrb[12].mxu0 }
 0x34f   : > { %v9318_v10 = vpop.f32.mrb[13].mxu0 }
 0x350   : > { %v9322_v13 = vpack.i.bf16 %v9318_v10, %v9306_v55 }
 0x352   : > { %1592 = vrot.lane.b32.xlu1 %v9295_v4, %s8726_s22  ;;  %8105 = vrot.lane.b32.xlu0 %v9322_v13, %s8726_s22 }
 0x356   : > { %1742 = vrot.lane.b32.xlu1 %v9316_v9, %s8726_s22  ;;  %8110 = vrot.lane.b32.xlu0 %v9273_v46, %s8729_s2  ;;  %s8738_s22 = smov 40  }
 0x35a   : > { %8115 = vrot.lane.b32.xlu1 %v9282_v47, %s8729_s2  ;;  %8120 = vrot.lane.b32.xlu0 %v9291_v61, %s8729_s2 }
 0x35e   : > { %8125 = vrot.lane.b32.xlu1 %v9303_v6, %s8729_s2  ;;  %8130 = vrot.lane.b32.xlu0 %v9312_v8, %s8729_s2 }
 0x362   : > { %2069 = vrot.lane.b32.xlu1 %v9295_v4, %s8729_s2 }
 0x3ac   : > { %v8081_v15 = vpop.permute.xlu0 %8080 }
 0x3ad   : > { %v8083_v16 = vunpack.i.h.bf16 %v8081_v15  ;;  %v8082_v63 = vunpack.i.l.bf16 %v8081_v15 }
 0x3af   : > { %v7809_v18 = vpack.c.bf16 %v8083_v16, %v8082_v63 }
 0x3b0   : > { %v8086_v19 = vpop.permute.xlu1 %8085 }
 0x3b1   : > { %7811 = vmatpush3.bf16.xpose.msk.msra.mxu1 %vm9345_vm7, %v7809_v18  ;;  %v8088_v20 = vunpack.i.h.bf16 %v8086_v19  ;;  %v8087_v11 = vunpack.i.l.bf16 %v8086_v19 }
 0x3b2   : > { %7812 = vmatprep.subr.bf16.mxu1 %v11620_v57 }
 0x3b3   : > { %v7813_v23 = vpack.c.bf16 %v8088_v20, %v8087_v11 }
 0x3b9   : > { %7815 = vmatpush3.bf16.xpose.msk.msra.mxu1 %vm9345_vm7, %v7813_v23  ;;  %v9434_v23 = vand.u32 127, %v816_v0 }
 0x3ba   : > { %7816 = vmatprep.subr.bf16.mxu1 %v11620_v57 }
 0x3bb   : > { %vm1572_vm8 = vcmp.lt.s32.totalorder %v9434_v23, 51 }
 0x3bc   : > { %v8091_v24 = vpop.permute.xlu1 %8090 }
 0x3bd   : > { %v8093_v25 = vunpack.i.h.bf16 %v8091_v24  ;;  %v8092_v26 = vunpack.i.l.bf16 %v8091_v24 }
 0x3bf   : > { %v7821_v27 = vpack.c.bf16 %v8093_v25, %v8092_v26 }
 0x3c0   : > { %v8096_v12 = vpop.permute.xlu1 %8095  ;;  %v8101_v28 = vpop.permute.xlu0 %8100 }
 0x3c1   : > { %v8098_v21 = vunpack.i.h.bf16 %v8096_v12  ;;  %v8097_v1 = vunpack.i.l.bf16 %v8096_v12  ;;  %7823 = vmatpush3.bf16.xpose.msk.msra.mxu0 %vm9345_vm7, %v7821_v27  ;;  %v8103_v31 = vunpack.i.h.bf16 %v8101_v28  ;;  %v8102_v33 = vunpack.i.l.bf16 %v8101_v28 }
 0x3c2   : > { %7824 = vmatprep.subr.bf16.mxu0 %v11620_v57 }
 0x3c3   : > { %v7817_v2 = vpack.c.bf16 %v8098_v21, %v8097_v1  ;;  %v7825_v36 = vpack.c.bf16 %v8103_v31, %v8102_v33 }
 0x3c4   : > { %v1593_v34 = vpop.permute.xlu1 %1592  ;;  %v8106_v35 = vpop.permute.xlu0 %8105 }
 0x3c5   : > { %7819 = vmatpush3.bf16.xpose.msk.msra.mxu1 %vm9345_vm7, %v7817_v2  ;;  %v8108_v29 = vunpack.i.h.bf16 %v8106_v35  ;;  %v8107_v41 = vunpack.i.l.bf16 %v8106_v35 }
 0x3c6   : > { %7130 = vmatprep.subr.mxu1 %v11622_v14 }
 0x3c7   : > { %v7829_v49 = vpack.c.bf16 %v8108_v29, %v8107_v41 }
 0x3c8   : > { %v1743_v22 = vpop.permute.xlu1 %1742  ;;  %v8111_v37 = vpop.permute.xlu0 %8110 }
 0x3c9   : > { %7827 = vmatpush3.bf16.xpose.msk.msra.mxu0 %vm9345_vm7, %v7825_v36  ;;  %v8113_v44 = vunpack.i.h.bf16 %v8111_v37  ;;  %v8112_v45 = vunpack.i.l.bf16 %v8111_v37 }
 0x3ca   : > { %7828 = vmatprep.subr.bf16.mxu0 %v11620_v57 }
 0x3cb   : > { %v7833_v30 = vpack.c.bf16 %v8113_v44, %v8112_v45 }
 0x3cc   : > { %v8116_v48 = vpop.permute.xlu1 %8115  ;;  %v8121_v51 = vpop.permute.xlu0 %8120 }
 0x3cd   : > { %7131 = vmatpush3.xpose.msk.msra.mxu1 %vm1594_vm6, %v1593_v34  ;;  %v8118_v50 = vunpack.i.h.bf16 %v8116_v48  ;;  %v8117_v40 = vunpack.i.l.bf16 %v8116_v48  ;;  %v8123_v42 = vunpack.i.h.bf16 %v8121_v51  ;;  %v8122_v53 = vunpack.i.l.bf16 %v8121_v51 }
 0x3ce   : > { %7832 = vmatprep.subr.bf16.mxu1 %v11620_v57 }
 0x3cf   : > { %v7836_v54 = vpack.c.bf16 %v8118_v50, %v8117_v40  ;;  %v7839_v39 = vpack.c.bf16 %v8123_v42, %v8122_v53 }
 0x3d0   : > { %7133 = vmatmul.mubr.msk.f32.vlgmr.msra.gmra.mrb[0].mxu1 %vm1594_vm6, %v9269_v52  ;;  %v8126_v56 = vpop.permute.xlu1 %8125  ;;  %v8131_v16 = vpop.permute.xlu0 %8130 }
 0x3d1   : > { %7831 = vmatpush3.bf16.xpose.msk.msra.mxu0 %vm9345_vm7, %v7829_v49  ;;  %7834 = vmatpush3.bf16.msra.mxu1 %v7833_v30  ;;  %v8128_v43 = vunpack.i.h.bf16 %v8126_v56  ;;  %v8127_v15 = vunpack.i.l.bf16 %v8126_v56  ;;  %v8133_v18 = vunpack.i.h.bf16 %v8131_v16  ;;  %v8132_v19 = vunpack.i.l.bf16 %v8131_v16 }
 0x3d2   : > { %7135 = vmatprep.mubr.msk.f32.mxu1 %vm8727_vm5, %v11622_v14  ;;  %7835 = vmatprep.subr.bf16.mxu1 %v11620_v57 }
 0x3d3   : > { %7165 = vmatprep.subr.mxu0 %v11622_v14  ;;  %v7842_v63 = vpack.c.bf16 %v8128_v43, %v8127_v15  ;;  %v7845_v11 = vpack.c.bf16 %v8133_v18, %v8132_v19 }
 0x3d4   : > { %7136 = vmatmul.mubr.msk.f32.gmra.mrb[2].mxu1 %vm1594_vm6, %v9267_v58  ;;  %v2070_v20 = vpop.permute.xlu1 %2069 }
 0x3d5   : > { %7837 = vmatpush3.bf16.msra.mxu1 %v7836_v54  ;;  %7138 = vmatprep.mubr.msk.f32.mxu1 %vm8727_vm5, %v11622_v14 }
 0x3d6   : > { %7838 = vmatprep.subr.bf16.mxu1 %v11620_v57 }
 0x3d8   : > { %7139 = vmatmul.mubr.msk.f32.gmra.mrb[4].mxu1 %vm1594_vm6, %v9278_v38 }
 0x3d9   : > { %7166 = vmatpush3.xpose.msk.msra.mxu0 %vm1594_vm6, %v1743_v22  ;;  %7840 = vmatpush3.bf16.msra.mxu1 %v7839_v39 }
 0x3da   : > { %7141 = vmatprep.mubr.msk.f32.mxu1 %vm8727_vm5, %v11622_v14  ;;  %7200 = vmatprep.subr.mxu1 %v11622_v14 }
 0x3db   : > { %7841 = vmatprep.subr.bf16.mxu0 %v11620_v57 }
 0x3dc   : > { %7142 = vmatmul.mubr.msk.f32.gmra.mrb[6].mxu1 %vm1594_vm6, %v9276_v32  ;;  %7168 = vmatmul.mubr.msk.f32.vlgmr.msra.gmra.mrb[14].mxu0 %vm1594_vm6, %v9293_v3 }
 0x3dd   : > { %7201 = vmatpush3.msra.mxu1 %v2070_v20  ;;  %7843 = vmatpush3.bf16.msra.mxu0 %v7842_v63 }
 0x3de   : > { %7144 = vmatprep.mubr.msk.f32.mxu1 %vm8727_vm5, %v11622_v14  ;;  %7170 = vmatprep.mubr.msk.f32.mxu0 %vm8727_vm5, %v11622_v14 }
 0x3df   : > { %7844 = vmatprep.subr.bf16.mxu0 %v11620_v57  ;;  %7850 = vmatprep.subr.bf16.mxu1 %v11620_v57 }
 0x3e0   : > { %7145 = vmatmul.mubr.msk.f32.gmra.mrb[8].mxu1 %vm1594_vm6, %v9287_v60  ;;  %7171 = vmatmul.mubr.msk.f32.gmra.mrb[16].mxu0 %vm1594_vm6, %v9299_v5 }
 0x3e1   : > { %7846 = vmatpush3.bf16.msra.mxu0 %v7845_v11  ;;  %7147 = vmatprep.mubr.msk.f32.mxu1 %vm8727_vm5, %v11622_v14 }
 0x3e2   : > { %7173 = vmatprep.mubr.msk.f32.mxu0 %vm8727_vm5, %v11622_v14  ;;  %7847 = vmatprep.subr.bf16.mxu0 %v11620_v57 }
 0x3e4   : > { %7148 = vmatmul.mubr.msk.f32.gmra.mrb[10].mxu1 %vm1594_vm6, %v9285_v59  ;;  %7174 = vmatmul.mubr.msk.f32.gmra.mrb[18].mxu0 %vm1594_vm6, %v9297_v62 }
 0x3e5   : > { %7150 = vmatprep.mubr.msk.f32.mxu1 %vm8727_vm5, %v11622_v14  ;;  %7176 = vmatprep.mubr.msk.f32.mxu0 %vm8727_vm5, %v11622_v14 }
 0x3e8   : > { %7151 = vmatmul.mubr.msk.f32.gmra.mrb[12].mxu1 %vm1594_vm6, %v9295_v4  ;;  %7177 = vmatmul.mubr.msk.f32.gmra.mrb[20].mxu0 %vm1594_vm6, %v9308_v7 }
 0x3e9   : > { %7179 = vmatprep.mubr.msk.f32.mxu0 %vm8727_vm5, %v11622_v14  ;;  %7202 = vmatprep.mubr.msk.f32.mxu1 %vm8727_vm5, %v11622_v14 }
 0x3ec   : > { %7180 = vmatmul.mubr.msk.f32.gmra.mrb[22].mxu0 %vm1594_vm6, %v9306_v55 }
 0x3ed   : > { %7182 = vmatprep.mubr.msk.f32.mxu0 %vm8727_vm5, %v11622_v14 }
 0x3f0   : > { %7183 = vmatmul.mubr.msk.f32.gmra.mrb[24].mxu0 %vm1594_vm6, %v9318_v10 }
 0x3f1   : > { %7185 = vmatprep.mubr.msk.f32.mxu0 %vm8727_vm5, %v11622_v14 }
 0x3f4   : > { %7186 = vmatmul.mubr.msk.f32.gmra.mrb[26].mxu0 %vm1594_vm6, %v9316_v9 }
 0x3f5   : > { %7237 = vmatprep.mubr.msk.f32.mxu0 %vm8727_vm5, %v11622_v14 }
 0x4a3   : > { %v1689_v24 = vpop.f32.mrb[0].mxu1 }
 0x4a4   : > { %v1872_v25 = vmul.f32 0.35355338, %v1689_v24  ;;  %v7134_v26 = vpop.f32.mrb[1].mxu1 }
 0x4a6   : > { %v9439_v27 = vsel %vm1572_vm8, %v1872_v25, -1e+30 }
 0x4a7   : > { %v1694_v12 = vpop.f32.mrb[2].mxu1  ;;  %v1903_v28 = vsel %vm1902_vm9, %v9439_v27, -inf }
 0x4a8   : > { %v1873_v21 = vmul.f32 0.35355338, %v1694_v12  ;;  %1904 = vmax.xlane.f32.xlu0 %v1903_v28  ;;  %v7137_v1 = vpop.f32.mrb[3].mxu1 }
 0x4aa   : > { %v9445_v0 = vsel %vm1572_vm8, %v1873_v21, -1e+30 }
 0x4ab   : > { %v1699_v2 = vpop.f32.mrb[4].mxu1  ;;  %v1906_v31 = vsel %vm1902_vm9, %v9445_v0, -inf }
 0x4ac   : > { %v1874_v33 = vmul.f32 0.35355338, %v1699_v2  ;;  %1907 = vmax.xlane.f32.xlu1 %v1906_v31  ;;  %v7140_v34 = vpop.f32.mrb[5].mxu1 }
 0x4ae   : > { %v9451_v35 = vsel %vm1572_vm8, %v1874_v33, -1e+30 }
 0x4af   : > { %v1704_v36 = vpop.f32.mrb[6].mxu1  ;;  %v1838_v22 = vpop.f32.mrb[14].mxu0  ;;  %v1909_v37 = vsel %vm1902_vm9, %v9451_v35, -inf }
 0x4b0   : > { %v1875_v29 = vmul.f32 0.35355338, %v1704_v36  ;;  %v1879_v41 = vmul.f32 0.35355338, %v1838_v22  ;;  %v7169_v44 = vpop.f32.mrb[15].mxu0  ;;  %1910 = vmax.xlane.f32.xlu0 %v1909_v37  ;;  %v7143_v45 = vpop.f32.mrb[7].mxu1 }
 0x4b2   : > { %v9457_v48 = vsel %vm1572_vm8, %v1875_v29, -1e+30  ;;  %v9463_v40 = vsel %vm1572_vm8, %v1879_v41, -1e+30 }
 0x4b3   : > { %v1709_v49 = vpop.f32.mrb[8].mxu1  ;;  %v1843_v30 = vpop.f32.mrb[16].mxu0  ;;  %v1912_v50 = vsel %vm1902_vm9, %v9457_v48, -inf  ;;  %v1924_v15 = vsel %vm1902_vm9, %v9463_v40, -inf }
 0x4b4   : > { %v1876_v51 = vmul.f32 0.35355338, %v1709_v49  ;;  %v1880_v54 = vmul.f32 0.35355338, %v1843_v30  ;;  %v7172_v42 = vpop.f32.mrb[17].mxu0  ;;  %1913 = vmax.xlane.f32.xlu0 %v1912_v50  ;;  %v7146_v53 = vpop.f32.mrb[9].mxu1 }
 0x4b6   : > { %v9467_v56 = vsel %vm1572_vm8, %v1876_v51, -1e+30  ;;  %v9475_v63 = vsel %vm1572_vm8, %v1880_v54, -1e+30 }
 0x4b7   : > { %v1714_v39 = vpop.f32.mrb[10].mxu1  ;;  %v1848_v43 = vpop.f32.mrb[18].mxu0  ;;  %v1915_v16 = vsel %vm1902_vm9, %v9467_v56, -inf  ;;  %v1927_v12 = vsel %vm1902_vm9, %v9475_v63, -inf }
 0x4b8   : > { %v1877_v18 = vmul.f32 0.35355338, %v1714_v39  ;;  %v1881_v19 = vmul.f32 0.35355338, %v1848_v43  ;;  %v7175_v20 = vpop.f32.mrb[19].mxu0  ;;  %1925 = vmax.xlane.f32.xlu0 %v1924_v15  ;;  %1916 = vmax.xlane.f32.xlu1 %v1915_v16  ;;  %v7149_v11 = vpop.f32.mrb[11].mxu1 }
 0x4ba   : > { %v9479_v24 = vsel %vm1572_vm8, %v1877_v18, -1e+30  ;;  %v9487_v21 = vsel %vm1572_vm8, %v1881_v19, -1e+30 }
 0x4bb   : > { %v1719_v25 = vpop.f32.mrb[12].mxu1  ;;  %v1853_v26 = vpop.f32.mrb[20].mxu0  ;;  %v1918_v28 = vsel %vm1902_vm9, %v9479_v24, -inf  ;;  %v1930_v22 = vsel %vm1902_vm9, %v9487_v21, -inf }
 0x4bc   : > { %v1878_v1 = vmul.f32 0.35355338, %v1719_v25  ;;  %v1882_v2 = vmul.f32 0.35355338, %v1853_v26  ;;  %v7178_v31 = vpop.f32.mrb[21].mxu0  ;;  %1928 = vmax.xlane.f32.xlu0 %v1927_v12  ;;  %1919 = vmax.xlane.f32.xlu1 %v1918_v28  ;;  %v7152_v33 = vpop.f32.mrb[13].mxu1 }
 0x4be   : > { %v9491_v34 = vsel %vm1572_vm8, %v1878_v1, -1e+30  ;;  %v9499_v44 = vsel %vm1572_vm8, %v1882_v2, -1e+30 }
 0x4bf   : > { %v1858_v36 = vpop.f32.mrb[22].mxu0  ;;  %v1921_v37 = vsel %vm1902_vm9, %v9491_v34, -inf  ;;  %v1933_v30 = vsel %vm1902_vm9, %v9499_v44, -inf }
 0x4c0   : > { %v1883_v29 = vmul.f32 0.35355338, %v1858_v36  ;;  %v7181_v41 = vpop.f32.mrb[23].mxu0  ;;  %1931 = vmax.xlane.f32.xlu0 %v1930_v22  ;;  %1922 = vmax.xlane.f32.xlu1 %v1921_v37 }
 0x4c2   : > { %v9503_v45 = vsel %vm1572_vm8, %v1883_v29, -1e+30 }
 0x4c3   : > { %v1863_v49 = vpop.f32.mrb[24].mxu0  ;;  %v1936_v50 = vsel %vm1902_vm9, %v9503_v45, -inf }
 0x4c4   : > { %v1884_v51 = vmul.f32 0.35355338, %v1863_v49  ;;  %v7184_v54 = vpop.f32.mrb[25].mxu0  ;;  %1934 = vmax.xlane.f32.xlu0 %v1933_v30  ;;  %1937 = vmax.xlane.f32.xlu1 %v1936_v50 }
 0x4c6   : > { %v9511_v42 = vsel %vm1572_vm8, %v1884_v51, -1e+30 }
 0x4c7   : > { %v1868_v53 = vpop.f32.mrb[26].mxu0  ;;  %v1939_v39 = vsel %vm1902_vm9, %v9511_v42, -inf }
 0x4c8   : > { %v7187_v43 = vpop.f32.mrb[27].mxu0  ;;  %1940 = vmax.xlane.f32.xlu0 %v1939_v39  ;;  %v1885_v15 = vmul.f32 0.35355338, %v1868_v53 }
 0x4ca   : > { %v9521_v16 = vsel %vm1572_vm8, %v1885_v15, -1e+30 }
 0x4cb   : > { %v1942_v18 = vsel %vm1902_vm9, %v9521_v16, -inf }
 0x4d5   : > { %8140 = vrot.lane.b32.xlu1 %v9322_v13, %s8729_s2 }
 0x4de   : > { %8135 = vrot.lane.b32.xlu0 %v9273_v46, %s8730_s8 }
 0x4f9   : > { %1943 = vmax.xlane.f32.xlu1 %v1942_v18 }
 0x50a   : > { %8145 = vrot.lane.b32.xlu1 %v9282_v47, %s8730_s8 }
 0x50e   : > { %8150 = vrot.lane.b32.xlu1 %v9303_v6, %s8730_s8 }
 0x512   : > { %8155 = vrot.lane.b32.xlu1 %v9291_v61, %s8730_s8 }
 0x516   : > { %8160 = vrot.lane.b32.xlu1 %v9312_v8, %s8730_s8 }
 0x51a   : > { %2367 = vrot.lane.b32.xlu1 %v9295_v4, %s8730_s8 }
 0x535   : > { %v1905_v19 = vpop.xlane.xlu0 %1904 }
 0x536   : > { %v1945_v20 = vsub.f32 %v9439_v27, %v1905_v19 }
 0x538   : > { %v1959_v11 = vmul.f32 1.442695, %v1945_v20 }
 0x539   : > { %v1908_v25 = vpop.xlane.xlu1 %1907 }
 0x53a   : > { %8347 = vpow2.f32 %v1959_v11  ;;  %v1946_v26 = vsub.f32 %v9445_v0, %v1908_v25 }
 0x53c   : > { %v1961_v12 = vmul.f32 1.442695, %v1946_v26 }
 0x53d   : > { %v1911_v28 = vpop.xlane.xlu0 %1910 }
 0x53e   : > { %8349 = vpow2.f32 %v1961_v12  ;;  %v1947_v1 = vsub.f32 %v9451_v35, %v1911_v28 }
 0x540   : > { %v1963_v2 = vmul.f32 1.442695, %v1947_v1 }
 0x541   : > { %v1914_v31 = vpop.xlane.xlu0 %1913 }
 0x542   : > { %8351 = vpow2.f32 %v1963_v2  ;;  %v1948_v33 = vsub.f32 %v9457_v48, %v1914_v31 }
 0x544   : > { %v9539_v36 = vpop.eup %8347  ;;  %v1965_v22 = vmul.f32 1.442695, %v1948_v33 }
 0x545   : > { %v9541_v37 = vpop.xlane.xlu0 %1925  ;;  %v1917_v27 = vpop.xlane.xlu1 %1916  ;;  %v1987_v29 = vsel %vm1902_vm9, %v9539_v36, 0.0 }
 0x546   : > { %8353 = vpow2.f32 %v1965_v22  ;;  %v1949_v0 = vsub.f32 %v9467_v56, %v1917_v27  ;;  %1988 = vadd.xlane.f32.xlu0 %v1987_v29 }
 0x548   : > { %v9546_v41 = vpop.eup %8349  ;;  %v1967_v35 = vmul.f32 1.442695, %v1949_v0 }
 0x549   : > { %v1929_v49 = vpop.xlane.xlu0 %1928  ;;  %v1920_v30 = vpop.xlane.xlu1 %1919  ;;  %v1990_v48 = vsel %vm1902_vm9, %v9546_v41, 0.0 }
 0x54a   : > { %v1953_v50 = vsub.f32 %v9475_v63, %v1929_v49  ;;  %v1950_v51 = vsub.f32 %v9479_v24, %v1920_v30  ;;  %1991 = vadd.xlane.f32.xlu1 %v1990_v48  ;;  %8355 = vpow2.f32 %v1967_v35  ;;  %v1952_v48 = vsub.f32 %v9463_v40, %v9541_v37 }
 0x54c   : > { %v9552_v54 = vpop.eup %8351  ;;  %v1975_v53 = vmul.f32 1.442695, %v1953_v50  ;;  %v1969_v15 = vmul.f32 1.442695, %v1950_v51 }
 0x54d   : > { %v1932_v39 = vpop.xlane.xlu0 %1931  ;;  %v1923_v56 = vpop.xlane.xlu1 %1922  ;;  %v1993_v43 = vsel %vm1902_vm9, %v9552_v54, 0.0 }
 0x54e   : > { %8357 = vpow2.f32 %v1975_v53  ;;  %v1951_v18 = vsub.f32 %v9491_v34, %v1923_v56  ;;  %1994 = vadd.xlane.f32.xlu1 %v1993_v43  ;;  %v1973_v53 = vmul.f32 1.442695, %v1952_v48  ;;  %v1954_v56 = vsub.f32 %v9487_v21, %v1932_v39 }
 0x54f   : > { %8359 = vpow2.f32 %v1969_v15 }
 0x550   : > { %v9557_v19 = vpop.eup %8353  ;;  %v1971_v63 = vmul.f32 1.442695, %v1951_v18  ;;  %v1977_v15 = vmul.f32 1.442695, %v1954_v56 }
 0x551   : > { %v1935_v20 = vpop.xlane.xlu0 %1934  ;;  %v1938_v24 = vpop.xlane.xlu1 %1937  ;;  %v1996_v11 = vsel %vm1902_vm9, %v9557_v19, 0.0 }
 0x552   : > { %v1955_v25 = vsub.f32 %v9499_v44, %v1935_v20  ;;  %1997 = vadd.xlane.f32.xlu1 %v1996_v11  ;;  %8361 = vpow2.f32 %v1971_v63  ;;  %v1956_v18 = vsub.f32 %v9503_v45, %v1938_v24 }
 0x554   : > { %v9562_v26 = vpop.eup %8355  ;;  %v1979_v1 = vmul.f32 1.442695, %v1955_v25  ;;  %v1981_v63 = vmul.f32 1.442695, %v1956_v18 }
 0x555   : > { %v1941_v12 = vpop.xlane.xlu0 %1940  ;;  %v8141_v28 = vpop.permute.xlu1 %8140  ;;  %v1999_v33 = vsel %vm1902_vm9, %v9562_v26, 0.0 }
 0x556   : > { %v1957_v34 = vsub.f32 %v9511_v42, %v1941_v12  ;;  %v8143_v2 = vunpack.i.h.bf16 %v8141_v28  ;;  %v8142_v31 = vunpack.i.l.bf16 %v8141_v28  ;;  %2000 = vadd.xlane.f32.xlu1 %v1999_v33  ;;  %8363 = vpow2.f32 %v1979_v1 }
 0x558   : > { %v9567_v22 = vpop.eup %8357  ;;  %v7848_v27 = vpack.c.bf16 %v8143_v2, %v8142_v31  ;;  %v1983_v29 = vmul.f32 1.442695, %v1957_v34 }
 0x559   : > { %v2011_v44 = vsel %vm1902_vm9, %v9567_v22, 0.0  ;;  %v9572_v0 = vpop.eup %8359  ;;  %v8136_v31 = vpop.permute.xlu0 %8135 }
 0x55a   : > { %7849 = vmatpush3.bf16.msra.mxu0 %v7848_v27  ;;  %2012 = vadd.xlane.f32.xlu1 %v2011_v44  ;;  %8365 = vpow2.f32 %v1983_v29  ;;  %v2002_v35 = vsel %vm1902_vm9, %v9572_v0, 0.0  ;;  %v8137_v48 = vunpack.i.l.bf16 %v8136_v31 }
 0x55b   : > { %7235 = vmatprep.subr.mxu0 %v11622_v14  ;;  %8367 = vpow2.f32 %v1973_v53 }
 0x55c   : > { %2211 = vrot.lane.b32.xlu0 %v9316_v9, %s8729_s2  ;;  %v9576_v42 = vpop.eup %8361  ;;  %8369 = vpow2.f32 %v1977_v15  ;;  %s8739_s2 = smov 8  }
 0x55d   : > { %v2005_v49 = vsel %vm1902_vm9, %v9576_v42, 0.0  ;;  %8371 = vpow2.f32 %v1981_v63 }
 0x55e   : > { %2003 = vadd.xlane.f32.xlu1 %v2002_v35 }
 0x560   : > { %v9582_v30 = vpop.eup %8363 }
 0x561   : > { %v2017_v50 = vsel %vm1902_vm9, %v9582_v30, 0.0 }
 0x562   : > { %2006 = vadd.xlane.f32.xlu1 %v2005_v49  ;;  %v8138_v49 = vunpack.i.h.bf16 %v8136_v31 }
 0x564   : > { %v9588_v51 = vpop.eup %8365 }
 0x565   : > { %v2023_v43 = vsel %vm1902_vm9, %v9588_v51, 0.0  ;;  %v9594_v40 = vpop.eup %8367 }
 0x566   : > { %2018 = vadd.xlane.f32.xlu1 %v2017_v50  ;;  %v2008_v37 = vsel %vm1902_vm9, %v9594_v40, 0.0  ;;  %v9598_v20 = vpop.eup %8369 }
 0x567   : > { %v2014_v21 = vsel %vm1902_vm9, %v9598_v20, 0.0  ;;  %v9604_v39 = vpop.eup %8371 }
 0x568   : > { %v2020_v45 = vsel %vm1902_vm9, %v9604_v39, 0.0 }
 0x56a   : > { %2024 = vadd.xlane.f32.xlu1 %v2023_v43  ;;  %v7851_v43 = vpack.c.bf16 %v8138_v49, %v8137_v48 }
 0x57b   : > { %2009 = vadd.xlane.f32.xlu0 %v2008_v37  ;;  %8165 = vrot.lane.b32.xlu1 %v9322_v13, %s8730_s8 }
 0x57f   : > { %2015 = vadd.xlane.f32.xlu0 %v2014_v21  ;;  %2343 = vrot.lane.b32.xlu1 %v9267_v58, %s8731_s3 }
 0x583   : > { %2021 = vadd.xlane.f32.xlu0 %v2020_v45  ;;  %2345 = vrot.lane.b32.xlu1 %v9278_v38, %s8731_s3 }
 0x586   : > { %v1944_v24 = vpop.xlane.xlu1 %1943 }
 0x587   : > { %v1958_v11 = vsub.f32 %v9521_v16, %v1944_v24  ;;  %2523 = vrot.lane.b32.xlu1 %v9316_v9, %s8730_s8  ;;  %s8740_s8 = smov 16  }
 0x589   : > { %v1985_v25 = vmul.f32 1.442695, %v1958_v11 }
 0x58a   : > { %v8146_v16 = vpop.permute.xlu1 %8145 }
 0x58b   : > { %8373 = vpow2.f32 %v1985_v25  ;;  %2347 = vrot.lane.b32.xlu1 %v9276_v32, %s8731_s3  ;;  %v8147_v63 = vunpack.i.l.bf16 %v8146_v16 }
 0x58e   : > { %v9649_v1 = vpop.permute.xlu1 %8150 }
 0x58f   : > { %2497 = vrot.lane.b32.xlu1 %v9293_v3, %s8731_s3 }
 0x592   : > { %v8156_v34 = vpop.permute.xlu1 %8155 }
 0x593   : > { %2499 = vrot.lane.b32.xlu1 %v9299_v5, %s8731_s3 }
 0x595   : > { %v9619_v12 = vpop.eup %8373 }
 0x596   : > { %v2026_v28 = vsel %vm1902_vm9, %v9619_v12, 0.0  ;;  %v9655_v2 = vpop.permute.xlu1 %8160 }
 0x597   : > { %2027 = vadd.xlane.f32.xlu0 %v2026_v28  ;;  %2501 = vrot.lane.b32.xlu1 %v9297_v62, %s8731_s3  ;;  %v8158_v28 = vunpack.i.h.bf16 %v8156_v34 }
 0x59a   : > { %v2368_v33 = vpop.permute.xlu1 %2367 }
 0x59b   : > { %2503 = vrot.lane.b32.xlu1 %v9308_v7, %s8731_s3 }
 0x59f   : > { %2507 = vrot.lane.b32.xlu1 %v9318_v10, %s8731_s3 }
 0x5a3   : > { %8175 = vrot.lane.b32.xlu1 %v9282_v47, %s8732_s20 }
 0x5a7   : > { %8185 = vrot.lane.b32.xlu1 %v9303_v6, %s8732_s20 }
 0x5ab   : > { %2847 = vrot.lane.b32.xlu1 %v9295_v4, %s8732_s20 }
 0x5ad   : > { %2341 = vrot.lane.b32.xlu0 %v9269_v52, %s8731_s3 }
 0x5af   : > { %8195 = vrot.lane.b32.xlu1 %v9273_v46, %s8733_s23 }
 0x5b1   : > { %2349 = vrot.lane.b32.xlu0 %v9287_v60, %s8731_s3 }
 0x5b3   : > { %8200 = vrot.lane.b32.xlu1 %v9322_v13, %s8732_s20 }
 0x5b5   : > { %2351 = vrot.lane.b32.xlu0 %v9285_v59, %s8731_s3 }
 0x5b7   : > { %8215 = vrot.lane.b32.xlu1 %v9291_v61, %s8733_s23 }
 0x5b9   : > { %2353 = vrot.lane.b32.xlu0 %v9295_v4, %s8731_s3 }
 0x5bd   : > { %2505 = vrot.lane.b32.xlu0 %v9306_v55, %s8731_s3 }
 0x5c1   : > { %2509 = vrot.lane.b32.xlu0 %v9316_v9, %s8731_s3  ;;  %s8741_s3 = smov 24  }
 0x5c5   : > { %8170 = vrot.lane.b32.xlu0 %v9273_v46, %s8732_s20 }
 0x5c9   : > { %8180 = vrot.lane.b32.xlu0 %v9291_v61, %s8732_s20 }
 0x5cd   : > { %8190 = vrot.lane.b32.xlu0 %v9312_v8, %s8732_s20 }
 0x5d1   : > { %2989 = vrot.lane.b32.xlu0 %v9316_v9, %s8732_s20 }
 0x5d3   : > { %v1989_v27 = vpop.xlane.xlu0 %1988 }
 0x5d4   : > { %8375 = vrcp.f32 %v1989_v27 }
 0x5d5   : > { %8205 = vrot.lane.b32.xlu0 %v9282_v47, %s8733_s23 }
 0x5d7   : > { %v2212_v44 = vpop.permute.xlu0 %2211  ;;  %v1992_v29 = vpop.xlane.xlu1 %1991 }
 0x5d8   : > { %8377 = vrcp.f32 %v1992_v29  ;;  %7236 = vmatpush3.msra.mxu0 %v2212_v44 }
 0x5d9   : > { %8210 = vrot.lane.b32.xlu0 %v9303_v6, %s8733_s23  ;;  %7862 = vmatprep.subr.bf16.mxu0 %v11620_v57 }
 0x5db   : > { %v1995_v35 = vpop.xlane.xlu1 %1994 }
 0x5dc   : > { %8379 = vrcp.f32 %v1995_v35 }
 0x5dd   : > { %8220 = vrot.lane.b32.xlu0 %v9312_v8, %s8733_s23 }
 0x5de   : > { %v8376_v50 = vpop.eup %8375 }
 0x5df   : > { %v2030_v53 = vmul.f32 %v8376_v50, %v9539_v36  ;;  %v1998_v56 = vpop.xlane.xlu1 %1997  ;;  %v8148_v36 = vunpack.i.h.bf16 %v8146_v16  ;;  %v8157_v16 = vunpack.i.l.bf16 %v8156_v34 }
 0x5e0   : > { %8381 = vrcp.f32 %v1998_v56 }
 0x5e1   : > { %7203 = vmatmul.mubr.msk.f32.vlgmr.msra.gmra.mrb[14].mxu1 %vm1902_vm9, %v2030_v53  ;;  %3145 = vrot.lane.b32.xlu0 %v9295_v4, %s8733_s23  ;;  %v7855_v24 = vpack.c.bf16 %v8148_v36, %v8147_v63  ;;  %v7859_v27 = vpack.c.bf16 %v8158_v28, %v8157_v16 }
 0x5e2   : > { %v8378_v15 = vpop.eup %8377  ;;  %7853 = vmatpush3.bf16.xpose.msk.msra.mxu1 %vm9345_vm7, %v7851_v43  ;;  %7205 = vmatprep.mubr.msk.f32.mxu1 %vm8727_vm5, %v11622_v14 }
 0x5e3   : > { %v2032_v18 = vmul.f32 %v8378_v15, %v9546_v41  ;;  %7854 = vmatprep.subr.bf16.mxu1 %v11620_v57  ;;  %v2001_v37 = vpop.xlane.xlu1 %2000 }
 0x5e4   : > { %8383 = vrcp.f32 %v2001_v37 }
 0x5e5   : > { %7206 = vmatmul.mubr.msk.f32.gmra.mrb[16].mxu1 %vm1902_vm9, %v2032_v18  ;;  %v8152_v18 = vunpack.i.l.bf16 %v9649_v1 }
 0x5e6   : > { %v8380_v21 = vpop.eup %8379  ;;  %7208 = vmatprep.mubr.msk.f32.mxu1 %vm8727_vm5, %v11622_v14 }
 0x5e7   : > { %v2034_v45 = vmul.f32 %v8380_v21, %v9552_v54  ;;  %v2013_v11 = vpop.xlane.xlu1 %2012 }
 0x5e9   : > { %7209 = vmatmul.mubr.msk.f32.gmra.mrb[18].mxu1 %vm1902_vm9, %v2034_v45 }
 0x5ea   : > { %v8382_v25 = vpop.eup %8381  ;;  %7857 = vmatpush3.bf16.xpose.msk.msra.mxu1 %vm9345_vm7, %v7855_v24  ;;  %7211 = vmatprep.mubr.msk.f32.mxu1 %vm8727_vm5, %v11622_v14 }
 0x5eb   : > { %v2036_v41 = vmul.f32 %v8382_v25, %v9557_v19  ;;  %7858 = vmatprep.subr.bf16.mxu1 %v11620_v57  ;;  %v2004_v31 = vpop.xlane.xlu1 %2003 }
 0x5ec   : > { %8385 = vrcp.f32 %v2004_v31 }
 0x5ed   : > { %7212 = vmatmul.mubr.msk.f32.gmra.mrb[20].mxu1 %vm1902_vm9, %v2036_v41  ;;  %v8162_v41 = vunpack.i.l.bf16 %v9655_v2 }
 0x5ee   : > { %7214 = vmatprep.mubr.msk.f32.mxu1 %vm8727_vm5, %v11622_v14  ;;  %v8384_v54 = vpop.eup %8383 }
 0x5ef   : > { %v2007_v44 = vpop.xlane.xlu1 %2006  ;;  %v2038_v29 = vmul.f32 %v8384_v54, %v9562_v26 }
 0x5f0   : > { %8387 = vrcp.f32 %v2007_v44 }
 0x5f1   : > { %7215 = vmatmul.mubr.msk.f32.gmra.mrb[22].mxu1 %vm1902_vm9, %v2038_v29 }
 0x5f2   : > { %7861 = vmatpush3.bf16.xpose.msk.msra.mxu1 %vm9345_vm7, %v7859_v27  ;;  %7217 = vmatprep.mubr.msk.f32.mxu1 %vm8727_vm5, %v11622_v14 }
 0x5f3   : > { %7270 = vmatprep.subr.mxu1 %v11622_v14  ;;  %v2019_v19 = vpop.xlane.xlu1 %2018 }
 0x5f6   : > { %v8386_v34 = vpop.eup %8385 }
 0x5f7   : > { %v2025_v35 = vpop.xlane.xlu1 %2024  ;;  %v2040_v49 = vmul.f32 %v8386_v34, %v9572_v0 }
 0x5f9   : > { %7218 = vmatmul.mubr.msk.f32.gmra.mrb[24].mxu1 %vm1902_vm9, %v2040_v49 }
 0x5fa   : > { %7271 = vmatpush3.xpose.msk.msra.mxu1 %vm1594_vm6, %v2368_v33  ;;  %v8388_v26 = vpop.eup %8387  ;;  %7220 = vmatprep.mubr.msk.f32.mxu1 %vm8727_vm5, %v11622_v14 }
 0x5fb   : > { %7874 = vmatprep.subr.bf16.mxu1 %v11620_v57  ;;  %v8166_v48 = vpop.permute.xlu1 %8165  ;;  %v2042_v50 = vmul.f32 %v8388_v26, %v9576_v42  ;;  %v8153_v42 = vunpack.i.h.bf16 %v9649_v1 }
 0x5fc   : > { %v8168_v44 = vunpack.i.h.bf16 %v8166_v48  ;;  %v8167_v29 = vunpack.i.l.bf16 %v8166_v48 }
 0x5fd   : > { %7221 = vmatmul.mubr.msk.f32.gmra.mrb[26].mxu1 %vm1902_vm9, %v2042_v50  ;;  %v7863_v24 = vpack.c.bf16 %v8153_v42, %v8152_v18 }
 0x5fe   : > { %7272 = vmatprep.mubr.msk.f32.mxu1 %vm8727_vm5, %v11622_v14  ;;  %v7871_v49 = vpack.c.bf16 %v8168_v44, %v8167_v29 }
 0x5ff   : > { %v9707_v53 = vpop.permute.xlu1 %2343 }
 0x603   : > { %v9709_v0 = vpop.permute.xlu1 %2345 }
 0x607   : > { %v9711_v56 = vpop.permute.xlu1 %2523 }
 0x608   : > { %v2010_v33 = vpop.xlane.xlu0 %2009 }
 0x609   : > { %8389 = vrcp.f32 %v2010_v33 }
 0x60a   : > { %8391 = vrcp.f32 %v2013_v11 }
 0x60b   : > { %v9713_v15 = vpop.permute.xlu1 %2347 }
 0x60c   : > { %v2016_v43 = vpop.xlane.xlu0 %2015 }
 0x60d   : > { %8393 = vrcp.f32 %v2016_v43 }
 0x60e   : > { %8395 = vrcp.f32 %v2019_v19 }
 0x60f   : > { %v9717_v36 = vpop.permute.xlu1 %2497 }
 0x610   : > { %v2022_v21 = vpop.xlane.xlu0 %2021 }
 0x611   : > { %8397 = vrcp.f32 %v2022_v21 }
 0x612   : > { %8399 = vrcp.f32 %v2025_v35 }
 0x613   : > { %v8390_v63 = vpop.eup %8389  ;;  %v9720_v25 = vpop.permute.xlu1 %2499 }
 0x614   : > { %v2044_v37 = vmul.f32 %v8390_v63, %v9594_v40  ;;  %v8392_v45 = vpop.eup %8391  ;;  %v8163_v40 = vunpack.i.h.bf16 %v9655_v2 }
 0x615   : > { %v2046_v1 = vmul.f32 %v8392_v45, %v9567_v22 }
 0x616   : > { %7238 = vmatmul.mubr.msk.f32.vlgmr.msra.gmra.mrb[28].mxu0 %vm1902_vm9, %v2044_v37  ;;  %v7867_v54 = vpack.c.bf16 %v8163_v40, %v8162_v41 }
 0x617   : > { %7865 = vmatpush3.bf16.xpose.msk.msra.mxu0 %vm9345_vm7, %v7863_v24  ;;  %7240 = vmatprep.mubr.msk.f32.mxu0 %vm8727_vm5, %v11622_v14  ;;  %v8394_v11 = vpop.eup %8393  ;;  %v9731_v28 = vpop.permute.xlu1 %2501 }
 0x618   : > { %7866 = vmatprep.subr.bf16.mxu0 %v11620_v57  ;;  %v2048_v16 = vmul.f32 %v8394_v11, %v9598_v20  ;;  %v8396_v31 = vpop.eup %8395 }
 0x619   : > { %v2050_v2 = vmul.f32 %v8396_v31, %v9582_v30 }
 0x61a   : > { %7241 = vmatmul.mubr.msk.f32.gmra.mrb[30].mxu0 %vm1902_vm9, %v2046_v1 }
 0x61b   : > { %7243 = vmatprep.mubr.msk.f32.mxu0 %vm8727_vm5, %v11622_v14  ;;  %v9737_v22 = vpop.permute.xlu1 %2503  ;;  %v8398_v27 = vpop.eup %8397 }
 0x61c   : > { %v2052_v34 = vmul.f32 %v8398_v27, %v9604_v39  ;;  %v8400_v35 = vpop.eup %8399 }
 0x61d   : > { %v2054_v48 = vmul.f32 %v8400_v35, %v9588_v51 }
 0x61e   : > { %7244 = vmatmul.mubr.msk.f32.gmra.mrb[32].mxu0 %vm1902_vm9, %v2048_v16 }
 0x61f   : > { %7869 = vmatpush3.bf16.xpose.msk.msra.mxu0 %vm9345_vm7, %v7867_v54  ;;  %7246 = vmatprep.mubr.msk.f32.mxu0 %vm8727_vm5, %v11622_v14  ;;  %v9746_v20 = vpop.permute.xlu1 %2507 }
 0x620   : > { %7870 = vmatprep.subr.bf16.mxu0 %v11620_v57 }
 0x622   : > { %7247 = vmatmul.mubr.msk.f32.gmra.mrb[34].mxu0 %vm1902_vm9, %v2050_v2 }
 0x623   : > { %7249 = vmatprep.mubr.msk.f32.mxu0 %vm8727_vm5, %v11622_v14  ;;  %v8176_v30 = vpop.permute.xlu1 %8175 }
 0x624   : > { %v2028_v19 = vpop.xlane.xlu0 %2027  ;;  %v8178_v45 = vunpack.i.h.bf16 %v8176_v30  ;;  %v8177_v24 = vunpack.i.l.bf16 %v8176_v30 }
 0x625   : > { %8401 = vrcp.f32 %v2028_v19 }
 0x626   : > { %7250 = vmatmul.mubr.msk.f32.gmra.mrb[36].mxu0 %vm1902_vm9, %v2052_v34  ;;  %v7878_v11 = vpack.c.bf16 %v8178_v45, %v8177_v24 }
 0x627   : > { %7873 = vmatpush3.bf16.xpose.msk.msra.mxu0 %vm9345_vm7, %v7871_v49  ;;  %7252 = vmatprep.mubr.msk.f32.mxu0 %vm8727_vm5, %v11622_v14  ;;  %v8186_v50 = vpop.permute.xlu1 %8185 }
 0x628   : > { %v2342_v26 = vpop.permute.xlu0 %2341  ;;  %7305 = vmatprep.subr.mxu0 %v11622_v14  ;;  %v8188_v42 = vunpack.i.h.bf16 %v8186_v50  ;;  %v8187_v18 = vunpack.i.l.bf16 %v8186_v50 }
 0x629   : > { %7273 = vmatmul.mubr.msk.f32.vlgmr.msra.gmra.mrb[28].mxu1 %vm1594_vm6, %v2342_v26 }
 0x62a   : > { %7253 = vmatmul.mubr.msk.f32.gmra.mrb[38].mxu0 %vm1902_vm9, %v2054_v48  ;;  %7275 = vmatprep.mubr.msk.f32.mxu1 %vm8727_vm5, %v11622_v14 }
 0x62b   : > { %7255 = vmatprep.mubr.msk.f32.mxu0 %vm8727_vm5, %v11622_v14 }
 0x62c   : > { %v2350_v39 = vpop.permute.xlu0 %2349 }
 0x62d   : > { %7276 = vmatmul.mubr.msk.f32.gmra.mrb[30].mxu1 %vm1594_vm6, %v9707_v53 }
 0x62e   : > { %7278 = vmatprep.mubr.msk.f32.mxu1 %vm8727_vm5, %v11622_v14 }
 0x62f   : > { %v8402_v51 = vpop.eup %8401  ;;  %7306 = vmatpush3.xpose.msk.msra.mxu0 %vm1594_vm6, %v9711_v56  ;;  %v7884_v56 = vpack.c.bf16 %v8188_v42, %v8187_v18 }
 0x630   : > { %v2352_v33 = vpop.permute.xlu0 %2351  ;;  %v2056_v43 = vmul.f32 %v8402_v51, %v9619_v12  ;;  %7883 = vmatprep.subr.bf16.mxu0 %v11620_v57 }
 0x631   : > { %7279 = vmatmul.mubr.msk.f32.gmra.mrb[32].mxu1 %vm1594_vm6, %v9709_v0  ;;  %v2848_v0 = vpop.permute.xlu1 %2847 }
 0x632   : > { %7256 = vmatmul.mubr.msk.f32.gmra.mrb[40].mxu0 %vm1902_vm9, %v2056_v43  ;;  %7281 = vmatprep.mubr.msk.f32.mxu1 %vm8727_vm5, %v11622_v14 }
 0x633   : > { %7307 = vmatprep.mubr.msk.f32.mxu0 %vm8727_vm5, %v11622_v14 }
 0x634   : > { %v2354_v53 = vpop.permute.xlu0 %2353 }
 0x635   : > { %7282 = vmatmul.mubr.msk.f32.gmra.mrb[34].mxu1 %vm1594_vm6, %v9713_v15  ;;  %v9804_v21 = vpop.permute.xlu1 %8195 }
 0x636   : > { %7308 = vmatmul.mubr.msk.f32.vlgmr.msra.gmra.mrb[42].mxu0 %vm1594_vm6, %v9717_v36  ;;  %7284 = vmatprep.mubr.msk.f32.mxu1 %vm8727_vm5, %v11622_v14 }
 0x637   : > { %7885 = vmatpush3.bf16.msra.mxu0 %v7884_v56  ;;  %7310 = vmatprep.mubr.msk.f32.mxu0 %vm8727_vm5, %v11622_v14 }
 0x638   : > { %v2506_v12 = vpop.permute.xlu0 %2505  ;;  %7886 = vmatprep.subr.bf16.mxu0 %v11620_v57 }
 0x639   : > { %7285 = vmatmul.mubr.msk.f32.gmra.mrb[36].mxu1 %vm1594_vm6, %v2350_v39 }
 0x63a   : > { %7311 = vmatmul.mubr.msk.f32.gmra.mrb[44].mxu0 %vm1594_vm6, %v9720_v25  ;;  %7287 = vmatprep.mubr.msk.f32.mxu1 %vm8727_vm5, %v11622_v14 }
 0x63b   : > { %7313 = vmatprep.mubr.msk.f32.mxu0 %vm8727_vm5, %v11622_v14 }
 0x63c   : > { %v2510_v15 = vpop.permute.xlu0 %2509 }
 0x63d   : > { %7288 = vmatmul.mubr.msk.f32.gmra.mrb[38].mxu1 %vm1594_vm6, %v2352_v33 }
 0x63e   : > { %7314 = vmatmul.mubr.msk.f32.gmra.mrb[46].mxu0 %vm1594_vm6, %v9731_v28  ;;  %7290 = vmatprep.mubr.msk.f32.mxu1 %vm8727_vm5, %v11622_v14  ;;  %v8201_v28 = vpop.permute.xlu1 %8200 }
 0x63f   : > { %7316 = vmatprep.mubr.msk.f32.mxu0 %vm8727_vm5, %v11622_v14  ;;  %v8202_v2 = vunpack.i.l.bf16 %v8201_v28 }
 0x640   : > { %v8171_v36 = vpop.permute.xlu0 %8170 }
 0x641   : > { %v8173_v63 = vunpack.i.h.bf16 %v8171_v36  ;;  %v8172_v37 = vunpack.i.l.bf16 %v8171_v36  ;;  %7291 = vmatmul.mubr.msk.f32.gmra.mrb[40].mxu1 %vm1594_vm6, %v2354_v53 }
 0x642   : > { %7317 = vmatmul.mubr.msk.f32.gmra.mrb[48].mxu0 %vm1594_vm6, %v9737_v22  ;;  %7342 = vmatprep.mubr.msk.f32.mxu1 %vm8727_vm5, %v11622_v14  ;;  %v8203_v22 = vunpack.i.h.bf16 %v8201_v28 }
 0x643   : > { %v7875_v25 = vpack.c.bf16 %v8173_v63, %v8172_v37  ;;  %7319 = vmatprep.mubr.msk.f32.mxu0 %vm8727_vm5, %v11622_v14 }
 0x644   : > { %v8181_v1 = vpop.permute.xlu0 %8180  ;;  %v7890_v29 = vpack.c.bf16 %v8203_v22, %v8202_v2 }
 0x645   : > { %7876 = vmatpush3.bf16.msra.mxu1 %v7875_v25  ;;  %v8183_v40 = vunpack.i.h.bf16 %v8181_v1  ;;  %v8182_v41 = vunpack.i.l.bf16 %v8181_v1 }
 0x646   : > { %7320 = vmatmul.mubr.msk.f32.gmra.mrb[50].mxu0 %vm1594_vm6, %v2506_v12  ;;  %7877 = vmatprep.subr.bf16.mxu1 %v11620_v57 }
 0x647   : > { %7322 = vmatprep.mubr.msk.f32.mxu0 %vm8727_vm5, %v11622_v14  ;;  %v7881_v27 = vpack.c.bf16 %v8183_v40, %v8182_v41 }
 0x648   : > { %v8191_v16 = vpop.permute.xlu0 %8190 }
 0x649   : > { %v8193_v31 = vunpack.i.h.bf16 %v8191_v16  ;;  %v8192_v54 = vunpack.i.l.bf16 %v8191_v16  ;;  %7879 = vmatpush3.bf16.msra.mxu1 %v7878_v11 }
 0x64a   : > { %7323 = vmatmul.mubr.msk.f32.gmra.mrb[52].mxu0 %vm1594_vm6, %v9746_v20  ;;  %7880 = vmatprep.subr.bf16.mxu1 %v11620_v57 }
 0x64b   : > { %v7887_v44 = vpack.c.bf16 %v8193_v31, %v8192_v54  ;;  %7325 = vmatprep.mubr.msk.f32.mxu0 %vm8727_vm5, %v11622_v14 }
 0x64c   : > { %v2990_v20 = vpop.permute.xlu0 %2989 }
 0x64d   : > { %7882 = vmatpush3.bf16.msra.mxu1 %v7881_v27  ;;  %7888 = vmatpush3.bf16.msra.mxu0 %v7887_v44 }
 0x64e   : > { %7326 = vmatmul.mubr.msk.f32.gmra.mrb[54].mxu0 %vm1594_vm6, %v2510_v15  ;;  %7340 = vmatprep.subr.mxu1 %v11622_v14 }
 0x64f   : > { %7889 = vmatprep.subr.bf16.mxu0 %v11620_v57  ;;  %7377 = vmatprep.mubr.msk.f32.mxu0 %vm8727_vm5, %v11622_v14 }
 0x651   : > { %7341 = vmatpush3.msra.mxu1 %v2848_v0  ;;  %7891 = vmatpush3.bf16.msra.mxu0 %v7890_v29 }
 0x652   : > { %7375 = vmatprep.subr.mxu0 %v11622_v14  ;;  %7892 = vmatprep.subr.bf16.mxu1 %v11620_v57 }
 0x655   : > { %7376 = vmatpush3.msra.mxu0 %v2990_v20 }
 0x656   : > { %7904 = vmatprep.subr.bf16.mxu0 %v11620_v57 }
 0x6b4   : > { %v9829_v19 = vpop.f32.mrb[14].mxu1 }
 0x6b5   : > { %11649 = vst [vmem:[#allocation9_spill] sm:$0xff] %v9829_v19  ;;  %v7204_v34 = vpop.f32.mrb[15].mxu1 }
 0x6b8   : > { %v9831_v35 = vpop.f32.mrb[16].mxu1 }
 0x6b9   : > { %11650 = vst [vmem:[#allocation10_spill] sm:$0xff] %v9831_v35  ;;  %v7207_v49 = vpop.f32.mrb[17].mxu1 }
 0x6bc   : > { %v9833_v30 = vpop.f32.mrb[18].mxu1 }
 0x6bd   : > { %11651 = vst [vmem:[#allocation11_spill] sm:$0xff] %v9833_v30  ;;  %v7210_v26 = vpop.f32.mrb[19].mxu1 }
 0x6c0   : > { %v9835_v48 = vpop.f32.mrb[20].mxu1 }
 0x6c1   : > { %11652 = vst [vmem:[#allocation12_spill] sm:$0xff] %v9835_v48  ;;  %v7213_v39 = vpop.f32.mrb[21].mxu1 }
 0x6c4   : > { %v9837_v50 = vpop.f32.mrb[22].mxu1 }
 0x6c5   : > { %11653 = vst [vmem:[#allocation13_spill] sm:$0xff] %v9837_v50  ;;  %v7216_v51 = vpop.f32.mrb[23].mxu1 }
 0x6cc   : > { %v9839_v33 = vpop.f32.mrb[24].mxu1 }
 0x6cd   : > { %11654 = vst [vmem:[#allocation14_spill] sm:$0xff] %v9839_v33  ;;  %v7219_v43 = vpop.f32.mrb[25].mxu1 }
 0x6d0   : > { %v9841_v42 = vpop.f32.mrb[26].mxu1 }
 0x6d1   : > { %11655 = vst [vmem:[#allocation15_spill] sm:$0xff] %v9841_v42  ;;  %v7222_v18 = vpop.f32.mrb[27].mxu1 }
 0x6e9   : > { %v9843_v53 = vpop.f32.mrb[28].mxu0 }
 0x6ea   : > { %11656 = vst [vmem:[#allocation16_spill] sm:$0xff] %v9843_v53  ;;  %v7239_v56 = vpop.f32.mrb[29].mxu0 }
 0x6ed   : > { %v9845_v12 = vpop.f32.mrb[30].mxu0 }
 0x6ee   : > { %11657 = vst [vmem:[#allocation17_spill] sm:$0xff] %v9845_v12  ;;  %v7242_v0 = vpop.f32.mrb[31].mxu0 }
 0x6f1   : > { %v9847_v15 = vpop.f32.mrb[32].mxu0 }
 0x6f2   : > { %11658 = vst [vmem:[#allocation18_spill] sm:$0xff] %v9847_v15  ;;  %v7245_v36 = vpop.f32.mrb[33].mxu0 }
 0x6f5   : > { %v9849_v63 = vpop.f32.mrb[34].mxu0 }
 0x6f6   : > { %11659 = vst [vmem:[#allocation19_spill] sm:$0xff] %v9849_v63  ;;  %v7248_v37 = vpop.f32.mrb[35].mxu0 }
 0x6f9   : > { %v9851_v45 = vpop.f32.mrb[36].mxu0 }
 0x6fa   : > { %11660 = vst [vmem:[#allocation20_spill] sm:$0xff] %v9851_v45  ;;  %v7251_v24 = vpop.f32.mrb[37].mxu0 }
 0x6fc   : > { %v2463_v25 = vpop.f32.mrb[28].mxu1 }
 0x6fd   : > { %v2653_v1 = vmul.f32 0.35355338, %v2463_v25  ;;  %v9853_v11 = vpop.f32.mrb[38].mxu0  ;;  %v7274_v40 = vpop.f32.mrb[29].mxu1 }
 0x6fe   : > { %11661 = vst [vmem:[#allocation21_spill] sm:$0xff] %v9853_v11  ;;  %v7254_v41 = vpop.f32.mrb[39].mxu0 }
 0x6ff   : > { %v9857_v28 = vsel %vm1572_vm8, %v2653_v1, -1e+30 }
 0x700   : > { %v2468_v16 = vpop.f32.mrb[30].mxu1  ;;  %v2681_v31 = vsel %vm1902_vm9, %v9857_v28, -inf }
 0x701   : > { %v2654_v54 = vmul.f32 0.35355338, %v2468_v16  ;;  %2682 = vmax.xlane.f32.xlu1 %v2681_v31  ;;  %v7277_v22 = vpop.f32.mrb[31].mxu1 }
 0x703   : > { %v9863_v2 = vsel %vm1572_vm8, %v2654_v54, -1e+30 }
 0x704   : > { %v2473_v27 = vpop.f32.mrb[32].mxu1  ;;  %v2684_v44 = vsel %vm1902_vm9, %v9863_v2, -inf }
 0x705   : > { %v2655_v29 = vmul.f32 0.35355338, %v2473_v27  ;;  %v9867_v20 = vpop.f32.mrb[40].mxu0  ;;  %2685 = vmax.xlane.f32.xlu0 %v2684_v44  ;;  %v7280_v34 = vpop.f32.mrb[33].mxu1 }
 0x706   : > { %11662 = vst [vmem:[#allocation22_spill] sm:$0xff] %v9867_v20  ;;  %v7257_v49 = vpop.f32.mrb[41].mxu0 }
 0x707   : > { %v9871_v26 = vsel %vm1572_vm8, %v2655_v29, -1e+30 }
 0x708   : > { %v2478_v39 = vpop.f32.mrb[34].mxu1  ;;  %v2687_v51 = vsel %vm1902_vm9, %v9871_v26, -inf }
 0x709   : > { %v2656_v43 = vmul.f32 0.35355338, %v2478_v39  ;;  %v2619_v18 = vpop.f32.mrb[42].mxu0  ;;  %2688 = vmax.xlane.f32.xlu0 %v2687_v51  ;;  %v7283_v56 = vpop.f32.mrb[35].mxu1 }
 0x70a   : > { %v2660_v0 = vmul.f32 0.35355338, %v2619_v18  ;;  %v7309_v36 = vpop.f32.mrb[43].mxu0 }
 0x70b   : > { %v9877_v37 = vsel %vm1572_vm8, %v2656_v43, -1e+30 }
 0x70c   : > { %v9881_v24 = vsel %vm1572_vm8, %v2660_v0, -1e+30  ;;  %v2483_v25 = vpop.f32.mrb[36].mxu1  ;;  %v2690_v1 = vsel %vm1902_vm9, %v9877_v37, -inf }
 0x70d   : > { %v2657_v40 = vmul.f32 0.35355338, %v2483_v25  ;;  %v2624_v41 = vpop.f32.mrb[44].mxu0  ;;  %2691 = vmax.xlane.f32.xlu1 %v2690_v1  ;;  %v7286_v16 = vpop.f32.mrb[37].mxu1  ;;  %v2702_v31 = vsel %vm1902_vm9, %v9881_v24, -inf }
 0x70e   : > { %v2661_v54 = vmul.f32 0.35355338, %v2624_v41  ;;  %v7312_v22 = vpop.f32.mrb[45].mxu0  ;;  %2703 = vmax.xlane.f32.xlu0 %v2702_v31 }
 0x70f   : > { %v9889_v27 = vsel %vm1572_vm8, %v2657_v40, -1e+30 }
 0x710   : > { %v9893_v44 = vsel %vm1572_vm8, %v2661_v54, -1e+30  ;;  %v2488_v29 = vpop.f32.mrb[38].mxu1  ;;  %v2693_v34 = vsel %vm1902_vm9, %v9889_v27, -inf }
 0x711   : > { %v2658_v49 = vmul.f32 0.35355338, %v2488_v29  ;;  %v2629_v39 = vpop.f32.mrb[46].mxu0  ;;  %2694 = vmax.xlane.f32.xlu1 %v2693_v34  ;;  %v7289_v51 = vpop.f32.mrb[39].mxu1  ;;  %v2705_v43 = vsel %vm1902_vm9, %v9893_v44, -inf }
 0x712   : > { %v2662_v18 = vmul.f32 0.35355338, %v2629_v39  ;;  %v7315_v56 = vpop.f32.mrb[47].mxu0  ;;  %2706 = vmax.xlane.f32.xlu0 %v2705_v43 }
 0x713   : > { %v9901_v0 = vsel %vm1572_vm8, %v2658_v49, -1e+30 }
 0x714   : > { %v9905_v36 = vsel %vm1572_vm8, %v2662_v18, -1e+30  ;;  %v2493_v25 = vpop.f32.mrb[40].mxu1  ;;  %v2696_v1 = vsel %vm1902_vm9, %v9901_v0, -inf }
 0x715   : > { %v2659_v40 = vmul.f32 0.35355338, %v2493_v25  ;;  %v2634_v41 = vpop.f32.mrb[48].mxu0  ;;  %2697 = vmax.xlane.f32.xlu1 %v2696_v1  ;;  %v7292_v16 = vpop.f32.mrb[41].mxu1  ;;  %v2708_v31 = vsel %vm1902_vm9, %v9905_v36, -inf }
 0x716   : > { %v2663_v54 = vmul.f32 0.35355338, %v2634_v41  ;;  %v7318_v22 = vpop.f32.mrb[49].mxu0  ;;  %2709 = vmax.xlane.f32.xlu0 %v2708_v31 }
 0x717   : > { %v9913_v29 = vsel %vm1572_vm8, %v2659_v40, -1e+30 }
 0x718   : > { %v9917_v34 = vsel %vm1572_vm8, %v2663_v54, -1e+30  ;;  %v2699_v49 = vsel %vm1902_vm9, %v9913_v29, -inf }
 0x719   : > { %v2639_v39 = vpop.f32.mrb[50].mxu0  ;;  %2700 = vmax.xlane.f32.xlu1 %v2699_v49  ;;  %v2711_v51 = vsel %vm1902_vm9, %v9917_v34, -inf }
 0x71a   : > { %v2664_v43 = vmul.f32 0.35355338, %v2639_v39  ;;  %v7321_v18 = vpop.f32.mrb[51].mxu0  ;;  %2712 = vmax.xlane.f32.xlu0 %v2711_v51 }
 0x71c   : > { %v9925_v56 = vsel %vm1572_vm8, %v2664_v43, -1e+30  ;;  %v9943_v43 = vpop.permute.xlu0 %8205 }
 0x71d   : > { %v2644_v25 = vpop.f32.mrb[52].mxu0  ;;  %v2714_v1 = vsel %vm1902_vm9, %v9925_v56, -inf }
 0x71e   : > { %v2665_v40 = vmul.f32 0.35355338, %v2644_v25  ;;  %v7324_v41 = vpop.f32.mrb[53].mxu0  ;;  %2715 = vmax.xlane.f32.xlu1 %v2714_v1  ;;  %v9949_v1 = vpop.permute.xlu1 %8215 }
 0x720   : > { %v9931_v16 = vsel %vm1572_vm8, %v2665_v40, -1e+30  ;;  %v9945_v18 = vpop.permute.xlu0 %8210 }
 0x721   : > { %v2649_v31 = vpop.f32.mrb[54].mxu0  ;;  %v2717_v54 = vsel %vm1902_vm9, %v9931_v16, -inf }
 0x722   : > { %v2666_v22 = vmul.f32 0.35355338, %v2649_v31  ;;  %v7327_v49 = vpop.f32.mrb[55].mxu0  ;;  %2718 = vmax.xlane.f32.xlu0 %v2717_v54 }
 0x724   : > { %v9937_v39 = vsel %vm1572_vm8, %v2666_v22, -1e+30  ;;  %v9947_v25 = vpop.permute.xlu0 %8220 }
 0x725   : > { %v2720_v51 = vsel %vm1902_vm9, %v9937_v39, -inf }
 0x726   : > { %2721 = vmax.xlane.f32.xlu1 %v2720_v51 }
 0x728   : > { %v9951_v40 = vpop.permute.xlu0 %3145 }
 0x738   : > { %3119 = vrot.lane.b32.xlu0 %v9269_v52, %s8734_s28 }
 0x78e   : > { %v2683_v41 = vpop.xlane.xlu1 %2682 }
 0x78f   : > { %v2723_v31 = vsub.f32 %v9857_v28, %v2683_v41 }
 0x791   : > { %v2737_v54 = vmul.f32 1.442695, %v2723_v31 }
 0x792   : > { %v2686_v22 = vpop.xlane.xlu0 %2685 }
 0x793   : > { %8403 = vpow2.f32 %v2737_v54  ;;  %v2724_v49 = vsub.f32 %v9863_v2, %v2686_v22 }
 0x795   : > { %v2739_v51 = vmul.f32 1.442695, %v2724_v49 }
 0x796   : > { %v2689_v57 = vpop.xlane.xlu0 %2688 }
 0x797   : > { %8405 = vpow2.f32 %v2739_v51  ;;  %v2725_v14 = vsub.f32 %v9871_v26, %v2689_v57 }
 0x799   : > { %v2741_v20 = vmul.f32 1.442695, %v2725_v14 }
 0x79a   : > { %v2692_v11 = vpop.xlane.xlu1 %2691 }
 0x79b   : > { %8407 = vpow2.f32 %v2741_v20  ;;  %v2726_v48 = vsub.f32 %v9877_v37, %v2692_v11  ;;  %v2704_v30 = vpop.xlane.xlu0 %2703 }
 0x79c   : > { %v2730_v35 = vsub.f32 %v9881_v24, %v2704_v30 }
 0x79d   : > { %v9958_v19 = vpop.eup %8403  ;;  %v2743_v28 = vmul.f32 1.442695, %v2726_v48 }
 0x79e   : > { %v2751_v41 = vmul.f32 1.442695, %v2730_v35  ;;  %v2695_v31 = vpop.xlane.xlu1 %2694  ;;  %v2765_v2 = vsel %vm1902_vm9, %v9958_v19, 0.0 }
 0x79f   : > { %8409 = vpow2.f32 %v2743_v28  ;;  %v2727_v54 = vsub.f32 %v9889_v27, %v2695_v31  ;;  %2766 = vadd.xlane.f32.xlu0 %v2765_v2  ;;  %v2707_v57 = vpop.xlane.xlu0 %2706 }
 0x7a0   : > { %8411 = vpow2.f32 %v2751_v41  ;;  %v2731_v14 = vsub.f32 %v9893_v44, %v2707_v57 }
 0x7a1   : > { %v9964_v11 = vpop.eup %8405  ;;  %v2745_v20 = vmul.f32 1.442695, %v2727_v54 }
 0x7a2   : > { %v2753_v30 = vmul.f32 1.442695, %v2731_v14  ;;  %v2698_v26 = vpop.xlane.xlu1 %2697  ;;  %v2768_v35 = vsel %vm1902_vm9, %v9964_v11, 0.0 }
 0x7a3   : > { %8413 = vpow2.f32 %v2745_v20  ;;  %v2728_v48 = vsub.f32 %v9901_v0, %v2698_v26  ;;  %v2710_v37 = vpop.xlane.xlu0 %2709  ;;  %2769 = vadd.xlane.f32.xlu1 %v2768_v35 }
 0x7a4   : > { %v2732_v24 = vsub.f32 %v9905_v36, %v2710_v37  ;;  %8415 = vpow2.f32 %v2753_v30 }
 0x7a5   : > { %v9970_v27 = vpop.eup %8407  ;;  %v2747_v22 = vmul.f32 1.442695, %v2728_v48 }
 0x7a6   : > { %v2755_v44 = vmul.f32 1.442695, %v2732_v24  ;;  %v2701_v49 = vpop.xlane.xlu1 %2700  ;;  %v2771_v51 = vsel %vm1902_vm9, %v9970_v27, 0.0 }
 0x7a7   : > { %v2729_v28 = vsub.f32 %v9913_v29, %v2701_v49  ;;  %v2713_v41 = vpop.xlane.xlu0 %2712  ;;  %2772 = vadd.xlane.f32.xlu1 %v2771_v51 }
 0x7a8   : > { %8417 = vpow2.f32 %v2755_v44  ;;  %v2733_v0 = vsub.f32 %v9917_v34, %v2713_v41 }
 0x7a9   : > { %v9976_v31 = vpop.eup %8409  ;;  %8419 = vpow2.f32 %v2747_v22  ;;  %v2749_v36 = vmul.f32 1.442695, %v2729_v28 }
 0x7aa   : > { %v9978_v2 = vpop.eup %8411  ;;  %v2757_v54 = vmul.f32 1.442695, %v2733_v0  ;;  %v2774_v57 = vsel %vm1902_vm9, %v9976_v31, 0.0 }
 0x7ab   : > { %2775 = vadd.xlane.f32.xlu0 %v2774_v57  ;;  %v2786_v14 = vsel %vm1902_vm9, %v9978_v2, 0.0  ;;  %v2716_v41 = vpop.xlane.xlu1 %2715 }
 0x7ac   : > { %8421 = vpow2.f32 %v2757_v54  ;;  %2787 = vadd.xlane.f32.xlu1 %v2786_v14  ;;  %v2734_v0 = vsub.f32 %v9925_v56, %v2716_v41  ;;  %v8198_v41 = vunpack.i.h.bf16 %v9804_v21 }
 0x7ad   : > { %v9984_v29 = vpop.eup %8413  ;;  %8423 = vpow2.f32 %v2749_v36 }
 0x7ae   : > { %v2777_v34 = vsel %vm1902_vm9, %v9984_v29, 0.0  ;;  %v9988_v20 = vpop.eup %8415  ;;  %v2759_v54 = vmul.f32 1.442695, %v2734_v0  ;;  %v8197_v0 = vunpack.i.l.bf16 %v9804_v21  ;;  %v11663_v21 = vmov 0.0  }
 0x7af   : > { %v2789_v35 = vsel %vm1902_vm9, %v9988_v20, 0.0  ;;  %v2719_v51 = vpop.xlane.xlu0 %2718 }
 0x7b0   : > { %2778 = vadd.xlane.f32.xlu1 %v2777_v34  ;;  %v2735_v28 = vsub.f32 %v9931_v16, %v2719_v51 }
 0x7b2   : > { %v9990_v30 = vpop.eup %8417  ;;  %v2761_v36 = vmul.f32 1.442695, %v2735_v28 }
 0x7b3   : > { %v2792_v26 = vsel %vm1902_vm9, %v9990_v30, 0.0  ;;  %v9996_v48 = vpop.eup %8419  ;;  %v2722_v56 = vpop.xlane.xlu1 %2721 }
 0x7b4   : > { %2793 = vadd.xlane.f32.xlu0 %v2792_v26  ;;  %2790 = vadd.xlane.f32.xlu1 %v2789_v35  ;;  %v2780_v22 = vsel %vm1902_vm9, %v9996_v48, 0.0  ;;  %8425 = vpow2.f32 %v2761_v36  ;;  %v2736_v16 = vsub.f32 %v9937_v39, %v2722_v56  ;;  %v10049_v39 = vpop.permute.xlu0 %3119 }
 0x7b5   : > { %8427 = vpow2.f32 %v2759_v54 }
 0x7b6   : > { %v9998_v37 = vpop.eup %8421  ;;  %v2763_v35 = vmul.f32 1.442695, %v2736_v16 }
 0x7b7   : > { %v2795_v24 = vsel %vm1902_vm9, %v9998_v37, 0.0  ;;  %v10004_v44 = vpop.eup %8423 }
 0x7b8   : > { %2796 = vadd.xlane.f32.xlu0 %v2795_v24  ;;  %2781 = vadd.xlane.f32.xlu1 %v2780_v22  ;;  %v2783_v49 = vsel %vm1902_vm9, %v10004_v44, 0.0  ;;  %8429 = vpow2.f32 %v2763_v35  ;;  %v8208_v35 = vunpack.i.h.bf16 %v9943_v43 }
 0x7bc   : > { %2784 = vadd.xlane.f32.xlu1 %v2783_v49 }
 0x7be   : > { %v10014_v57 = vpop.eup %8425 }
 0x7bf   : > { %v2801_v14 = vsel %vm1902_vm9, %v10014_v57, 0.0  ;;  %v10018_v34 = vpop.eup %8427 }
 0x7c0   : > { %v2798_v26 = vsel %vm1902_vm9, %v10018_v34, 0.0 }
 0x7c2   : > { %v10045_v24 = vpop.eup %8429 }
 0x7c3   : > { %v2804_v22 = vsel %vm1902_vm9, %v10045_v24, 0.0 }
 0x7cd   : > { %3121 = vrot.lane.b32.xlu1 %v9267_v58, %s8734_s28 }
 0x7ce   : > { %8225 = vrot.lane.b32.xlu0 %v9322_v13, %s8733_s23 }
 0x7ed   : > { %2802 = vadd.xlane.f32.xlu0 %v2801_v14 }
 0x7f1   : > { %2799 = vadd.xlane.f32.xlu1 %v2798_v26  ;;  %v7893_v26 = vpack.c.bf16 %v8198_v41, %v8197_v0 }
 0x802   : > { %3301 = vrot.lane.b32.xlu1 %v9316_v9, %s8733_s23  ;;  %s11695_s23 = scalar_lea.vmem %s11602_s9, %s8874_s25 }
 0x803   : > { %3123 = vrot.lane.b32.xlu0 %v9278_v38, %s8734_s28 }
 0x806   : > { %3275 = vrot.lane.b32.xlu1 %v9293_v3, %s8734_s28 }
 0x807   : > { %3125 = vrot.lane.b32.xlu0 %v9276_v32, %s8734_s28 }
 0x80b   : > { %3127 = vrot.lane.b32.xlu0 %v9287_v60, %s8734_s28 }
 0x80f   : > { %3129 = vrot.lane.b32.xlu0 %v9285_v59, %s8734_s28 }
 0x813   : > { %3131 = vrot.lane.b32.xlu0 %v9295_v4, %s8734_s28 }
 0x817   : > { %3283 = vrot.lane.b32.xlu0 %v9306_v55, %s8734_s28 }
 0x81b   : > { %3287 = vrot.lane.b32.xlu0 %v9316_v9, %s8734_s28 }
 0x81f   : > { %8230 = vrot.lane.b32.xlu0 %v9273_v46, %s8735_s4 }
 0x823   : > { %8240 = vrot.lane.b32.xlu0 %v9291_v61, %s8735_s4 }
 0x827   : > { %8250 = vrot.lane.b32.xlu0 %v9312_v8, %s8735_s4 }
 0x82a   : > { %2805 = vadd.xlane.f32.xlu1 %v2804_v22  ;;  %v8207_v22 = vunpack.i.l.bf16 %v9943_v43  ;;  %v8213_v43 = vunpack.i.h.bf16 %v9945_v18 }
 0x82b   : > { %3767 = vrot.lane.b32.xlu0 %v9316_v9, %s8735_s4 }
 0x82c   : > { %v2767_v49 = vpop.xlane.xlu0 %2766 }
 0x82d   : > { %8431 = vrcp.f32 %v2767_v49 }
 0x82f   : > { %8265 = vrot.lane.b32.xlu0 %v9282_v47, %s8736_s27 }
 0x830   : > { %v2770_v51 = vpop.xlane.xlu1 %2769 }
 0x831   : > { %8433 = vrcp.f32 %v2770_v51  ;;  %v11664_v51 = vmov 0.0|0.0  }
 0x833   : > { %8270 = vrot.lane.b32.xlu0 %v9303_v6, %s8736_s27 }
 0x834   : > { %v2773_v28 = vpop.xlane.xlu1 %2772 }
 0x835   : > { %8435 = vrcp.f32 %v2773_v28 }
 0x837   : > { %v8432_v36 = vpop.eup %8431  ;;  %8280 = vrot.lane.b32.xlu0 %v9312_v8, %s8736_s27 }
 0x838   : > { %v2808_v54 = vmul.f32 %v8432_v36, %v9958_v19  ;;  %v2776_v14 = vpop.xlane.xlu0 %2775 }
 0x839   : > { %8437 = vrcp.f32 %v2776_v14  ;;  %v2788_v56 = vpop.xlane.xlu1 %2787 }
 0x83a   : > { %8439 = vrcp.f32 %v2788_v56  ;;  %7343 = vmatmul.mubr.msk.f32.vlgmr.msra.gmra.mrb[42].mxu1 %vm1902_vm9, %v2808_v54  ;;  %v8212_v54 = vunpack.i.l.bf16 %v9945_v18  ;;  %v8218_v18 = vunpack.i.h.bf16 %v9949_v1  ;;  %v8217_v56 = vunpack.i.l.bf16 %v9949_v1 }
 0x83b   : > { %v8434_v16 = vpop.eup %8433  ;;  %7895 = vmatpush3.bf16.xpose.msk.msra.mxu1 %vm9345_vm7, %v7893_v26  ;;  %3923 = vrot.lane.b32.xlu0 %v9295_v4, %s8736_s27 }
 0x83c   : > { %3277 = vrot.lane.b32.xlu1 %v9299_v5, %s8734_s28  ;;  %7345 = vmatprep.mubr.msk.f32.mxu1 %vm8727_vm5, %v11663_v21  ;;  %v2810_v19 = vmul.f32 %v8434_v16, %v9964_v11  ;;  %v7897_v11 = vpack.c.bf16 %v8208_v35, %v8207_v22  ;;  %v7905_v35 = vpack.c.bf16 %v8213_v43, %v8212_v54 }
 0x83d   : > { %v2779_v49 = vpop.xlane.xlu1 %2778  ;;  %7896 = vmatprep.subr.bf16.mxu1 %v11664_v51  ;;  %v7901_v1 = vpack.c.bf16 %v8218_v18, %v8217_v56 }
 0x83e   : > { %8441 = vrcp.f32 %v2779_v49  ;;  %7346 = vmatmul.mubr.msk.f32.gmra.mrb[44].mxu1 %vm1902_vm9, %v2810_v19 }
 0x83f   : > { %v8436_v28 = vpop.eup %8435  ;;  %7348 = vmatprep.mubr.msk.f32.mxu1 %vm8727_vm5, %v11663_v21 }
 0x840   : > { %3279 = vrot.lane.b32.xlu1 %v9297_v62, %s8734_s28  ;;  %v2812_v41 = vmul.f32 %v8436_v28, %v9970_v27  ;;  %v8223_v28 = vunpack.i.h.bf16 %v9947_v25 }
 0x841   : > { %v2794_v0 = vpop.xlane.xlu0 %2793  ;;  %v2791_v36 = vpop.xlane.xlu1 %2790 }
 0x842   : > { %7349 = vmatmul.mubr.msk.f32.gmra.mrb[46].mxu1 %vm1902_vm9, %v2812_v41  ;;  %8443 = vrcp.f32 %v2791_v36  ;;  %v8222_v41 = vunpack.i.l.bf16 %v9947_v25 }
 0x843   : > { %v8438_v14 = vpop.eup %8437  ;;  %7899 = vmatpush3.bf16.xpose.msk.msra.mxu1 %vm9345_vm7, %v7897_v11  ;;  %7351 = vmatprep.mubr.msk.f32.mxu1 %vm8727_vm5, %v11663_v21  ;;  %8445 = vrcp.f32 %v2794_v0 }
 0x844   : > { %v8440_v26 = vpop.eup %8439  ;;  %3281 = vrot.lane.b32.xlu1 %v9308_v7, %s8734_s28  ;;  %v2814_v27 = vmul.f32 %v8438_v14, %v9976_v31  ;;  %7900 = vmatprep.subr.bf16.mxu1 %v11664_v51  ;;  %v7909_v0 = vpack.c.bf16 %v8223_v28, %v8222_v41 }
 0x845   : > { %v2822_v16 = vmul.f32 %v8440_v26, %v9978_v2  ;;  %v2782_v19 = vpop.xlane.xlu1 %2781  ;;  %v2797_v22 = vpop.xlane.xlu0 %2796 }
 0x846   : > { %7352 = vmatmul.mubr.msk.f32.gmra.mrb[48].mxu1 %vm1902_vm9, %v2814_v27  ;;  %8447 = vrcp.f32 %v2782_v19 }
 0x847   : > { %7378 = vmatmul.mubr.msk.f32.vlgmr.msra.gmra.mrb[56].mxu0 %vm1902_vm9, %v2822_v16  ;;  %7354 = vmatprep.mubr.msk.f32.mxu1 %vm8727_vm5, %v11663_v21  ;;  %8449 = vrcp.f32 %v2797_v22 }
 0x848   : > { %v8442_v31 = vpop.eup %8441  ;;  %3285 = vrot.lane.b32.xlu1 %v9318_v10, %s8734_s28  ;;  %7907 = vmatpush3.bf16.xpose.msk.msra.mxu0 %vm9345_vm7, %v7905_v35  ;;  %s11697_s28 = sld [smem:[#allocation38_spill]] (!%p6709_p6) }
 0x849   : > { %v2785_v2 = vpop.xlane.xlu1 %2784  ;;  %v2816_v49 = vmul.f32 %v8442_v31, %v9984_v29  ;;  %7380 = vmatprep.mubr.msk.f32.mxu0 %vm8727_vm5, %v11663_v21  ;;  %7908 = vmatprep.subr.bf16.mxu0 %v11664_v51  ;;  %v8226_v43 = vpop.permute.xlu0 %8225 }
 0x84a   : > { %8451 = vrcp.f32 %v2785_v2  ;;  %v8228_v27 = vunpack.i.h.bf16 %v8226_v43  ;;  %v8227_v18 = vunpack.i.l.bf16 %v8226_v43 }
 0x84b   : > { %7903 = vmatpush3.bf16.xpose.msk.msra.mxu1 %vm9345_vm7, %v7901_v1 }
 0x84c   : > { %8235 = vrot.lane.b32.xlu1 %v9282_v47, %s8735_s4  ;;  %7355 = vmatmul.mubr.msk.f32.gmra.mrb[50].mxu1 %vm1902_vm9, %v2816_v49  ;;  %v8444_v11 = vpop.eup %8443 }
 0x84d   : > { %7410 = vmatprep.subr.mxu1 %v11663_v21  ;;  %7357 = vmatprep.mubr.msk.f32.mxu1 %vm8727_vm5, %v11663_v21  ;;  %v2824_v29 = vmul.f32 %v8444_v11, %v9988_v20  ;;  %v8446_v36 = vpop.eup %8445 }
 0x84e   : > { %v2826_v14 = vmul.f32 %v8446_v36, %v9990_v30  ;;  %v7913_v30 = vpack.c.bf16 %v8228_v27, %v8227_v18 }
 0x84f   : > { %7381 = vmatmul.mubr.msk.f32.gmra.mrb[58].mxu0 %vm1902_vm9, %v2824_v29 }
 0x850   : > { %8245 = vrot.lane.b32.xlu1 %v9303_v6, %s8735_s4  ;;  %v8448_v25 = vpop.eup %8447  ;;  %7911 = vmatpush3.bf16.xpose.msk.msra.mxu0 %vm9345_vm7, %v7909_v0 }
 0x851   : > { %7383 = vmatprep.mubr.msk.f32.mxu0 %vm8727_vm5, %v11663_v21  ;;  %v2818_v54 = vmul.f32 %v8448_v25, %v9996_v48  ;;  %7912 = vmatprep.subr.bf16.mxu0 %v11664_v51  ;;  %v8450_v20 = vpop.eup %8449 }
 0x853   : > { %7411 = vmatpush3.xpose.msk.msra.mxu1 %vm1594_vm6, %v9951_v40  ;;  %7384 = vmatmul.mubr.msk.f32.gmra.mrb[60].mxu0 %vm1902_vm9, %v2826_v14  ;;  %v2828_v40 = vmul.f32 %v8450_v20, %v9998_v37  ;;  %v3122_v37 = vpop.permute.xlu1 %3121 }
 0x854   : > { %v8452_v26 = vpop.eup %8451  ;;  %3625 = vrot.lane.b32.xlu1 %v9295_v4, %s8735_s4  ;;  %7358 = vmatmul.mubr.msk.f32.gmra.mrb[52].mxu1 %vm1902_vm9, %v2818_v54 }
 0x855   : > { %7360 = vmatprep.mubr.msk.f32.mxu1 %vm8727_vm5, %v11663_v21  ;;  %v2820_v48 = vmul.f32 %v8452_v26, %v10004_v44  ;;  %7386 = vmatprep.mubr.msk.f32.mxu0 %vm8727_vm5, %v11663_v21 }
 0x856   : > { %7916 = vmatprep.subr.bf16.mxu1 %v11664_v51 }
 0x857   : > { %7387 = vmatmul.mubr.msk.f32.gmra.mrb[62].mxu0 %vm1902_vm9, %v2828_v40 }
 0x858   : > { %8255 = vrot.lane.b32.xlu1 %v9273_v46, %s8736_s27  ;;  %7361 = vmatmul.mubr.msk.f32.gmra.mrb[54].mxu1 %vm1902_vm9, %v2820_v48 }
 0x859   : > { %7412 = vmatprep.mubr.msk.f32.mxu1 %vm8727_vm5, %v11663_v21  ;;  %7915 = vmatpush3.bf16.xpose.msk.msra.mxu0 %vm9345_vm7, %v7913_v30 }
 0x85a   : > { %7389 = vmatprep.mubr.msk.f32.mxu0 %vm8727_vm5, %v11663_v21  ;;  %7445 = vmatprep.subr.mxu0 %v11663_v21 }
 0x85c   : > { %8260 = vrot.lane.b32.xlu1 %v9322_v13, %s8735_s4  ;;  %7413 = vmatmul.mubr.msk.f32.vlgmr.msra.gmra.mrb[56].mxu1 %vm1594_vm6, %v10049_v39  ;;  %s11696_s4 = scalar_lea.vmem %s11603_s10, %s8874_s25 }
 0x85d   : > { %7415 = vmatprep.mubr.msk.f32.mxu1 %vm8727_vm5, %v11663_v21 }
 0x860   : > { %8275 = vrot.lane.b32.xlu1 %v9291_v61, %s8736_s27  ;;  %7416 = vmatmul.mubr.msk.f32.gmra.mrb[58].mxu1 %vm1594_vm6, %v3122_v37 }
 0x861   : > { %7418 = vmatprep.mubr.msk.f32.mxu1 %vm8727_vm5, %v11663_v21 }
 0x87a   : > { %v2803_v44 = vpop.xlane.xlu0 %2802 }
 0x87e   : > { %v3124_v56 = vpop.permute.xlu0 %3123  ;;  %v2800_v16 = vpop.xlane.xlu1 %2799 }
 0x87f   : > { %8453 = vrcp.f32 %v2800_v16  ;;  %7419 = vmatmul.mubr.msk.f32.gmra.mrb[60].mxu1 %vm1594_vm6, %v3124_v56 }
 0x880   : > { %7421 = vmatprep.mubr.msk.f32.mxu1 %vm8727_vm5, %v11663_v21  ;;  %8455 = vrcp.f32 %v2803_v44 }
 0x882   : > { %v3126_v39 = vpop.permute.xlu0 %3125  ;;  %v3302_v19 = vpop.permute.xlu1 %3301 }
 0x883   : > { %7422 = vmatmul.mubr.msk.f32.gmra.mrb[62].mxu1 %vm1594_vm6, %v3126_v39  ;;  %7446 = vmatpush3.xpose.msk.msra.mxu0 %vm1594_vm6, %v3302_v19 }
 0x884   : > { %7424 = vmatprep.mubr.msk.f32.mxu1 %vm8727_vm5, %v11663_v21  ;;  %7925 = vmatprep.subr.bf16.mxu0 %v11664_v51 }
 0x886   : > { %v3128_v35 = vpop.permute.xlu0 %3127 }
 0x887   : > { %7425 = vmatmul.mubr.msk.f32.gmra.mrb[64].mxu1 %vm1594_vm6, %v3128_v35 }
 0x888   : > { %7427 = vmatprep.mubr.msk.f32.mxu1 %vm8727_vm5, %v11663_v21 }
 0x889   : > { %v8454_v22 = vpop.eup %8453 }
 0x88a   : > { %v3130_v31 = vpop.permute.xlu0 %3129  ;;  %v2830_v1 = vmul.f32 %v8454_v22, %v10018_v34  ;;  %v8456_v2 = vpop.eup %8455 }
 0x88b   : > { %7428 = vmatmul.mubr.msk.f32.gmra.mrb[66].mxu1 %vm1594_vm6, %v3130_v31  ;;  %v2832_v28 = vmul.f32 %v8456_v2, %v10014_v57  ;;  %v3276_v57 = vpop.permute.xlu1 %3275 }
 0x88c   : > { %7390 = vmatmul.mubr.msk.f32.gmra.mrb[64].mxu0 %vm1902_vm9, %v2830_v1  ;;  %7430 = vmatprep.mubr.msk.f32.mxu1 %vm8727_vm5, %v11663_v21 }
 0x88d   : > { %7392 = vmatprep.mubr.msk.f32.mxu0 %vm8727_vm5, %v11663_v21 }
 0x88e   : > { %v3132_v49 = vpop.permute.xlu0 %3131 }
 0x88f   : > { %7431 = vmatmul.mubr.msk.f32.gmra.mrb[68].mxu1 %vm1594_vm6, %v3132_v49 }
 0x890   : > { %7393 = vmatmul.mubr.msk.f32.gmra.mrb[66].mxu0 %vm1902_vm9, %v2832_v28  ;;  %7482 = vmatprep.mubr.msk.f32.mxu1 %vm8727_vm5, %v11663_v21 }
 0x891   : > { %7395 = vmatprep.mubr.msk.f32.mxu0 %vm8727_vm5, %v11663_v21 }
 0x892   : > { %v3284_v34 = vpop.permute.xlu0 %3283 }
 0x896   : > { %v10190_v41 = vpop.permute.xlu0 %3287 }
 0x89a   : > { %v8231_v11 = vpop.permute.xlu0 %8230 }
 0x89b   : > { %v8233_v29 = vunpack.i.h.bf16 %v8231_v11  ;;  %v8232_v0 = vunpack.i.l.bf16 %v8231_v11 }
 0x89d   : > { %v7917_v36 = vpack.c.bf16 %v8233_v29, %v8232_v0 }
 0x89e   : > { %v8241_v18 = vpop.permute.xlu0 %8240 }
 0x89f   : > { %7918 = vmatpush3.bf16.msra.mxu1 %v7917_v36  ;;  %v8243_v37 = vunpack.i.h.bf16 %v8241_v18  ;;  %v8242_v44 = vunpack.i.l.bf16 %v8241_v18 }
 0x8a0   : > { %7919 = vmatprep.subr.bf16.mxu1 %v11664_v51 }
 0x8a1   : > { %v7923_v35 = vpack.c.bf16 %v8243_v37, %v8242_v44 }
 0x8a2   : > { %v8251_v56 = vpop.permute.xlu0 %8250 }
 0x8a3   : > { %v8253_v22 = vunpack.i.h.bf16 %v8251_v56  ;;  %v8252_v31 = vunpack.i.l.bf16 %v8251_v56 }
 0x8a5   : > { %v7929_v49 = vpack.c.bf16 %v8253_v22, %v8252_v31 }
 0x8b7   : > { %v2806_v25 = vpop.xlane.xlu1 %2805 }
 0x8b8   : > { %8457 = vrcp.f32 %v2806_v25 }
 0x8bb   : > { %v3278_v43 = vpop.permute.xlu1 %3277 }
 0x8bf   : > { %v3280_v54 = vpop.permute.xlu1 %3279 }
 0x8c2   : > { %v8458_v20 = vpop.eup %8457 }
 0x8c3   : > { %v3282_v14 = vpop.permute.xlu1 %3281  ;;  %v2834_v26 = vmul.f32 %v8458_v20, %v10045_v24 }
 0x8c5   : > { %7396 = vmatmul.mubr.msk.f32.gmra.mrb[68].mxu0 %vm1902_vm9, %v2834_v26 }
 0x8c6   : > { %7447 = vmatprep.mubr.msk.f32.mxu0 %vm8727_vm5, %v11663_v21 }
 0x8c7   : > { %v3286_v27 = vpop.permute.xlu1 %3285 }
 0x8c9   : > { %7448 = vmatmul.mubr.msk.f32.vlgmr.msra.gmra.mrb[70].mxu0 %vm1594_vm6, %v3276_v57 }
 0x8ca   : > { %7450 = vmatprep.mubr.msk.f32.mxu0 %vm8727_vm5, %v11663_v21 }
 0x8cb   : > { %v8236_v48 = vpop.permute.xlu1 %8235 }
 0x8cc   : > { %v8238_v40 = vunpack.i.h.bf16 %v8236_v48  ;;  %v8237_v30 = vunpack.i.l.bf16 %v8236_v48 }
 0x8cd   : > { %7451 = vmatmul.mubr.msk.f32.gmra.mrb[72].mxu0 %vm1594_vm6, %v3278_v43 }
 0x8ce   : > { %v7920_v24 = vpack.c.bf16 %v8238_v40, %v8237_v30  ;;  %7453 = vmatprep.mubr.msk.f32.mxu0 %vm8727_vm5, %v11663_v21 }
 0x8cf   : > { %v8246_v16 = vpop.permute.xlu1 %8245 }
 0x8d0   : > { %v8248_v39 = vunpack.i.h.bf16 %v8246_v16  ;;  %v8247_v19 = vunpack.i.l.bf16 %v8246_v16  ;;  %7921 = vmatpush3.bf16.msra.mxu1 %v7920_v24 }
 0x8d1   : > { %7454 = vmatmul.mubr.msk.f32.gmra.mrb[74].mxu0 %vm1594_vm6, %v3280_v54  ;;  %7922 = vmatprep.subr.bf16.mxu1 %v11664_v51 }
 0x8d2   : > { %v7926_v1 = vpack.c.bf16 %v8248_v39, %v8247_v19  ;;  %7456 = vmatprep.mubr.msk.f32.mxu0 %vm8727_vm5, %v11663_v21 }
 0x8d3   : > { %v3626_v2 = vpop.permute.xlu1 %3625 }
 0x8d4   : > { %7924 = vmatpush3.bf16.msra.mxu1 %v7923_v35  ;;  %7927 = vmatpush3.bf16.msra.mxu0 %v7926_v1 }
 0x8d5   : > { %7457 = vmatmul.mubr.msk.f32.gmra.mrb[76].mxu0 %vm1594_vm6, %v3282_v14  ;;  %7480 = vmatprep.subr.mxu1 %v11663_v21 }
 0x8d6   : > { %7928 = vmatprep.subr.bf16.mxu0 %v11664_v51  ;;  %7459 = vmatprep.mubr.msk.f32.mxu0 %vm8727_vm5, %v11663_v21 }
 0x8d7   : > { %v10212_v28 = vpop.permute.xlu1 %8255 }
 0x8d8   : > { %7481 = vmatpush3.msra.mxu1 %v3626_v2  ;;  %7930 = vmatpush3.bf16.msra.mxu0 %v7929_v49 }
 0x8d9   : > { %7460 = vmatmul.mubr.msk.f32.gmra.mrb[78].mxu0 %vm1594_vm6, %v3284_v34  ;;  %7931 = vmatprep.subr.bf16.mxu0 %v11664_v51  ;;  %v3768_v34 = vpop.permute.xlu0 %3767 }
 0x8da   : > { %7462 = vmatprep.mubr.msk.f32.mxu0 %vm8727_vm5, %v11663_v21  ;;  %7934 = vmatprep.subr.bf16.mxu1 %v11664_v51 }
 0x8db   : > { %v8261_v11 = vpop.permute.xlu1 %8260 }
 0x8dc   : > { %v8263_v29 = vunpack.i.h.bf16 %v8261_v11  ;;  %v8262_v0 = vunpack.i.l.bf16 %v8261_v11 }
 0x8dd   : > { %7463 = vmatmul.mubr.msk.f32.gmra.mrb[80].mxu0 %vm1594_vm6, %v3286_v27 }
 0x8de   : > { %v7932_v36 = vpack.c.bf16 %v8263_v29, %v8262_v0  ;;  %7465 = vmatprep.mubr.msk.f32.mxu0 %vm8727_vm5, %v11663_v21 }
 0x8e0   : > { %7933 = vmatpush3.bf16.msra.mxu0 %v7932_v36 }
 0x8e1   : > { %7466 = vmatmul.mubr.msk.f32.gmra.mrb[82].mxu0 %vm1594_vm6, %v10190_v41  ;;  %7515 = vmatprep.subr.mxu0 %v11663_v21 }
 0x8e2   : > { %7517 = vmatprep.mubr.msk.f32.mxu0 %vm8727_vm5, %v11663_v21 }
 0x8e4   : > { %7516 = vmatpush3.msra.mxu0 %v3768_v34 }
 0x8e5   : > { %7946 = vmatprep.subr.bf16.mxu0 %v11664_v51 }
 0x90d   : > { %v10228_v57 = vpop.f32.mrb[42].mxu1 }
 0x90e   : > { %v7344_v25 = vpop.f32.mrb[43].mxu1 }
 0x911   : > { %v10230_v43 = vpop.f32.mrb[44].mxu1 }
 0x912   : > { %v7347_v54 = vpop.f32.mrb[45].mxu1 }
 0x915   : > { %v10232_v20 = vpop.f32.mrb[46].mxu1 }
 0x916   : > { %v7350_v14 = vpop.f32.mrb[47].mxu1 }
 0x919   : > { %v10234_v26 = vpop.f32.mrb[48].mxu1 }
 0x91a   : > { %v7353_v41 = vpop.f32.mrb[49].mxu1  ;;  %v10236_v27 = vpop.f32.mrb[56].mxu0 }
 0x91b   : > { %v7379_v18 = vpop.f32.mrb[57].mxu0 }
 0x91f   : > { %v10238_v48 = vpop.f32.mrb[50].mxu1 }
 0x920   : > { %11665 = vst [vmem:[#allocation23_spill] sm:$0xff] %v10238_v48  ;;  %v7356_v40 = vpop.f32.mrb[51].mxu1 }
 0x922   : > { %v10240_v30 = vpop.f32.mrb[58].mxu0 }
 0x923   : > { %11666 = vst [vmem:[#allocation24_spill] sm:$0xff] %v10240_v30  ;;  %v7382_v37 = vpop.f32.mrb[59].mxu0 }
 0x926   : > { %v10244_v24 = vpop.f32.mrb[60].mxu0 }
 0x927   : > { %v10242_v44 = vpop.f32.mrb[52].mxu1  ;;  %11667 = vst [vmem:[#allocation25_spill] sm:$0xff] %v10244_v24  ;;  %v7385_v16 = vpop.f32.mrb[61].mxu0 }
 0x928   : > { %v7359_v56 = vpop.f32.mrb[53].mxu1 }
 0x92a   : > { %v10248_v19 = vpop.f32.mrb[62].mxu0 }
 0x92b   : > { %v10246_v39 = vpop.f32.mrb[54].mxu1  ;;  %11669 = vst [vmem:[#allocation27_spill] sm:$0xff] %v10248_v19  ;;  %v7388_v22 = vpop.f32.mrb[63].mxu0 }
 0x92c   : > { %11668 = vst [vmem:[#allocation26_spill] sm:$0xff] %v10246_v39  ;;  %v7362_v35 = vpop.f32.mrb[55].mxu1 }
 0x92f   : > { %v3241_v31 = vpop.f32.mrb[56].mxu1 }
 0x930   : > { %v3431_v1 = vmul.f32 0.35355338, %v3241_v31  ;;  %v7414_v2 = vpop.f32.mrb[57].mxu1 }
 0x932   : > { %v10252_v49 = vsel %vm1572_vm8, %v3431_v1, -1e+30 }
 0x933   : > { %v3246_v11 = vpop.f32.mrb[58].mxu1  ;;  %v3459_v29 = vsel %vm1902_vm9, %v10252_v49, -inf }
 0x934   : > { %v3432_v0 = vmul.f32 0.35355338, %v3246_v11  ;;  %3460 = vmax.xlane.f32.xlu1 %v3459_v29  ;;  %v7417_v36 = vpop.f32.mrb[59].mxu1 }
 0x936   : > { %v10258_v34 = vsel %vm1572_vm8, %v3432_v0, -1e+30 }
 0x937   : > { %v3462_v25 = vsel %vm1902_vm9, %v10258_v34, -inf }
 0x938   : > { %3463 = vmax.xlane.f32.xlu0 %v3462_v25 }
 0x952   : > { %v3251_v54 = vpop.f32.mrb[60].mxu1 }
 0x953   : > { %v3433_v14 = vmul.f32 0.35355338, %v3251_v54  ;;  %v7420_v41 = vpop.f32.mrb[61].mxu1 }
 0x955   : > { %v10264_v18 = vsel %vm1572_vm8, %v3433_v14, -1e+30 }
 0x956   : > { %v3256_v40 = vpop.f32.mrb[62].mxu1  ;;  %v3465_v37 = vsel %vm1902_vm9, %v10264_v18, -inf }
 0x957   : > { %v3434_v56 = vmul.f32 0.35355338, %v3256_v40  ;;  %3466 = vmax.xlane.f32.xlu0 %v3465_v37  ;;  %v7423_v16 = vpop.f32.mrb[63].mxu1 }
 0x959   : > { %v10270_v35 = vsel %vm1572_vm8, %v3434_v56, -1e+30 }
 0x95a   : > { %v3261_v22 = vpop.f32.mrb[64].mxu1  ;;  %v3468_v31 = vsel %vm1902_vm9, %v10270_v35, -inf }
 0x95b   : > { %v3435_v1 = vmul.f32 0.35355338, %v3261_v22  ;;  %3469 = vmax.xlane.f32.xlu1 %v3468_v31  ;;  %v7426_v2 = vpop.f32.mrb[65].mxu1 }
 0x95d   : > { %v10276_v11 = vsel %vm1572_vm8, %v3435_v1, -1e+30 }
 0x95e   : > { %v3266_v29 = vpop.f32.mrb[66].mxu1  ;;  %v3471_v0 = vsel %vm1902_vm9, %v10276_v11, -inf }
 0x95f   : > { %v3436_v36 = vmul.f32 0.35355338, %v3266_v29  ;;  %v10280_v25 = vpop.f32.mrb[64].mxu0  ;;  %3472 = vmax.xlane.f32.xlu1 %v3471_v0  ;;  %v7429_v54 = vpop.f32.mrb[67].mxu1 }
 0x960   : > { %11670 = vst [vmem:[#allocation28_spill] sm:$0xff] %v10280_v25  ;;  %v7391_v14 = vpop.f32.mrb[65].mxu0 }
 0x961   : > { %v10284_v41 = vsel %vm1572_vm8, %v3436_v36, -1e+30 }
 0x962   : > { %v3271_v40 = vpop.f32.mrb[68].mxu1  ;;  %v3474_v37 = vsel %vm1902_vm9, %v10284_v41, -inf }
 0x963   : > { %v3437_v56 = vmul.f32 0.35355338, %v3271_v40  ;;  %v10288_v16 = vpop.f32.mrb[66].mxu0  ;;  %3475 = vmax.xlane.f32.xlu1 %v3474_v37  ;;  %v7432_v22 = vpop.f32.mrb[69].mxu1 }
 0x964   : > { %11671 = vst [vmem:[#allocation29_spill] sm:$0xff] %v10288_v16  ;;  %v7394_v31 = vpop.f32.mrb[67].mxu0 }
 0x965   : > { %v10292_v1 = vsel %vm1572_vm8, %v3437_v56, -1e+30 }
 0x966   : > { %v3477_v2 = vsel %vm1902_vm9, %v10292_v1, -inf }
 0x967   : > { %3478 = vmax.xlane.f32.xlu1 %v3477_v2 }
 0x998   : > { %v10296_v29 = vpop.f32.mrb[68].mxu0 }
 0x999   : > { %11672 = vst [vmem:[#allocation30_spill] sm:$0xff] %v10296_v29  ;;  %v7397_v0 = vpop.f32.mrb[69].mxu0 }
 0x99c   : > { %v3397_v36 = vpop.f32.mrb[70].mxu0 }
 0x99d   : > { %v3438_v54 = vmul.f32 0.35355338, %v3397_v36  ;;  %v7449_v14 = vpop.f32.mrb[71].mxu0 }
 0x99f   : > { %v10300_v40 = vsel %vm1572_vm8, %v3438_v54, -1e+30 }
 0x9a0   : > { %v3402_v37 = vpop.f32.mrb[72].mxu0  ;;  %v3480_v22 = vsel %vm1902_vm9, %v10300_v40, -inf }
 0x9a1   : > { %v3439_v56 = vmul.f32 0.35355338, %v3402_v37  ;;  %v7452_v31 = vpop.f32.mrb[73].mxu0  ;;  %3481 = vmax.xlane.f32.xlu0 %v3480_v22 }
 0x9a3   : > { %v10306_v2 = vsel %vm1572_vm8, %v3439_v56, -1e+30 }
 0x9a4   : > { %v3407_v63 = vpop.f32.mrb[74].mxu0  ;;  %v3483_v0 = vsel %vm1902_vm9, %v10306_v2, -inf }
 0x9a5   : > { %v3440_v36 = vmul.f32 0.35355338, %v3407_v63  ;;  %v7455_v14 = vpop.f32.mrb[75].mxu0  ;;  %3484 = vmax.xlane.f32.xlu0 %v3483_v0 }
 0x9a7   : > { %v10312_v54 = vsel %vm1572_vm8, %v3440_v36, -1e+30  ;;  %v10322_v36 = vpop.permute.xlu0 %8265 }
 0x9a8   : > { %v3412_v12 = vpop.f32.mrb[76].mxu0  ;;  %v3486_v37 = vsel %vm1902_vm9, %v10312_v54, -inf }
 0x9a9   : > { %v3441_v22 = vmul.f32 0.35355338, %v3412_v12  ;;  %v7458_v31 = vpop.f32.mrb[77].mxu0  ;;  %3487 = vmax.xlane.f32.xlu0 %v3486_v37 }
 0x9ab   : > { %v10318_v56 = vsel %vm1572_vm8, %v3441_v22, -1e+30 }
 0x9ac   : > { %v3417_v45 = vpop.f32.mrb[78].mxu0  ;;  %v3489_v63 = vsel %vm1902_vm9, %v10318_v56, -inf }
 0x9ad   : > { %v3442_v0 = vmul.f32 0.35355338, %v3417_v45  ;;  %v7461_v14 = vpop.f32.mrb[79].mxu0  ;;  %3490 = vmax.xlane.f32.xlu0 %v3489_v63 }
 0x9ae   : > { %v10336_v14 = vpop.permute.xlu0 %8270 }
 0x9af   : > { %v10326_v42 = vsel %vm1572_vm8, %v3442_v0, -1e+30 }
 0x9b0   : > { %v3422_v12 = vpop.f32.mrb[80].mxu0  ;;  %v3492_v37 = vsel %vm1902_vm9, %v10326_v42, -inf }
 0x9b1   : > { %v3443_v31 = vmul.f32 0.35355338, %v3422_v12  ;;  %v7464_v22 = vpop.f32.mrb[81].mxu0  ;;  %3493 = vmax.xlane.f32.xlu1 %v3492_v37 }
 0x9b2   : > { %v10344_v37 = vpop.permute.xlu0 %8280 }
 0x9b3   : > { %v10332_v15 = vsel %vm1572_vm8, %v3443_v31, -1e+30 }
 0x9b4   : > { %v3427_v45 = vpop.f32.mrb[82].mxu0  ;;  %v3495_v63 = vsel %vm1902_vm9, %v10332_v15, -inf }
 0x9b5   : > { %v3444_v50 = vmul.f32 0.35355338, %v3427_v45  ;;  %v7467_v0 = vpop.f32.mrb[83].mxu0  ;;  %3496 = vmax.xlane.f32.xlu0 %v3495_v63  ;;  %v10351_v45 = vpop.permute.xlu1 %8275 }
 0x9b6   : > { %v10346_v31 = vpop.permute.xlu0 %3923 }
 0x9b7   : > { %v10340_v53 = vsel %vm1572_vm8, %v3444_v50, -1e+30 }
 0x9b8   : > { %v3498_v12 = vsel %vm1902_vm9, %v10340_v53, -inf }
 0x9b9   : > { %3499 = vmax.xlane.f32.xlu1 %v3498_v12 }
 0x9c1   : > { %v3461_v50 = vpop.xlane.xlu1 %3460 }
 0x9c2   : > { %v3501_v0 = vsub.f32 %v10252_v49, %v3461_v50 }
 0x9c4   : > { %v3515_v19 = vmul.f32 1.442695, %v3501_v0 }
 0x9c5   : > { %v3464_v22 = vpop.xlane.xlu0 %3463 }
 0x9c6   : > { %v3502_v33 = vsub.f32 %v10258_v34, %v3464_v22 }
 0x9c8   : > { %v3517_v16 = vmul.f32 1.442695, %v3502_v33 }
 0x9ca   : > { %8459 = vpow2.f32 %v3517_v16 }
 0x9cb   : > { %3897 = vrot.lane.b32.xlu0 %v9269_v52, %s8737_s0  ;;  %8461 = vpow2.f32 %v3515_v19 }
 0x9d4   : > { %v10353_v63 = vpop.eup %8459 }
 0x9d5   : > { %v3546_v12 = vsel %vm1902_vm9, %v10353_v63, 0.0  ;;  %v10359_v16 = vpop.eup %8461 }
 0x9d6   : > { %3547 = vadd.xlane.f32.xlu1 %v3546_v12  ;;  %v3543_v30 = vsel %vm1902_vm9, %v10359_v16, 0.0 }
 0x9e4   : > { %v3467_v34 = vpop.xlane.xlu0 %3466 }
 0x9e5   : > { %v3503_v33 = vsub.f32 %v10264_v18, %v3467_v34 }
 0x9e7   : > { %v3519_v22 = vmul.f32 1.442695, %v3503_v33 }
 0x9e8   : > { %v3470_v52 = vpop.xlane.xlu1 %3469 }
 0x9e9   : > { %8463 = vpow2.f32 %v3519_v22  ;;  %v3504_v29 = vsub.f32 %v10270_v35, %v3470_v52 }
 0x9ea   : > { %3544 = vadd.xlane.f32.xlu0 %v3543_v30 }
 0x9eb   : > { %v3521_v49 = vmul.f32 1.442695, %v3504_v29 }
 0x9ec   : > { %v3473_v12 = vpop.xlane.xlu1 %3472 }
 0x9ed   : > { %8465 = vpow2.f32 %v3521_v49  ;;  %v3505_v35 = vsub.f32 %v10276_v11, %v3473_v12 }
 0x9ef   : > { %v3523_v33 = vmul.f32 1.442695, %v3505_v35 }
 0x9f0   : > { %v3476_v29 = vpop.xlane.xlu1 %3475 }
 0x9f3   : > { %v10364_v50 = vpop.eup %8463 }
 0x9f4   : > { %v3549_v19 = vsel %vm1902_vm9, %v10364_v50, 0.0  ;;  %v3479_v39 = vpop.xlane.xlu1 %3478 }
 0x9f5   : > { %3550 = vadd.xlane.f32.xlu1 %v3549_v19  ;;  %v3506_v19 = vsub.f32 %v10284_v41, %v3476_v29  ;;  %v3507_v11 = vsub.f32 %v10292_v1, %v3479_v39 }
 0x9f7   : > { %v10368_v18 = vpop.eup %8465  ;;  %v3525_v48 = vmul.f32 1.442695, %v3506_v19 }
 0x9f8   : > { %v3552_v0 = vsel %vm1902_vm9, %v10368_v18, 0.0 }
 0x9f9   : > { %3553 = vadd.xlane.f32.xlu0 %v3552_v0 }
 0xa2e   : > { %v3482_v34 = vpop.xlane.xlu0 %3481 }
 0xa2f   : > { %v3508_v30 = vsub.f32 %v10300_v40, %v3482_v34 }
 0xa31   : > { %v3529_v22 = vmul.f32 1.442695, %v3508_v30 }
 0xa32   : > { %v3485_v52 = vpop.xlane.xlu0 %3484 }
 0xa33   : > { %8467 = vpow2.f32 %v3529_v22  ;;  %v3509_v49 = vsub.f32 %v10306_v2, %v3485_v52  ;;  %v3527_v2 = vmul.f32 1.442695, %v3507_v11 }
 0xa34   : > { %8469 = vpow2.f32 %v3523_v33 }
 0xa35   : > { %v3531_v25 = vmul.f32 1.442695, %v3509_v49 }
 0xa36   : > { %v3488_v24 = vpop.xlane.xlu0 %3487 }
 0xa37   : > { %v3510_v0 = vsub.f32 %v10312_v54, %v3488_v24  ;;  %8471 = vpow2.f32 %v3531_v25 }
 0xa39   : > { %v3533_v40 = vmul.f32 1.442695, %v3510_v0 }
 0xa3a   : > { %v3491_v12 = vpop.xlane.xlu0 %3490 }
 0xa3b   : > { %8473 = vpow2.f32 %v3533_v40  ;;  %v3511_v35 = vsub.f32 %v10318_v56, %v3491_v12 }
 0xa3c   : > { %8475 = vpow2.f32 %v3525_v48 }
 0xa3d   : > { %v10379_v34 = vpop.eup %8467  ;;  %v3535_v30 = vmul.f32 1.442695, %v3511_v35 }
 0xa3e   : > { %v3564_v41 = vsel %vm1902_vm9, %v10379_v34, 0.0  ;;  %v10383_v29 = vpop.eup %8469  ;;  %v3494_v11 = vpop.xlane.xlu1 %3493 }
 0xa3f   : > { %8477 = vpow2.f32 %v3535_v30  ;;  %3565 = vadd.xlane.f32.xlu1 %v3564_v41  ;;  %v3555_v24 = vsel %vm1902_vm9, %v10383_v29, 0.0  ;;  %v3512_v40 = vsub.f32 %v10326_v42, %v3494_v11  ;;  %v8258_v42 = vunpack.i.h.bf16 %v10212_v28 }
 0xa40   : > { %8479 = vpow2.f32 %v3527_v2 }
 0xa41   : > { %v10387_v39 = vpop.eup %8471  ;;  %v3537_v35 = vmul.f32 1.442695, %v3512_v40 }
 0xa42   : > { %v3567_v1 = vsel %vm1902_vm9, %v10387_v39, 0.0  ;;  %v3497_v19 = vpop.xlane.xlu0 %3496 }
 0xa43   : > { %3556 = vadd.xlane.f32.xlu1 %v3555_v24  ;;  %v3513_v0 = vsub.f32 %v10332_v15, %v3497_v19 }
 0xa45   : > { %v10389_v25 = vpop.eup %8473  ;;  %v3539_v12 = vmul.f32 1.442695, %v3513_v0 }
 0xa46   : > { %v3570_v48 = vsel %vm1902_vm9, %v10389_v25, 0.0  ;;  %v10395_v54 = vpop.eup %8475  ;;  %v10413_v2 = vpop.permute.xlu0 %3897 }
 0xa47   : > { %3571 = vadd.xlane.f32.xlu0 %v3570_v48  ;;  %3568 = vadd.xlane.f32.xlu1 %v3567_v1  ;;  %v3558_v22 = vsel %vm1902_vm9, %v10395_v54, 0.0  ;;  %8481 = vpow2.f32 %v3539_v12  ;;  %v3500_v30 = vpop.xlane.xlu1 %3499  ;;  %v8257_v1 = vunpack.i.l.bf16 %v10212_v28  ;;  %v8267_v12 = vunpack.i.l.bf16 %v10322_v36 }
 0xa48   : > { %8483 = vpow2.f32 %v3537_v35 }
 0xa49   : > { %v10397_v56 = vpop.eup %8477  ;;  %v7935_v11 = vpack.c.bf16 %v8258_v42, %v8257_v1 }
 0xa4a   : > { %v3573_v33 = vsel %vm1902_vm9, %v10397_v56, 0.0  ;;  %v10403_v52 = vpop.eup %8479 }
 0xa4b   : > { %3574 = vadd.xlane.f32.xlu0 %v3573_v33  ;;  %3559 = vadd.xlane.f32.xlu1 %v3558_v22  ;;  %v3561_v49 = vsel %vm1902_vm9, %v10403_v52, 0.0 }
 0xa4f   : > { %3562 = vadd.xlane.f32.xlu1 %v3561_v49 }
 0xa60   : > { %3899 = vrot.lane.b32.xlu1 %v9267_v58, %s8737_s0  ;;  %v10415_v58 = vpop.eup %8481 }
 0xa61   : > { %8285 = vrot.lane.b32.xlu0 %v9322_v13, %s8736_s27  ;;  %v3579_v48 = vsel %vm1902_vm9, %v10415_v58, 0.0  ;;  %v10419_v15 = vpop.eup %8483 }
 0xa62   : > { %v3576_v19 = vsel %vm1902_vm9, %v10419_v15, 0.0 }
 0xa63   : > { %v3548_v41 = vpop.xlane.xlu1 %3547 }
 0xa77   : > { %v3545_v24 = vpop.xlane.xlu0 %3544 }
 0xa78   : > { %8485 = vrcp.f32 %v3545_v24 }
 0xa79   : > { %8487 = vrcp.f32 %v3548_v41 }
 0xa80   : > { %3580 = vadd.xlane.f32.xlu0 %v3579_v48  ;;  %v8277_v48 = vunpack.i.l.bf16 %v10351_v45 }
 0xa82   : > { %v8486_v33 = vpop.eup %8485  ;;  %v3551_v22 = vpop.xlane.xlu1 %3550 }
 0xa83   : > { %v3586_v49 = vmul.f32 %v8486_v33, %v10359_v16  ;;  %8489 = vrcp.f32 %v3551_v22  ;;  %v8488_v0 = vpop.eup %8487  ;;  %v8268_v16 = vunpack.i.h.bf16 %v10322_v36 }
 0xa84   : > { %3577 = vadd.xlane.f32.xlu1 %v3576_v19  ;;  %v3588_v28 = vmul.f32 %v8488_v0, %v10353_v63  ;;  %v8278_v63 = vunpack.i.h.bf16 %v10351_v45 }
 0xa85   : > { %7483 = vmatmul.mubr.msk.f32.vlgmr.msra.gmra.mrb[70].mxu1 %vm1902_vm9, %v3586_v49  ;;  %v7939_v35 = vpack.c.bf16 %v8268_v16, %v8267_v12 }
 0xa86   : > { %7937 = vmatpush3.bf16.xpose.msk.msra.mxu1 %vm9345_vm7, %v7935_v11  ;;  %v3554_v40 = vpop.xlane.xlu0 %3553  ;;  %7485 = vmatprep.mubr.msk.f32.mxu1 %vm8727_vm5, %v11663_v21  ;;  %v7943_v1 = vpack.c.bf16 %v8278_v63, %v8277_v48 }
 0xa87   : > { %8491 = vrcp.f32 %v3554_v40  ;;  %7938 = vmatprep.subr.bf16.mxu1 %v11664_v51 }
 0xa89   : > { %7486 = vmatmul.mubr.msk.f32.gmra.mrb[72].mxu1 %vm1902_vm9, %v3588_v28 }
 0xa8a   : > { %7488 = vmatprep.mubr.msk.f32.mxu1 %vm8727_vm5, %v11663_v21 }
 0xa8d   : > { %v8490_v41 = vpop.eup %8489 }
 0xa8e   : > { %7941 = vmatpush3.bf16.xpose.msk.msra.mxu1 %vm9345_vm7, %v7939_v35  ;;  %v3590_v24 = vmul.f32 %v8490_v41, %v10364_v50 }
 0xa8f   : > { %7942 = vmatprep.subr.bf16.mxu1 %v11664_v51 }
 0xa90   : > { %7489 = vmatmul.mubr.msk.f32.gmra.mrb[74].mxu1 %vm1902_vm9, %v3590_v24 }
 0xa91   : > { %v8492_v36 = vpop.eup %8491  ;;  %7491 = vmatprep.mubr.msk.f32.mxu1 %vm8727_vm5, %v11663_v21 }
 0xa92   : > { %v3592_v42 = vmul.f32 %v8492_v36, %v10368_v18 }
 0xa94   : > { %7492 = vmatmul.mubr.msk.f32.gmra.mrb[76].mxu1 %vm1902_vm9, %v3592_v42 }
 0xa95   : > { %4079 = vrot.lane.b32.xlu1 %v9316_v9, %s8736_s27  ;;  %7494 = vmatprep.mubr.msk.f32.mxu1 %vm8727_vm5, %v11663_v21 }
 0xa96   : > { %7945 = vmatpush3.bf16.xpose.msk.msra.mxu1 %vm9345_vm7, %v7943_v1  ;;  %3901 = vrot.lane.b32.xlu0 %v9278_v38, %s8737_s0  ;;  %v3514_v38 = vsub.f32 %v10340_v53, %v3500_v30 }
 0xa97   : > { %7550 = vmatprep.subr.mxu1 %v11663_v21 }
 0xa99   : > { %4053 = vrot.lane.b32.xlu1 %v9293_v3, %s8737_s0 }
 0xa9a   : > { %3903 = vrot.lane.b32.xlu0 %v9276_v32, %s8737_s0  ;;  %v3541_v32 = vmul.f32 1.442695, %v3514_v38 }
 0xa9c   : > { %8493 = vpow2.f32 %v3541_v32 }
 0xa9e   : > { %7551 = vmatpush3.xpose.msk.msra.mxu1 %vm1594_vm6, %v10346_v31  ;;  %3905 = vrot.lane.b32.xlu0 %v9287_v60, %s8737_s0  ;;  %v8272_v31 = vunpack.i.l.bf16 %v10336_v14 }
 0xa9f   : > { %7958 = vmatprep.subr.bf16.mxu1 %v11664_v51 }
 0xaa2   : > { %3907 = vrot.lane.b32.xlu0 %v9285_v59, %s8737_s0 }
 0xaa6   : > { %3909 = vrot.lane.b32.xlu0 %v9295_v4, %s8737_s0  ;;  %v10480_v59 = vpop.eup %8493 }
 0xaa7   : > { %v3582_v60 = vsel %vm1902_vm9, %v10480_v59, 0.0 }
 0xaaa   : > { %4061 = vrot.lane.b32.xlu0 %v9306_v55, %s8737_s0 }
 0xaae   : > { %4065 = vrot.lane.b32.xlu0 %v9316_v9, %s8737_s0 }
 0xab2   : > { %8290 = vrot.lane.b32.xlu0 %v9273_v46, %s8738_s22 }
 0xab6   : > { %8300 = vrot.lane.b32.xlu0 %v9291_v61, %s8738_s22  ;;  %v8273_v61 = vunpack.i.h.bf16 %v10336_v14 }
 0xab8   : > { %v7947_v18 = vpack.c.bf16 %v8273_v61, %v8272_v31 }
 0xabd   : > { %3583 = vadd.xlane.f32.xlu1 %v3582_v60 }
 0xacc   : > { %v3566_v3 = vpop.xlane.xlu1 %3565 }
 0xacd   : > { %8495 = vrcp.f32 %v3566_v3 }
 0xace   : > { %4055 = vrot.lane.b32.xlu1 %v9299_v5, %s8737_s0 }
 0xad0   : > { %v3557_v55 = vpop.xlane.xlu1 %3556 }
 0xad1   : > { %8497 = vrcp.f32 %v3557_v55 }
 0xad2   : > { %4057 = vrot.lane.b32.xlu1 %v9297_v62, %s8737_s0 }
 0xad4   : > { %v3572_v46 = vpop.xlane.xlu0 %3571  ;;  %v3569_v53 = vpop.xlane.xlu1 %3568 }
 0xad5   : > { %8499 = vrcp.f32 %v3569_v53 }
 0xad6   : > { %4059 = vrot.lane.b32.xlu1 %v9308_v7, %s8737_s0  ;;  %8501 = vrcp.f32 %v3572_v46 }
 0xad7   : > { %v8496_v45 = vpop.eup %8495 }
 0xad8   : > { %v3600_v50 = vmul.f32 %v8496_v45, %v10379_v34  ;;  %v3560_v5 = vpop.xlane.xlu1 %3559  ;;  %v3575_v30 = vpop.xlane.xlu0 %3574  ;;  %v8283_v34 = vunpack.i.h.bf16 %v10344_v37 }
 0xad9   : > { %8503 = vrcp.f32 %v3560_v5 }
 0xada   : > { %4063 = vrot.lane.b32.xlu1 %v9318_v10, %s8737_s0  ;;  %7518 = vmatmul.mubr.msk.f32.vlgmr.msra.gmra.mrb[84].mxu0 %vm1902_vm9, %v3600_v50  ;;  %8505 = vrcp.f32 %v3575_v30  ;;  %v8282_v10 = vunpack.i.l.bf16 %v10344_v37  ;;  %s11698_s0 = sld [smem:[#allocation39_spill]] (!%p6709_p6) }
 0xadb   : > { %v8498_v62 = vpop.eup %8497  ;;  %7949 = vmatpush3.bf16.xpose.msk.msra.mxu0 %vm9345_vm7, %v7947_v18  ;;  %7520 = vmatprep.mubr.msk.f32.mxu0 %vm8727_vm5, %v11663_v21 }
 0xadc   : > { %v3563_v7 = vpop.xlane.xlu1 %3562  ;;  %v3594_v14 = vmul.f32 %v8498_v62, %v10383_v29  ;;  %7950 = vmatprep.subr.bf16.mxu0 %v11664_v51  ;;  %v7951_v29 = vpack.c.bf16 %v8283_v34, %v8282_v10  ;;  %v8286_v19 = vpop.permute.xlu0 %8285 }
 0xadd   : > { %8507 = vrcp.f32 %v3563_v7  ;;  %v8287_v40 = vunpack.i.l.bf16 %v8286_v19 }
 0xade   : > { %8295 = vrot.lane.b32.xlu1 %v9282_v47, %s8738_s22  ;;  %7495 = vmatmul.mubr.msk.f32.gmra.mrb[78].mxu1 %vm1902_vm9, %v3594_v14 }
 0xadf   : > { %7497 = vmatprep.mubr.msk.f32.mxu1 %vm8727_vm5, %v11663_v21  ;;  %v8500_v33 = vpop.eup %8499 }
 0xae0   : > { %v3602_v22 = vmul.f32 %v8500_v33, %v10387_v39  ;;  %v8502_v49 = vpop.eup %8501  ;;  %v8288_v39 = vunpack.i.h.bf16 %v8286_v19 }
 0xae1   : > { %v3604_v37 = vmul.f32 %v8502_v49, %v10389_v25 }
 0xae2   : > { %7521 = vmatmul.mubr.msk.f32.gmra.mrb[86].mxu0 %vm1902_vm9, %v3602_v22  ;;  %v7955_v16 = vpack.c.bf16 %v8288_v39, %v8287_v40 }
 0xae3   : > { %v8504_v0 = vpop.eup %8503  ;;  %7953 = vmatpush3.bf16.xpose.msk.msra.mxu0 %vm9345_vm7, %v7951_v29  ;;  %7523 = vmatprep.mubr.msk.f32.mxu0 %vm8727_vm5, %v11663_v21 }
 0xae4   : > { %v3596_v47 = vmul.f32 %v8504_v0, %v10395_v54  ;;  %7954 = vmatprep.subr.bf16.mxu0 %v11664_v51  ;;  %v8506_v11 = vpop.eup %8505 }
 0xae5   : > { %v3606_v25 = vmul.f32 %v8506_v11, %v10397_v56  ;;  %v3900_v56 = vpop.permute.xlu1 %3899 }
 0xae6   : > { %7498 = vmatmul.mubr.msk.f32.gmra.mrb[80].mxu1 %vm1902_vm9, %v3596_v47  ;;  %7524 = vmatmul.mubr.msk.f32.gmra.mrb[88].mxu0 %vm1902_vm9, %v3604_v37 }
 0xae7   : > { %v8508_v28 = vpop.eup %8507  ;;  %7500 = vmatprep.mubr.msk.f32.mxu1 %vm8727_vm5, %v11663_v21  ;;  %7526 = vmatprep.mubr.msk.f32.mxu0 %vm8727_vm5, %v11663_v21 }
 0xae8   : > { %v3598_v54 = vmul.f32 %v8508_v28, %v10403_v52 }
 0xaea   : > { %7501 = vmatmul.mubr.msk.f32.gmra.mrb[82].mxu1 %vm1902_vm9, %v3598_v54  ;;  %7527 = vmatmul.mubr.msk.f32.gmra.mrb[90].mxu0 %vm1902_vm9, %v3606_v25 }
 0xaeb   : > { %7957 = vmatpush3.bf16.xpose.msk.msra.mxu0 %vm9345_vm7, %v7955_v16  ;;  %7552 = vmatprep.mubr.msk.f32.mxu1 %vm8727_vm5, %v11663_v21 }
 0xaec   : > { %7585 = vmatprep.subr.mxu0 %v11663_v21  ;;  %7529 = vmatprep.mubr.msk.f32.mxu0 %vm8727_vm5, %v11663_v21 }
 0xaee   : > { %7553 = vmatmul.mubr.msk.f32.vlgmr.msra.gmra.mrb[84].mxu1 %vm1594_vm6, %v10413_v2 }
 0xaef   : > { %7555 = vmatprep.mubr.msk.f32.mxu1 %vm8727_vm5, %v11663_v21 }
 0xaf2   : > { %7556 = vmatmul.mubr.msk.f32.gmra.mrb[86].mxu1 %vm1594_vm6, %v3900_v56 }
 0xaf3   : > { %7558 = vmatprep.mubr.msk.f32.mxu1 %vm8727_vm5, %v11663_v21 }
 0xb0d   : > { %v3581_v17 = vpop.xlane.xlu0 %3580 }
 0xb11   : > { %v3902_v52 = vpop.permute.xlu0 %3901  ;;  %v3578_v12 = vpop.xlane.xlu1 %3577 }
 0xb12   : > { %8509 = vrcp.f32 %v3578_v12  ;;  %7559 = vmatmul.mubr.msk.f32.gmra.mrb[88].mxu1 %vm1594_vm6, %v3902_v52 }
 0xb13   : > { %7561 = vmatprep.mubr.msk.f32.mxu1 %vm8727_vm5, %v11663_v21  ;;  %8511 = vrcp.f32 %v3581_v17 }
 0xb15   : > { %v3904_v2 = vpop.permute.xlu0 %3903  ;;  %v4080_v35 = vpop.permute.xlu1 %4079 }
 0xb16   : > { %7562 = vmatmul.mubr.msk.f32.gmra.mrb[90].mxu1 %vm1594_vm6, %v3904_v2  ;;  %7586 = vmatpush3.xpose.msk.msra.mxu0 %vm1594_vm6, %v4080_v35 }
 0xb17   : > { %7564 = vmatprep.mubr.msk.f32.mxu1 %vm8727_vm5, %v11663_v21  ;;  %7967 = vmatprep.subr.bf16.mxu0 %v11664_v51 }
 0xb19   : > { %v3906_v41 = vpop.permute.xlu0 %3905 }
 0xb1a   : > { %7565 = vmatmul.mubr.msk.f32.gmra.mrb[92].mxu1 %vm1594_vm6, %v3906_v41 }
 0xb1b   : > { %7567 = vmatprep.mubr.msk.f32.mxu1 %vm8727_vm5, %v11663_v21 }
 0xb1c   : > { %v8510_v24 = vpop.eup %8509 }
 0xb1d   : > { %v3908_v63 = vpop.permute.xlu0 %3907  ;;  %v3608_v48 = vmul.f32 %v8510_v24, %v10419_v15  ;;  %v8512_v36 = vpop.eup %8511 }
 0xb1e   : > { %7568 = vmatmul.mubr.msk.f32.gmra.mrb[94].mxu1 %vm1594_vm6, %v3908_v63  ;;  %v3610_v1 = vmul.f32 %v8512_v36, %v10415_v58  ;;  %v4054_v58 = vpop.permute.xlu1 %4053 }
 0xb1f   : > { %7530 = vmatmul.mubr.msk.f32.gmra.mrb[92].mxu0 %vm1902_vm9, %v3608_v48  ;;  %7570 = vmatprep.mubr.msk.f32.mxu1 %vm8727_vm5, %v11663_v21 }
 0xb20   : > { %7532 = vmatprep.mubr.msk.f32.mxu0 %vm8727_vm5, %v11663_v21 }
 0xb21   : > { %v3910_v42 = vpop.permute.xlu0 %3909 }
 0xb22   : > { %7571 = vmatmul.mubr.msk.f32.gmra.mrb[96].mxu1 %vm1594_vm6, %v3910_v42 }
 0xb23   : > { %7533 = vmatmul.mubr.msk.f32.gmra.mrb[94].mxu0 %vm1902_vm9, %v3610_v1  ;;  %7622 = vmatprep.mubr.msk.f32.mxu1 %vm8727_vm5, %v11663_v21 }
 0xb24   : > { %7535 = vmatprep.mubr.msk.f32.mxu0 %vm8727_vm5, %v11663_v21 }
 0xb25   : > { %v4062_v15 = vpop.permute.xlu0 %4061 }
 0xb29   : > { %v4066_v38 = vpop.permute.xlu0 %4065 }
 0xb2d   : > { %v8291_v32 = vpop.permute.xlu0 %8290 }
 0xb2e   : > { %v8293_v60 = vunpack.i.h.bf16 %v8291_v32  ;;  %v8292_v3 = vunpack.i.l.bf16 %v8291_v32 }
 0xb30   : > { %v7959_v55 = vpack.c.bf16 %v8293_v60, %v8292_v3 }
 0xb31   : > { %v8301_v14 = vpop.permute.xlu0 %8300 }
 0xb32   : > { %7960 = vmatpush3.bf16.msra.mxu1 %v7959_v55  ;;  %v8303_v33 = vunpack.i.h.bf16 %v8301_v14  ;;  %v8302_v22 = vunpack.i.l.bf16 %v8301_v14 }
 0xb33   : > { %7961 = vmatprep.subr.bf16.mxu1 %v11664_v51 }
 0xb34   : > { %v7965_v0 = vpack.c.bf16 %v8303_v33, %v8302_v22 }
 0xb4a   : > { %v3584_v46 = vpop.xlane.xlu1 %3583 }
 0xb4b   : > { %8513 = vrcp.f32 %v3584_v46 }
 0xb4e   : > { %v4056_v53 = vpop.permute.xlu1 %4055 }
 0xb52   : > { %v4058_v61 = vpop.permute.xlu1 %4057 }
 0xb55   : > { %v8514_v31 = vpop.eup %8513 }
 0xb56   : > { %v4060_v45 = vpop.permute.xlu1 %4059  ;;  %v3612_v50 = vmul.f32 %v8514_v31, %v10480_v59 }
 0xb58   : > { %v10569_v5 = vpop.f32.mrb[70].mxu1  ;;  %7536 = vmatmul.mubr.msk.f32.gmra.mrb[96].mxu0 %vm1902_vm9, %v3612_v50 }
 0xb59   : > { %v7484_v18 = vpop.f32.mrb[71].mxu1  ;;  %7587 = vmatprep.mubr.msk.f32.mxu0 %vm8727_vm5, %v11663_v21 }
 0xb5a   : > { %v4064_v30 = vpop.permute.xlu1 %4063 }
 0xb5c   : > { %v10574_v62 = vpop.f32.mrb[72].mxu1  ;;  %7588 = vmatmul.mubr.msk.f32.vlgmr.msra.gmra.mrb[98].mxu0 %vm1594_vm6, %v4054_v58 }
 0xb5d   : > { %v7487_v7 = vpop.f32.mrb[73].mxu1  ;;  %7590 = vmatprep.mubr.msk.f32.mxu0 %vm8727_vm5, %v11663_v21 }
 0xb5e   : > { %v8296_v34 = vpop.permute.xlu1 %8295 }
 0xb5f   : > { %v8298_v59 = vunpack.i.h.bf16 %v8296_v34  ;;  %v8297_v10 = vunpack.i.l.bf16 %v8296_v34 }
 0xb60   : > { %7591 = vmatmul.mubr.msk.f32.gmra.mrb[100].mxu0 %vm1594_vm6, %v4056_v53 }
 0xb61   : > { %v7962_v49 = vpack.c.bf16 %v8298_v59, %v8297_v10  ;;  %7593 = vmatprep.mubr.msk.f32.mxu0 %vm8727_vm5, %v11663_v21 }
 0xb63   : > { %v10582_v29 = vpop.f32.mrb[74].mxu1  ;;  %7963 = vmatpush3.bf16.msra.mxu1 %v7962_v49 }
 0xb64   : > { %v7490_v19 = vpop.f32.mrb[75].mxu1  ;;  %7594 = vmatmul.mubr.msk.f32.gmra.mrb[102].mxu0 %vm1594_vm6, %v4058_v61  ;;  %7964 = vmatprep.subr.bf16.mxu1 %v11664_v51 }
 0xb65   : > { %7596 = vmatprep.mubr.msk.f32.mxu0 %vm8727_vm5, %v11663_v21 }
 0xb67   : > { %v10588_v47 = vpop.f32.mrb[76].mxu1  ;;  %7966 = vmatpush3.bf16.msra.mxu1 %v7965_v0 }
 0xb68   : > { %v7493_v37 = vpop.f32.mrb[77].mxu1  ;;  %7597 = vmatmul.mubr.msk.f32.gmra.mrb[104].mxu0 %vm1594_vm6, %v4060_v45  ;;  %7620 = vmatprep.subr.mxu1 %v11663_v21 }
 0xb69   : > { %7599 = vmatprep.mubr.msk.f32.mxu0 %vm8727_vm5, %v11663_v21 }
 0xb6c   : > { %7600 = vmatmul.mubr.msk.f32.gmra.mrb[106].mxu0 %vm1594_vm6, %v4062_v15 }
 0xb6d   : > { %7602 = vmatprep.mubr.msk.f32.mxu0 %vm8727_vm5, %v11663_v21 }
 0xb70   : > { %7603 = vmatmul.mubr.msk.f32.gmra.mrb[108].mxu0 %vm1594_vm6, %v4064_v30 }
 0xb71   : > { %7605 = vmatprep.mubr.msk.f32.mxu0 %vm8727_vm5, %v11663_v21 }
 0xb74   : > { %7606 = vmatmul.mubr.msk.f32.gmra.mrb[110].mxu0 %vm1594_vm6, %v4066_v38 }
 0xb75   : > { %7657 = vmatprep.mubr.msk.f32.mxu0 %vm8727_vm5, %v11663_v21 }
 0xbad   : > { %v10603_v11 = vpop.f32.mrb[84].mxu0 }
 0xbae   : > { %v7519_v39 = vpop.f32.mrb[85].mxu0 }
 0xbb1   : > { %v10605_v40 = vpop.f32.mrb[78].mxu1 }
 0xbb2   : > { %v7496_v28 = vpop.f32.mrb[79].mxu1 }
 0xbb5   : > { %v10607_v54 = vpop.f32.mrb[86].mxu0 }
 0xbb6   : > { %v7522_v25 = vpop.f32.mrb[87].mxu0 }
 0xbb9   : > { %v10609_v16 = vpop.f32.mrb[80].mxu1  ;;  %v10611_v56 = vpop.f32.mrb[88].mxu0 }
 0xbba   : > { %v7499_v17 = vpop.f32.mrb[81].mxu1  ;;  %v7525_v52 = vpop.f32.mrb[89].mxu0 }
 0xbbd   : > { %v10613_v12 = vpop.f32.mrb[82].mxu1  ;;  %v10615_v2 = vpop.f32.mrb[90].mxu0 }
 0xbbe   : > { %v7502_v35 = vpop.f32.mrb[83].mxu1  ;;  %v7528_v41 = vpop.f32.mrb[91].mxu0 }
 0xbc1   : > { %v4019_v24 = vpop.f32.mrb[84].mxu1 }
 0xbc2   : > { %v4209_v63 = vmul.f32 0.35355338, %v4019_v24  ;;  %v7554_v48 = vpop.f32.mrb[85].mxu1 }
 0xbc4   : > { %v10619_v36 = vsel %vm1572_vm8, %v4209_v63, -1e+30 }
 0xbc5   : > { %v4024_v42 = vpop.f32.mrb[86].mxu1  ;;  %v4237_v1 = vsel %vm1902_vm9, %v10619_v36, -inf }
 0xbc6   : > { %v4210_v15 = vmul.f32 0.35355338, %v4024_v42  ;;  %4238 = vmax.xlane.f32.xlu1 %v4237_v1  ;;  %v7557_v38 = vpop.f32.mrb[87].mxu1 }
 0xbc8   : > { %v10625_v32 = vsel %vm1572_vm8, %v4210_v15, -1e+30 }
 0xbc9   : > { %v4240_v60 = vsel %vm1902_vm9, %v10625_v32, -inf }
 0xbca   : > { %4241 = vmax.xlane.f32.xlu0 %v4240_v60 }
 0xbe5   : > { %v4029_v3 = vpop.f32.mrb[88].mxu1 }
 0xbe6   : > { %v4211_v55 = vmul.f32 0.35355338, %v4029_v3  ;;  %v7560_v58 = vpop.f32.mrb[89].mxu1 }
 0xbe8   : > { %v10631_v46 = vsel %vm1572_vm8, %v4211_v55, -1e+30 }
 0xbe9   : > { %v4034_v53 = vpop.f32.mrb[90].mxu1  ;;  %v4243_v61 = vsel %vm1902_vm9, %v10631_v46, -inf }
 0xbea   : > { %v4212_v31 = vmul.f32 0.35355338, %v4034_v53  ;;  %4244 = vmax.xlane.f32.xlu0 %v4243_v61  ;;  %v7563_v45 = vpop.f32.mrb[91].mxu1 }
 0xbec   : > { %v10637_v50 = vsel %vm1572_vm8, %v4212_v31, -1e+30 }
 0xbed   : > { %v4039_v18 = vpop.f32.mrb[92].mxu1  ;;  %v4246_v30 = vsel %vm1902_vm9, %v10637_v50, -inf }
 0xbee   : > { %v4213_v7 = vmul.f32 0.35355338, %v4039_v18  ;;  %4247 = vmax.xlane.f32.xlu1 %v4246_v30  ;;  %v7566_v14 = vpop.f32.mrb[93].mxu1 }
 0xbf0   : > { %v10643_v34 = vsel %vm1572_vm8, %v4213_v7, -1e+30 }
 0xbf1   : > { %v4044_v59 = vpop.f32.mrb[94].mxu1  ;;  %v4249_v10 = vsel %vm1902_vm9, %v10643_v34, -inf }
 0xbf2   : > { %v4214_v33 = vmul.f32 0.35355338, %v4044_v59  ;;  %v10647_v22 = vpop.f32.mrb[92].mxu0  ;;  %4250 = vmax.xlane.f32.xlu1 %v4249_v10  ;;  %v7569_v49 = vpop.f32.mrb[95].mxu1 }
 0xbf3   : > { %v7531_v19 = vpop.f32.mrb[93].mxu0 }
 0xbf4   : > { %v10651_v0 = vsel %vm1572_vm8, %v4214_v33, -1e+30 }
 0xbf5   : > { %v4049_v37 = vpop.f32.mrb[96].mxu1  ;;  %v4252_v39 = vsel %vm1902_vm9, %v10651_v0, -inf }
 0xbf6   : > { %v4215_v28 = vmul.f32 0.35355338, %v4049_v37  ;;  %v10655_v25 = vpop.f32.mrb[94].mxu0  ;;  %4253 = vmax.xlane.f32.xlu1 %v4252_v39  ;;  %v7572_v17 = vpop.f32.mrb[97].mxu1 }
 0xbf7   : > { %v7534_v52 = vpop.f32.mrb[95].mxu0 }
 0xbf8   : > { %v10659_v35 = vsel %vm1572_vm8, %v4215_v28, -1e+30 }
 0xbf9   : > { %v4255_v41 = vsel %vm1902_vm9, %v10659_v35, -inf }
 0xbfa   : > { %4256 = vmax.xlane.f32.xlu1 %v4255_v41 }
 0xc2b   : > { %v10663_v24 = vpop.f32.mrb[96].mxu0 }
 0xc2c   : > { %v7537_v63 = vpop.f32.mrb[97].mxu0 }
 0xc2f   : > { %v4175_v48 = vpop.f32.mrb[98].mxu0 }
 0xc30   : > { %v4216_v42 = vmul.f32 0.35355338, %v4175_v48  ;;  %v7589_v1 = vpop.f32.mrb[99].mxu0 }
 0xc32   : > { %v10667_v15 = vsel %vm1572_vm8, %v4216_v42, -1e+30 }
 0xc33   : > { %v4180_v38 = vpop.f32.mrb[100].mxu0  ;;  %v4258_v60 = vsel %vm1902_vm9, %v10667_v15, -inf }
 0xc34   : > { %v4217_v3 = vmul.f32 0.35355338, %v4180_v38  ;;  %v7592_v55 = vpop.f32.mrb[101].mxu0  ;;  %4259 = vmax.xlane.f32.xlu0 %v4258_v60 }
 0xc36   : > { %v10673_v58 = vsel %vm1572_vm8, %v4217_v3, -1e+30 }
 0xc37   : > { %v4185_v53 = vpop.f32.mrb[102].mxu0  ;;  %v4261_v61 = vsel %vm1902_vm9, %v10673_v58, -inf }
 0xc38   : > { %v4218_v31 = vmul.f32 0.35355338, %v4185_v53  ;;  %v7595_v45 = vpop.f32.mrb[103].mxu0  ;;  %4262 = vmax.xlane.f32.xlu0 %v4261_v61 }
 0xc3a   : > { %v10679_v18 = vsel %vm1572_vm8, %v4218_v31, -1e+30 }
 0xc3b   : > { %v4190_v30 = vpop.f32.mrb[104].mxu0  ;;  %v4264_v7 = vsel %vm1902_vm9, %v10679_v18, -inf }
 0xc3c   : > { %v4219_v14 = vmul.f32 0.35355338, %v4190_v30  ;;  %v7598_v59 = vpop.f32.mrb[105].mxu0  ;;  %4265 = vmax.xlane.f32.xlu0 %v4264_v7 }
 0xc3e   : > { %v10685_v10 = vsel %vm1572_vm8, %v4219_v14, -1e+30 }
 0xc3f   : > { %v4195_v33 = vpop.f32.mrb[106].mxu0  ;;  %v4267_v49 = vsel %vm1902_vm9, %v10685_v10, -inf }
 0xc40   : > { %v4220_v19 = vmul.f32 0.35355338, %v4195_v33  ;;  %v7601_v37 = vpop.f32.mrb[107].mxu0  ;;  %4268 = vmax.xlane.f32.xlu0 %v4267_v49 }
 0xc42   : > { %v10691_v39 = vsel %vm1572_vm8, %v4220_v19, -1e+30 }
 0xc43   : > { %v4200_v28 = vpop.f32.mrb[108].mxu0  ;;  %v4270_v17 = vsel %vm1902_vm9, %v10691_v39, -inf }
 0xc44   : > { %v4221_v52 = vmul.f32 0.35355338, %v4200_v28  ;;  %v7604_v41 = vpop.f32.mrb[109].mxu0  ;;  %4271 = vmax.xlane.f32.xlu1 %v4270_v17 }
 0xc46   : > { %v10697_v63 = vsel %vm1572_vm8, %v4221_v52, -1e+30 }
 0xc47   : > { %v4205_v48 = vpop.f32.mrb[110].mxu0  ;;  %v4273_v42 = vsel %vm1902_vm9, %v10697_v63, -inf }
 0xc48   : > { %v7607_v1 = vpop.f32.mrb[111].mxu0  ;;  %4274 = vmax.xlane.f32.xlu0 %v4273_v42  ;;  %v4222_v55 = vmul.f32 0.35355338, %v4205_v48 }
 0xc4a   : > { %v10708_v61 = vsel %vm1572_vm8, %v4222_v55, -1e+30 }
 0xc53   : > { %v4239_v38 = vpop.xlane.xlu1 %4238 }
 0xc54   : > { %v4279_v60 = vsub.f32 %v10619_v36, %v4239_v38 }
 0xc55   : > { %4403 = vrot.lane.b32.xlu1 %v9295_v4, %s8738_s22  ;;  %v4276_v4 = vsel %vm1902_vm9, %v10708_v61, -inf }
 0xc56   : > { %v4293_v3 = vmul.f32 1.442695, %v4279_v60 }
 0xc57   : > { %v4242_v53 = vpop.xlane.xlu0 %4241 }
 0xc58   : > { %8515 = vpow2.f32 %v4293_v3 }
 0xc5e   : > { %8305 = vrot.lane.b32.xlu0 %v9303_v6, %s8738_s22 }
 0xc62   : > { %v10713_v30 = vpop.eup %8515 }
 0xc63   : > { %v4321_v36 = vsel %vm1902_vm9, %v10713_v30, 0.0 }
 0xc77   : > { %v4245_v31 = vpop.xlane.xlu0 %4244 }
 0xc78   : > { %v4281_v45 = vsub.f32 %v10631_v46, %v4245_v31  ;;  %v4280_v46 = vsub.f32 %v10625_v32, %v4242_v53 }
 0xc79   : > { %4277 = vmax.xlane.f32.xlu1 %v4276_v4 }
 0xc7a   : > { %v4297_v6 = vmul.f32 1.442695, %v4281_v45  ;;  %v4295_v59 = vmul.f32 1.442695, %v4280_v46 }
 0xc7b   : > { %v4248_v14 = vpop.xlane.xlu1 %4247 }
 0xc7c   : > { %8517 = vpow2.f32 %v4297_v6  ;;  %v4282_v33 = vsub.f32 %v10637_v50, %v4248_v14 }
 0xc7d   : > { %4322 = vadd.xlane.f32.xlu0 %v4321_v36  ;;  %8519 = vpow2.f32 %v4295_v59 }
 0xc7e   : > { %v4299_v49 = vmul.f32 1.442695, %v4282_v33 }
 0xc7f   : > { %v4251_v32 = vpop.xlane.xlu1 %4250 }
 0xc80   : > { %8521 = vpow2.f32 %v4299_v49  ;;  %v4283_v17 = vsub.f32 %v10643_v34, %v4251_v32 }
 0xc82   : > { %v4301_v48 = vmul.f32 1.442695, %v4283_v17 }
 0xc83   : > { %v4254_v52 = vpop.xlane.xlu1 %4253 }
 0xc84   : > { %v4284_v42 = vsub.f32 %v10651_v0, %v4254_v52 }
 0xc86   : > { %v10717_v7 = vpop.eup %8517  ;;  %v4303_v3 = vmul.f32 1.442695, %v4284_v42 }
 0xc87   : > { %v4327_v23 = vsel %vm1902_vm9, %v10717_v7, 0.0  ;;  %v10725_v19 = vpop.eup %8519  ;;  %v4257_v53 = vpop.xlane.xlu1 %4256 }
 0xc88   : > { %4328 = vadd.xlane.f32.xlu0 %v4327_v23  ;;  %v4324_v37 = vsel %vm1902_vm9, %v10725_v19, 0.0  ;;  %v4285_v45 = vsub.f32 %v10659_v35, %v4257_v53 }
 0xc8a   : > { %8310 = vrot.lane.b32.xlu1 %v9312_v8, %s8738_s22  ;;  %v10729_v28 = vpop.eup %8521  ;;  %v4305_v0 = vmul.f32 1.442695, %v4285_v45 }
 0xc8b   : > { %v4330_v8 = vsel %vm1902_vm9, %v10729_v28, 0.0 }
 0xcae   : > { %4325 = vadd.xlane.f32.xlu1 %v4324_v37 }
 0xcb2   : > { %4331 = vadd.xlane.f32.xlu1 %v4330_v8 }
 0xcc1   : > { %v4260_v50 = vpop.xlane.xlu0 %4259 }
 0xcc2   : > { %v4286_v41 = vsub.f32 %v10667_v15, %v4260_v50 }
 0xcc4   : > { %v4307_v1 = vmul.f32 1.442695, %v4286_v41 }
 0xcc5   : > { %v4263_v38 = vpop.xlane.xlu0 %4262 }
 0xcc6   : > { %8523 = vpow2.f32 %v4307_v1  ;;  %v4287_v60 = vsub.f32 %v10673_v58, %v4263_v38 }
 0xcc7   : > { %8525 = vpow2.f32 %v4301_v48 }
 0xcc8   : > { %v4309_v55 = vmul.f32 1.442695, %v4287_v60 }
 0xcc9   : > { %v4266_v31 = vpop.xlane.xlu0 %4265 }
 0xcca   : > { %8527 = vpow2.f32 %v4309_v55  ;;  %v4288_v34 = vsub.f32 %v10679_v18, %v4266_v31 }
 0xccb   : > { %8529 = vpow2.f32 %v4303_v3 }
 0xccc   : > { %v4311_v15 = vmul.f32 1.442695, %v4288_v34 }
 0xccd   : > { %v4269_v4 = vpop.xlane.xlu0 %4268 }
 0xcce   : > { %8531 = vpow2.f32 %v4311_v15  ;;  %v4289_v36 = vsub.f32 %v10685_v10, %v4269_v4 }
 0xccf   : > { %8533 = vpow2.f32 %v4305_v0 }
 0xcd0   : > { %v10739_v6 = vpop.eup %8523  ;;  %v4313_v35 = vmul.f32 1.442695, %v4289_v36 }
 0xcd1   : > { %v4272_v58 = vpop.xlane.xlu1 %4271  ;;  %v4342_v23 = vsel %vm1902_vm9, %v10739_v6, 0.0  ;;  %v10744_v46 = vpop.eup %8525 }
 0xcd2   : > { %v4290_v14 = vsub.f32 %v10691_v39, %v4272_v58  ;;  %4343 = vadd.xlane.f32.xlu1 %v4342_v23  ;;  %v4333_v10 = vsel %vm1902_vm9, %v10744_v46, 0.0 }
 0xcd4   : > { %v10747_v18 = vpop.eup %8527  ;;  %v4315_v59 = vmul.f32 1.442695, %v4290_v14 }
 0xcd5   : > { %v4275_v33 = vpop.xlane.xlu0 %4274  ;;  %v4404_v49 = vpop.permute.xlu1 %4403  ;;  %v4345_v37 = vsel %vm1902_vm9, %v10747_v18, 0.0 }
 0xcd6   : > { %v10753_v8 = vpop.eup %8529  ;;  %8535 = vpow2.f32 %v4315_v59  ;;  %v4291_v32 = vsub.f32 %v10697_v63, %v4275_v33  ;;  %4346 = vadd.xlane.f32.xlu0 %v4345_v37  ;;  %4334 = vadd.xlane.f32.xlu1 %v4333_v10 }
 0xcd7   : > { %7621 = vmatpush3.msra.mxu1 %v4404_v49  ;;  %8537 = vpow2.f32 %v4313_v35  ;;  %v4336_v52 = vsel %vm1902_vm9, %v10753_v8, 0.0 }
 0xcd8   : > { %v4317_v39 = vmul.f32 1.442695, %v4291_v32  ;;  %v10758_v50 = vpop.eup %8531 }
 0xcd9   : > { %v8306_v17 = vpop.permute.xlu0 %8305  ;;  %v4348_v1 = vsel %vm1902_vm9, %v10758_v50, 0.0  ;;  %v10762_v63 = vpop.eup %8533 }
 0xcda   : > { %v8308_v41 = vunpack.i.h.bf16 %v8306_v17  ;;  %v8307_v48 = vunpack.i.l.bf16 %v8306_v17  ;;  %4337 = vadd.xlane.f32.xlu1 %v4336_v52  ;;  %8539 = vpow2.f32 %v4317_v39  ;;  %v4339_v60 = vsel %vm1902_vm9, %v10762_v63, 0.0 }
 0xcdc   : > { %v7968_v42 = vpack.c.bf16 %v8308_v41, %v8307_v48 }
 0xcde   : > { %7969 = vmatpush3.bf16.msra.mxu0 %v7968_v42  ;;  %4349 = vadd.xlane.f32.xlu1 %v4348_v1 }
 0xcdf   : > { %7970 = vmatprep.subr.bf16.mxu0 %v11664_v51 }
 0xce0   : > { %v10765_v38 = vpop.eup %8535 }
 0xce1   : > { %v4354_v3 = vsel %vm1902_vm9, %v10765_v38, 0.0  ;;  %v10771_v55 = vpop.eup %8537 }
 0xce2   : > { %4340 = vadd.xlane.f32.xlu1 %v4339_v60  ;;  %4355 = vadd.xlane.f32.xlu0 %v4354_v3  ;;  %v4351_v53 = vsel %vm1902_vm9, %v10771_v55, 0.0 }
 0xce4   : > { %v10775_v31 = vpop.eup %8539 }
 0xce5   : > { %v4357_v34 = vsel %vm1902_vm9, %v10775_v31, 0.0 }
 0xce6   : > { %4352 = vadd.xlane.f32.xlu1 %v4351_v53 }
 0xcea   : > { %4358 = vadd.xlane.f32.xlu1 %v4357_v34 }
 0xcf8   : > { %8315 = vrot.lane.b32.xlu0 %v9322_v13, %s8738_s22 }
 0xcfb   : > { %4545 = vrot.lane.b32.xlu1 %v9316_v9, %s8738_s22 }
 0xcff   : > { %4689 = vrot.lane.b32.xlu1 %v10228_v57, %s8739_s2 }
 0xd03   : > { %4691 = vrot.lane.b32.xlu1 %v10230_v43, %s8739_s2 }
 0xd06   : > { %v4278_v45 = vpop.xlane.xlu1 %4277 }
 0xd07   : > { %v4292_v15 = vsub.f32 %v10708_v61, %v4278_v45  ;;  %4745 = vrot.lane.b32.xlu1 %v10569_v5, %s8740_s8 }
 0xd09   : > { %v4319_v4 = vmul.f32 1.442695, %v4292_v15 }
 0xd0a   : > { %v4323_v0 = vpop.xlane.xlu0 %4322  ;;  %v8311_v13 = vpop.permute.xlu1 %8310 }
 0xd0b   : > { %8541 = vpow2.f32 %v4319_v4  ;;  %v8313_v36 = vunpack.i.h.bf16 %v8311_v13  ;;  %v8312_v9 = vunpack.i.l.bf16 %v8311_v13  ;;  %4747 = vrot.lane.b32.xlu1 %v10574_v62, %s8740_s8 }
 0xd0c   : > { %8543 = vrcp.f32 %v4323_v0 }
 0xd0d   : > { %v7971_v57 = vpack.c.bf16 %v8313_v36, %v8312_v9 }
 0xd0f   : > { %4693 = vrot.lane.b32.xlu1 %v10232_v20, %s8739_s2  ;;  %7972 = vmatpush3.bf16.msra.mxu0 %v7971_v57  ;;  %v11674_v20 = vld [vmem:[#allocation25_spill] sm:$0xff] }
 0xd10   : > { %7973 = vmatprep.subr.bf16.mxu0 %v11664_v51  ;;  %v11673_v51 = vld [vmem:[#allocation23_spill] sm:$0xff] }
 0xd13   : > { %4695 = vrot.lane.b32.xlu1 %v10234_v26, %s8739_s2  ;;  %v11675_v26 = vld [vmem:[#allocation26_spill] sm:$0xff] }
 0xd15   : > { %v10797_v43 = vpop.eup %8541 }
 0xd16   : > { %v8544_v5 = vpop.eup %8543  ;;  %v4360_v61 = vsel %vm1902_vm9, %v10797_v43, 0.0 }
 0xd17   : > { %v4364_v58 = vmul.f32 %v8544_v5, %v10713_v30  ;;  %4749 = vrot.lane.b32.xlu1 %v10582_v29, %s8740_s8  ;;  %4361 = vadd.xlane.f32.xlu0 %v4360_v61  ;;  %v11677_v29 = vld [vmem:[#allocation24_spill] sm:$0xff] }
 0xd19   : > { %7623 = vmatmul.mubr.msk.f32.vlgmr.msra.gmra.mrb[98].mxu1 %vm1902_vm9, %v4364_v58  ;;  %v11681_v58 = vld [vmem:[#allocation14_spill] sm:$0xff] }
 0xd1a   : > { %7625 = vmatprep.mubr.msk.f32.mxu1 %vm8727_vm5, %v11663_v21 }
 0xd1b   : > { %4751 = vrot.lane.b32.xlu1 %v10588_v47, %s8740_s8  ;;  %v11678_v47 = vld [vmem:[#allocation30_spill] sm:$0xff] }
 0xd1f   : > { %4699 = vrot.lane.b32.xlu1 %v10242_v44, %s8739_s2  ;;  %v4329_v44 = vpop.xlane.xlu0 %4328 }
 0xd23   : > { %4755 = vrot.lane.b32.xlu1 %v10609_v16, %s8740_s8 }
 0xd27   : > { %4703 = vrot.lane.b32.xlu1 %v10236_v27, %s8739_s2  ;;  %v11676_v27 = vld [vmem:[#allocation28_spill] sm:$0xff] }
 0xd2b   : > { %4759 = vrot.lane.b32.xlu1 %v10603_v11, %s8740_s8 }
 0xd2d   : > { %4697 = vrot.lane.b32.xlu0 %v11673_v51, %s8739_s2 }
 0xd2f   : > { %4707 = vrot.lane.b32.xlu1 %v11674_v20, %s8739_s2 }
 0xd31   : > { %4753 = vrot.lane.b32.xlu0 %v10605_v40, %s8740_s8  ;;  %v11679_v40 = vld [vmem:[#allocation27_spill] sm:$0xff] }
 0xd33   : > { %4763 = vrot.lane.b32.xlu1 %v10611_v56, %s8740_s8 }
 0xd35   : > { %4701 = vrot.lane.b32.xlu0 %v11675_v26, %s8739_s2 }
 0xd37   : > { %4711 = vrot.lane.b32.xlu1 %v11676_v27, %s8739_s2 }
 0xd39   : > { %4757 = vrot.lane.b32.xlu0 %v10613_v12, %s8740_s8 }
 0xd3b   : > { %4767 = vrot.lane.b32.xlu1 %v10647_v22, %s8740_s8  ;;  %v4326_v62 = vpop.xlane.xlu1 %4325 }
 0xd3c   : > { %8545 = vrcp.f32 %v4326_v62 }
 0xd3d   : > { %4705 = vrot.lane.b32.xlu0 %v11677_v29, %s8739_s2  ;;  %8547 = vrcp.f32 %v4329_v44  ;;  %v11682_v44 = vld [vmem:[#allocation16_spill] sm:$0xff]  ;;  %v11683_v29 = vld [vmem:[#allocation13_spill] sm:$0xff] }
 0xd3f   : > { %4715 = vrot.lane.b32.xlu1 %v11678_v47, %s8739_s2  ;;  %v4332_v11 = vpop.xlane.xlu1 %4331 }
 0xd40   : > { %8549 = vrcp.f32 %v4332_v11 }
 0xd41   : > { %4761 = vrot.lane.b32.xlu0 %v10607_v54, %s8740_s8  ;;  %v11680_v54 = vld [vmem:[#allocation29_spill] sm:$0xff] }
 0xd45   : > { %4709 = vrot.lane.b32.xlu0 %v11679_v40, %s8739_s2 }
 0xd46   : > { %v8546_v16 = vpop.eup %8545 }
 0xd47   : > { %v4366_v56 = vmul.f32 %v8546_v16, %v10725_v19  ;;  %v8548_v12 = vpop.eup %8547 }
 0xd48   : > { %v4368_v22 = vmul.f32 %v8548_v12, %v10717_v7 }
 0xd49   : > { %4765 = vrot.lane.b32.xlu0 %v10615_v2, %s8740_s8  ;;  %7626 = vmatmul.mubr.msk.f32.gmra.mrb[100].mxu1 %vm1902_vm9, %v4366_v56 }
 0xd4a   : > { %7628 = vmatprep.mubr.msk.f32.mxu1 %vm8727_vm5, %v11663_v21  ;;  %v8550_v30 = vpop.eup %8549 }
 0xd4b   : > { %v4370_v19 = vmul.f32 %v8550_v30, %v10729_v28  ;;  %v11684_v30 = vld [vmem:[#allocation18_spill] sm:$0xff] }
 0xd4d   : > { %4713 = vrot.lane.b32.xlu0 %v11680_v54, %s8739_s2  ;;  %7629 = vmatmul.mubr.msk.f32.gmra.mrb[102].mxu1 %vm1902_vm9, %v4368_v22 }
 0xd4e   : > { %7631 = vmatprep.mubr.msk.f32.mxu1 %vm8727_vm5, %v11663_v21 }
 0xd51   : > { %7632 = vmatmul.mubr.msk.f32.gmra.mrb[104].mxu1 %vm1902_vm9, %v4370_v19 }
 0xd52   : > { %7634 = vmatprep.mubr.msk.f32.mxu1 %vm8727_vm5, %v11663_v21 }
 0xd5f   : > { %v4344_v2 = vpop.xlane.xlu1 %4343 }
 0xd63   : > { %v4335_v23 = vpop.xlane.xlu1 %4334  ;;  %v4347_v14 = vpop.xlane.xlu0 %4346 }
 0xd64   : > { %8551 = vrcp.f32 %v4335_v23  ;;  %v11685_v23 = vld [vmem:[#allocation15_spill] sm:$0xff] }
 0xd67   : > { %v4338_v7 = vpop.xlane.xlu1 %4337 }
 0xd68   : > { %8553 = vrcp.f32 %v4338_v7 }
 0xd69   : > { %8555 = vrcp.f32 %v4344_v2 }
 0xd6b   : > { %v4350_v35 = vpop.xlane.xlu1 %4349 }
 0xd6e   : > { %v8552_v59 = vpop.eup %8551 }
 0xd6f   : > { %v4356_v33 = vpop.xlane.xlu0 %4355  ;;  %v4341_v49 = vpop.xlane.xlu1 %4340  ;;  %v4372_v37 = vmul.f32 %v8552_v59, %v10744_v46 }
 0xd70   : > { %8557 = vrcp.f32 %v4341_v49 }
 0xd71   : > { %8559 = vrcp.f32 %v4347_v14  ;;  %7635 = vmatmul.mubr.msk.f32.gmra.mrb[106].mxu1 %vm1902_vm9, %v4372_v37  ;;  %v11686_v37 = vld [vmem:[#allocation20_spill] sm:$0xff] }
 0xd72   : > { %v8554_v28 = vpop.eup %8553  ;;  %7637 = vmatprep.mubr.msk.f32.mxu1 %vm8727_vm5, %v11663_v21  ;;  %8561 = vrcp.f32 %v4350_v35 }
 0xd73   : > { %v8316_v10 = vpop.permute.xlu0 %8315  ;;  %v4353_v32 = vpop.xlane.xlu1 %4352  ;;  %v4374_v39 = vmul.f32 %v8554_v28, %v10753_v8 }
 0xd74   : > { %v8318_v17 = vunpack.i.h.bf16 %v8316_v10  ;;  %v8317_v52 = vunpack.i.l.bf16 %v8316_v10  ;;  %v8556_v46 = vpop.eup %8555  ;;  %8563 = vrcp.f32 %v4353_v32  ;;  %v11687_v10 = vld [vmem:[#allocation17_spill] sm:$0xff] }
 0xd75   : > { %7638 = vmatmul.mubr.msk.f32.gmra.mrb[108].mxu1 %vm1902_vm9, %v4374_v39  ;;  %v4378_v1 = vmul.f32 %v8556_v46, %v10739_v6  ;;  %8565 = vrcp.f32 %v4356_v33  ;;  %v11688_v46 = vld [vmem:[#allocation19_spill] sm:$0xff] }
 0xd76   : > { %v7974_v41 = vpack.c.bf16 %v8318_v17, %v8317_v52  ;;  %7640 = vmatprep.mubr.msk.f32.mxu1 %vm8727_vm5, %v11663_v21 }
 0xd77   : > { %v4359_v48 = vpop.xlane.xlu1 %4358 }
 0xd78   : > { %7975 = vmatpush3.bf16.msra.mxu0 %v7974_v41  ;;  %8567 = vrcp.f32 %v4359_v48 }
 0xd79   : > { %7655 = vmatprep.subr.mxu0 %v11663_v21 }
 0xd7a   : > { %v8558_v42 = vpop.eup %8557 }
 0xd7b   : > { %v4546_v60 = vpop.permute.xlu1 %4545  ;;  %v8560_v8 = vpop.eup %8559  ;;  %v4376_v3 = vmul.f32 %v8558_v42, %v10762_v63 }
 0xd7c   : > { %7656 = vmatpush3.msra.mxu0 %v4546_v60  ;;  %v4380_v34 = vmul.f32 %v8560_v8, %v10747_v18  ;;  %v8562_v45 = vpop.eup %8561 }
 0xd7d   : > { %7658 = vmatmul.mubr.msk.f32.vlgmr.msra.gmra.mrb[112].mxu0 %vm1902_vm9, %v4378_v1  ;;  %7641 = vmatmul.mubr.msk.f32.gmra.mrb[110].mxu1 %vm1902_vm9, %v4376_v3  ;;  %v4382_v63 = vmul.f32 %v8562_v45, %v10758_v50  ;;  %v4888_v45 = vld [vmem:[%s8903_s26 + $0x8] sm:$0xff] }
 0xd7e   : > { %7660 = vmatprep.mubr.msk.f32.mxu0 %vm8727_vm5, %v11663_v21  ;;  %v8564_v15 = vpop.eup %8563 }
 0xd7f   : > { %v10872_v53 = vpop.permute.xlu1 %4689  ;;  %v4384_v18 = vmul.f32 %v8564_v15, %v10771_v55  ;;  %v8566_v0 = vpop.eup %8565 }
 0xd80   : > { %v4386_v50 = vmul.f32 %v8566_v0, %v10765_v38 }
 0xd81   : > { %7661 = vmatmul.mubr.msk.f32.gmra.mrb[114].mxu0 %vm1902_vm9, %v4380_v34  ;;  %v4887_v34 = vld [vmem:[%s8903_s26] sm:$0xff] }
 0xd82   : > { %7663 = vmatprep.mubr.msk.f32.mxu0 %vm8727_vm5, %v11663_v21  ;;  %v8568_v36 = vpop.eup %8567  ;;  %v7976_v15 = vpack.c.bf16 %v4888_v45, %v4887_v34 }
 0xd83   : > { %v10878_v6 = vpop.permute.xlu1 %4691  ;;  %v4388_v55 = vmul.f32 %v8568_v36, %v10775_v31 }
 0xd84   : > { %7977 = vmatprep.subr.bf16.mxu0 %v7976_v15  ;;  %8024 = vmatprep.subr.bf16.mxu1 %v7976_v15 }
 0xd85   : > { %7664 = vmatmul.mubr.msk.f32.gmra.mrb[116].mxu0 %vm1902_vm9, %v4382_v63  ;;  %v4889_v63 = vld [vmem:[%s8903_s26 + $0x10] sm:$0xff]  ;;  %8026 = vmatpush3.bf16.msra.mxu1 %v7976_v15 }
 0xd86   : > { %7666 = vmatprep.mubr.msk.f32.mxu0 %vm8727_vm5, %v11663_v21  ;;  %7979 = vmatpush3.bf16.msra.mxu0 %v7976_v15 }
 0xd87   : > { %v10884_v4 = vpop.permute.xlu1 %4745 }
 0xd89   : > { %7667 = vmatmul.mubr.msk.f32.gmra.mrb[118].mxu0 %vm1902_vm9, %v4384_v18  ;;  %v4890_v18 = vld [vmem:[%s8903_s26 + $0x18] sm:$0xff] }
 0xd8a   : > { %7669 = vmatprep.mubr.msk.f32.mxu0 %vm8727_vm5, %v11663_v21  ;;  %v7980_v0 = vpack.c.bf16 %v4890_v18, %v4889_v63 }
 0xd8b   : > { %v10890_v13 = vpop.permute.xlu1 %4747 }
 0xd8c   : > { %7981 = vmatprep.subr.bf16.mxu0 %v7980_v0  ;;  %8025 = vmatprep.subr.bf16.mxu1 %v7980_v0 }
 0xd8d   : > { %7670 = vmatmul.mubr.msk.f32.gmra.mrb[120].mxu0 %vm1902_vm9, %v4386_v50  ;;  %8027 = vmatpush3.bf16.msra.mxu1 %v7980_v0 }
 0xd8e   : > { %7672 = vmatprep.mubr.msk.f32.mxu0 %vm8727_vm5, %v11663_v21  ;;  %7983 = vmatpush3.bf16.msra.mxu0 %v7980_v0 }
 0xd8f   : > { %v10896_v9 = vpop.permute.xlu1 %4693 }
 0xd91   : > { %7673 = vmatmul.mubr.msk.f32.gmra.mrb[122].mxu0 %vm1902_vm9, %v4388_v55 }
 0xd92   : > { %7675 = vmatprep.mubr.msk.f32.mxu0 %vm8727_vm5, %v11663_v21 }
 0xd93   : > { %v10902_v57 = vpop.permute.xlu1 %4695 }
 0xd97   : > { %v10904_v5 = vpop.permute.xlu1 %4749 }
 0xd9b   : > { %v10906_v38 = vpop.permute.xlu1 %4751 }
 0xd9f   : > { %v4700_v61 = vpop.permute.xlu1 %4699 }
 0xda0   : > { %v4848_v51 = vsel %vm1594_vm6, %v11681_v58, %v4700_v61 }
 0xda3   : > { %v4756_v20 = vpop.permute.xlu1 %4755 }
 0xda4   : > { %v10911_v26 = vsel %vm4857_vm10, %v4848_v51, %v4756_v20  ;;  %v4362_v31 = vpop.xlane.xlu0 %4361 }
 0xda5   : > { %8569 = vrcp.f32 %v4362_v31 }
 0xda7   : > { %v4704_v27 = vpop.permute.xlu1 %4703 }
 0xda8   : > { %v4850_v21 = vsel %vm1594_vm6, %v11682_v44, %v4704_v27  ;;  %v4698_v62 = vpop.permute.xlu0 %4697 }
 0xda9   : > { %v4847_v47 = vsel %vm1594_vm6, %v11683_v29, %v4698_v62 }
 0xdab   : > { %v4760_v11 = vpop.permute.xlu1 %4759 }
 0xdac   : > { %v10918_v40 = vsel %vm4857_vm10, %v4850_v21, %v4760_v11  ;;  %v4754_v16 = vpop.permute.xlu0 %4753 }
 0xdad   : > { %v10921_v56 = vsel %vm4857_vm10, %v4847_v47, %v4754_v16 }
 0xdaf   : > { %v8570_v12 = vpop.eup %8569  ;;  %v4708_v22 = vpop.permute.xlu1 %4707 }
 0xdb0   : > { %v4852_v54 = vsel %vm1594_vm6, %v11684_v30, %v4708_v22  ;;  %v4702_v19 = vpop.permute.xlu0 %4701  ;;  %v4390_v2 = vmul.f32 %v8570_v12, %v10797_v43 }
 0xdb1   : > { %v4849_v7 = vsel %vm1594_vm6, %v11685_v23, %v4702_v19 }
 0xdb2   : > { %7676 = vmatmul.mubr.msk.f32.gmra.mrb[124].mxu0 %vm1902_vm9, %v4390_v2  ;;  %v11689_v2 = vld [vmem:[#allocation9_spill] sm:$0xff] }
 0xdb3   : > { %v4764_v14 = vpop.permute.xlu1 %4763  ;;  %v4843_v23 = vsel %vm1594_vm6, %v11689_v2, %v10872_v53 }
 0xdb4   : > { %v10930_v35 = vsel %vm4857_vm10, %v4852_v54, %v4764_v14  ;;  %v4758_v59 = vpop.permute.xlu0 %4757 }
 0xdb5   : > { %v10933_v33 = vsel %vm4857_vm10, %v4849_v7, %v4758_v59  ;;  %v4858_v7 = vsel %vm4857_vm10, %v4843_v23, %v10884_v4 }
 0xdb7   : > { %v4712_v49 = vpop.permute.xlu1 %4711 }
 0xdb8   : > { %v4854_v28 = vsel %vm1594_vm6, %v11686_v37, %v4712_v49  ;;  %v4706_v43 = vpop.permute.xlu0 %4705 }
 0xdb9   : > { %v4851_v32 = vsel %vm1594_vm6, %v11687_v10, %v4706_v43  ;;  %v11690_v43 = vld [vmem:[#allocation10_spill] sm:$0xff] }
 0xdba   : > { %v4844_v10 = vsel %vm1594_vm6, %v11690_v43, %v10878_v6  ;;  %v11692_v6 = vld [vmem:[#allocation12_spill] sm:$0xff] }
 0xdbb   : > { %v4768_v39 = vpop.permute.xlu1 %4767 }
 0xdbc   : > { %v10940_v17 = vsel %vm4857_vm10, %v4854_v28, %v4768_v39  ;;  %v4762_v52 = vpop.permute.xlu0 %4761 }
 0xdbd   : > { %v10943_v41 = vsel %vm4857_vm10, %v4851_v32, %v4762_v52  ;;  %v4859_v32 = vsel %vm4857_vm10, %v4844_v10, %v10890_v13  ;;  %v4846_v13 = vsel %vm1594_vm6, %v11692_v6, %v10902_v57  ;;  %v8659_v10 = vld [vmem:[#allocation2 + $0x28] sm:$0xff]  ;;  %v8661_v6 = vld [vmem:[#allocation2 + $0x38] sm:$0xff] }
 0xdbf   : > { %v4716_v4 = vpop.permute.xlu1 %4715 }
 0xdc0   : > { %v4710_v48 = vpop.permute.xlu0 %4709 }
 0xdc1   : > { %v4853_v42 = vsel %vm1594_vm6, %v11688_v46, %v4710_v48  ;;  %v11691_v48 = vld [vmem:[#allocation11_spill] sm:$0xff] }
 0xdc2   : > { %v4845_v46 = vsel %vm1594_vm6, %v11691_v48, %v10896_v9 }
 0xdc4   : > { %v4766_v1 = vpop.permute.xlu0 %4765 }
 0xdc5   : > { %v10948_v60 = vsel %vm4857_vm10, %v4853_v42, %v4766_v1  ;;  %v4860_v42 = vsel %vm4857_vm10, %v4845_v46, %v10904_v5 }
 0xdc8   : > { %v10965_v30 = vpop.permute.xlu0 %4713 }
 0xdec   : > { %v4499_v8 = vpop.f32.mrb[98].mxu1 }
 0xded   : > { %4801 = vrot.lane.b32.xlu0 %v4499_v8, %s8741_s3  ;;  %v7624_v3 = vpop.f32.mrb[99].mxu1 }
 0xdee   : > { %v4861_v3 = vsel %vm4857_vm10, %v4846_v13, %v10906_v38 }
 0xe1c   : > { %v4504_v50 = vpop.f32.mrb[100].mxu1 }
 0xe1d   : > { %4803 = vrot.lane.b32.xlu1 %v4504_v50, %s8741_s3  ;;  %v7627_v36 = vpop.f32.mrb[101].mxu1 }
 0xe20   : > { %v4509_v55 = vpop.f32.mrb[102].mxu1 }
 0xe21   : > { %4805 = vrot.lane.b32.xlu0 %v4509_v55, %s8741_s3  ;;  %v7630_v61 = vpop.f32.mrb[103].mxu1 }
 0xe24   : > { %v4514_v58 = vpop.f32.mrb[104].mxu1 }
 0xe25   : > { %4807 = vrot.lane.b32.xlu1 %v4514_v58, %s8741_s3  ;;  %v7633_v51 = vpop.f32.mrb[105].mxu1 }
 0xe26   : > { %v11693_v51 = vld [vmem:[#allocation21_spill] sm:$0xff] }
 0xe44   : > { %v4519_v20 = vpop.f32.mrb[106].mxu1 }
 0xe45   : > { %4809 = vrot.lane.b32.xlu0 %v4519_v20, %s8741_s3  ;;  %v7636_v31 = vpop.f32.mrb[107].mxu1  ;;  %v4855_v20 = vsel %vm1594_vm6, %v11693_v51, %v10965_v30 }
 0xe48   : > { %v4524_v27 = vpop.f32.mrb[108].mxu1 }
 0xe49   : > { %v7639_v44 = vpop.f32.mrb[109].mxu1 }
 0xe50   : > { %v4641_v21 = vpop.f32.mrb[112].mxu0  ;;  %v4529_v62 = vpop.f32.mrb[110].mxu1 }
 0xe51   : > { %v7659_v29 = vpop.f32.mrb[113].mxu0  ;;  %4815 = vrot.lane.b32.xlu1 %v4641_v21, %s8741_s3  ;;  %v7642_v47 = vpop.f32.mrb[111].mxu1 }
 0xe52   : > { %v11042_v47 = vld [vmem:[%s11695_s23] ss:$0 sm:$0xff] }
 0xe54   : > { %v4646_v11 = vpop.f32.mrb[114].mxu0 }
 0xe55   : > { %v7662_v16 = vpop.f32.mrb[115].mxu0  ;;  %4817 = vrot.lane.b32.xlu0 %v4646_v11, %s8741_s3  ;;  %4811 = vrot.lane.b32.xlu1 %v4524_v27, %s8741_s3  ;;  %v8655_v11 = vld [vmem:[#allocation2 + $0x8] sm:$0xff] }
 0xe58   : > { %v4651_v12 = vpop.f32.mrb[116].mxu0 }
 0xe59   : > { %v7665_v22 = vpop.f32.mrb[117].mxu0  ;;  %4771 = vrot.lane.b32.xlu1 %v10663_v24, %s8740_s8  ;;  %4813 = vrot.lane.b32.xlu0 %v4529_v62, %s8741_s3 }
 0xe5a   : > { %v8656_v22 = vld [vmem:[#allocation2] sm:$0xff] }
 0xe5c   : > { %v4656_v54 = vpop.f32.mrb[118].mxu0 }
 0xe5d   : > { %v7668_v19 = vpop.f32.mrb[119].mxu0  ;;  %4819 = vrot.lane.b32.xlu1 %v4651_v12, %s8741_s3  ;;  %4769 = vrot.lane.b32.xlu0 %v10655_v25, %s8740_s8 }
 0xe5f   : > { %v4802_v24 = vpop.permute.xlu0 %4801 }
 0xe60   : > { %v4873_v14 = vsel %vm4872_vm11, %v4858_v7, %v4802_v24  ;;  %v4661_v59 = vpop.f32.mrb[120].mxu0 }
 0xe61   : > { %7686 = vmatprep.mubr.msk.f32.mxu0 %vm1165_vm4, %v4873_v14  ;;  %v7671_v49 = vpop.f32.mrb[121].mxu0  ;;  %4823 = vrot.lane.b32.xlu1 %v4661_v59, %s8741_s3  ;;  %v8657_v14 = vld [vmem:[#allocation2 + $0x18] sm:$0xff] }
 0xe62   : > { %4821 = vrot.lane.b32.xlu0 %v4656_v54, %s8741_s3  ;;  %v8658_v49 = vld [vmem:[#allocation2 + $0x10] sm:$0xff] }
 0xe64   : > { %v4666_v25 = vpop.f32.mrb[122].mxu0 }
 0xe65   : > { %v7674_v37 = vpop.f32.mrb[123].mxu0 }
 0xe66   : > { %4825 = vrot.lane.b32.xlu0 %v4666_v25, %s8741_s3 }
 0xe85   : > { %v4671_v28 = vpop.f32.mrb[124].mxu0 }
 0xe86   : > { %v7677_v53 = vpop.f32.mrb[125].mxu0  ;;  %4827 = vrot.lane.b32.xlu1 %v4671_v28, %s8741_s3 }
 0xe8f   : > { %v4804_v39 = vpop.permute.xlu1 %4803 }
 0xe90   : > { %v4874_v52 = vsel %vm4872_vm11, %v4859_v32, %v4804_v39 }
 0xe91   : > { %7687 = vmatmul.mubr.msk.f32.vlgmr.msra.gmra.mrb[126].mxu0 %vm1165_vm4, %v4874_v52  ;;  %v8660_v52 = vld [vmem:[#allocation2 + $0x20] sm:$0xff] }
 0xe93   : > { %v4806_v1 = vpop.permute.xlu0 %4805 }
 0xe94   : > { %v4875_v8 = vsel %vm4872_vm11, %v4860_v42, %v4806_v1 }
 0xe95   : > { %7689 = vmatprep.mubr.msk.f32.mxu0 %vm1165_vm4, %v4875_v8 }
 0xe97   : > { %v4808_v34 = vpop.permute.xlu1 %4807 }
 0xe98   : > { %v4876_v45 = vsel %vm4872_vm11, %v4861_v3, %v4808_v34 }
 0xe99   : > { %7690 = vmatmul.mubr.msk.f32.gmra.mrb[128].mxu0 %vm1165_vm4, %v4876_v45  ;;  %v8662_v45 = vld [vmem:[#allocation2 + $0x30] sm:$0xff] }
 0xeb7   : > { %v4810_v9 = vpop.permute.xlu0 %4809 }
 0xeb8   : > { %v4877_v5 = vsel %vm4872_vm11, %v10921_v56, %v4810_v9 }
 0xeb9   : > { %7692 = vmatprep.mubr.msk.f32.mxu0 %vm1165_vm4, %v4877_v5 }
 0xec3   : > { %v4816_v63 = vpop.permute.xlu1 %4815 }
 0xec4   : > { %v4880_v36 = vsel %vm4872_vm11, %v10918_v40, %v4816_v63 }
 0xec7   : > { %v4818_v15 = vpop.permute.xlu0 %4817  ;;  %v4812_v18 = vpop.permute.xlu1 %4811 }
 0xec8   : > { %v4878_v57 = vsel %vm4872_vm11, %v10911_v26, %v4812_v18  ;;  %v4881_v56 = vsel %vm4872_vm11, %v10943_v41, %v4818_v15  ;;  %v8663_v18 = vld [vmem:[#allocation2 + $0x48] sm:$0xff] }
 0xec9   : > { %7693 = vmatmul.mubr.msk.f32.gmra.mrb[130].mxu0 %vm1165_vm4, %v4878_v57 }
 0xecb   : > { %v4772_v38 = vpop.permute.xlu1 %4771  ;;  %v4814_v0 = vpop.permute.xlu0 %4813 }
 0xecc   : > { %v4879_v50 = vsel %vm4872_vm11, %v10933_v33, %v4814_v0 }
 0xecd   : > { %7695 = vmatprep.mubr.msk.f32.mxu1 %vm1165_vm4, %v4879_v50  ;;  %v8664_v50 = vld [vmem:[#allocation2 + $0x40] sm:$0xff] }
 0xece   : > { %7696 = vmatmul.mubr.msk.f32.vlgmr.msra.gmra.mrb[112].mxu1 %vm1165_vm4, %v4880_v36 }
 0xecf   : > { %v4820_v55 = vpop.permute.xlu1 %4819  ;;  %7698 = vmatprep.mubr.msk.f32.mxu1 %vm1165_vm4, %v4881_v56  ;;  %v4770_v26 = vpop.permute.xlu0 %4769 }
 0xed0   : > { %v4882_v61 = vsel %vm4872_vm11, %v10930_v35, %v4820_v55  ;;  %v4870_v35 = vsel %vm4857_vm10, %v4855_v20, %v4770_v26  ;;  %v8666_v20 = vld [vmem:[#allocation2 + $0x50] sm:$0xff] }
 0xed2   : > { %7699 = vmatmul.mubr.msk.f32.gmra.mrb[114].mxu1 %vm1165_vm4, %v4882_v61 }
 0xed3   : > { %v4824_v33 = vpop.permute.xlu1 %4823 }
 0xed4   : > { %v4884_v40 = vsel %vm4872_vm11, %v10940_v17, %v4824_v33  ;;  %v4822_v58 = vpop.permute.xlu0 %4821  ;;  %v11694_v17 = vld [vmem:[#allocation22_spill] sm:$0xff] }
 0xed5   : > { %v4883_v41 = vsel %vm4872_vm11, %v10948_v60, %v4822_v58  ;;  %v4856_v44 = vsel %vm1594_vm6, %v11694_v17, %v4716_v4 }
 0xed6   : > { %7701 = vmatprep.mubr.msk.f32.mxu1 %vm1165_vm4, %v4883_v41  ;;  %v4871_v60 = vsel %vm4857_vm10, %v4856_v44, %v4772_v38 }
 0xed7   : > { %7702 = vmatmul.mubr.msk.f32.gmra.mrb[116].mxu1 %vm1165_vm4, %v4884_v40  ;;  %v8665_v40 = vld [vmem:[#allocation2 + $0x58] sm:$0xff] }
 0xed8   : > { %v4826_v31 = vpop.permute.xlu0 %4825 }
 0xed9   : > { %v4885_v27 = vsel %vm4872_vm11, %v4870_v35, %v4826_v31 }
 0xeda   : > { %7704 = vmatprep.mubr.msk.f32.mxu1 %vm1165_vm4, %v4885_v27 }
 0xef8   : > { %v4828_v21 = vpop.permute.xlu1 %4827 }
 0xef9   : > { %v4886_v62 = vsel %vm4872_vm11, %v4871_v60, %v4828_v21  ;;  %v8667_v21 = vld [vmem:[#allocation2 + $0x68] sm:$0xff] }
 0xefa   : > { %7705 = vmatmul.mubr.msk.f32.gmra.mrb[118].mxu1 %vm1165_vm4, %v4886_v62 }
 0xf64   : > { %v7688_v29 = vpop.f32.mrb[126].mxu0 }
 0xf65   : > { %v5069_v16 = vadd.f32 %v8655_v11, %v7688_v29  ;;  %v4999_v12 = vpop.f32.mrb[127].mxu0  ;;  %v8668_v11 = vld [vmem:[#allocation2 + $0x60] sm:$0xff] }
 0xf66   : > { %v5068_v30 = vadd.f32 %v8656_v22, %v4999_v12 }
 0xf67   : > { %v11045_v54 = vadd.f32 %v11042_v47, %v5069_v16 }
 0xf68   : > { %v11048_v19 = vadd.f32 %v11042_v47, %v5068_v30 }
 0xf69   : > { %v5108_v2 = vsel %vm1165_vm4, %v11045_v54, 0.0 }
 0xf6a   : > { %5109 = vadd.xlane.f32.xlu1 %v5108_v2  ;;  %v5105_v23 = vsel %vm1165_vm4, %v11048_v19, 0.0 }
 0xf6b   : > { %5106 = vadd.xlane.f32.xlu0 %v5105_v23 }
 0xf6c   : > { %v7691_v7 = vpop.f32.mrb[128].mxu0 }
 0xf6d   : > { %v5009_v24 = vpop.f32.mrb[129].mxu0  ;;  %v5071_v59 = vadd.f32 %v8657_v14, %v7691_v7 }
 0xf6e   : > { %v5070_v25 = vadd.f32 %v8658_v49, %v5009_v24 }
 0xf6f   : > { %v11058_v28 = vadd.f32 %v11042_v47, %v5071_v59 }
 0xf70   : > { %v11055_v37 = vadd.f32 %v11042_v47, %v5070_v25 }
 0xf71   : > { %v5114_v4 = vsel %vm1165_vm4, %v11058_v28, 0.0 }
 0xf72   : > { %v5111_v53 = vsel %vm1165_vm4, %v11055_v37, 0.0 }
 0xf73   : > { %5112 = vadd.xlane.f32.xlu0 %v5111_v53 }
 0xf77   : > { %5115 = vadd.xlane.f32.xlu0 %v5114_v4 }
 0xf9c   : > { %v7694_v43 = vpop.f32.mrb[130].mxu0 }
 0xf9d   : > { %v5073_v32 = vadd.f32 %v8659_v10, %v7694_v43  ;;  %v5019_v39 = vpop.f32.mrb[131].mxu0 }
 0xf9e   : > { %v5072_v48 = vadd.f32 %v8660_v52, %v5019_v39 }
 0xf9f   : > { %v11065_v46 = vadd.f32 %v11042_v47, %v5073_v32 }
 0xfa0   : > { %v11068_v42 = vadd.f32 %v11042_v47, %v5072_v48 }
 0xfa1   : > { %v7697_v1 = vpop.f32.mrb[112].mxu1  ;;  %v5120_v8 = vsel %vm1165_vm4, %v11065_v46, 0.0 }
 0xfa2   : > { %v5075_v13 = vadd.f32 %v8661_v6, %v7697_v1  ;;  %5121 = vadd.xlane.f32.xlu0 %v5120_v8  ;;  %v5029_v3 = vpop.f32.mrb[113].mxu1  ;;  %v5117_v34 = vsel %vm1165_vm4, %v11068_v42, 0.0 }
 0xfa3   : > { %v5074_v9 = vadd.f32 %v8662_v45, %v5029_v3  ;;  %5118 = vadd.xlane.f32.xlu1 %v5117_v34  ;;  %v5327_v3 = vld [vmem:[%s8916_s24] sm:$0xff]  ;;  %v5328_v34 = vld [vmem:[%s8916_s24 + $0x8] sm:$0xff] }
 0xfa4   : > { %v11075_v5 = vadd.f32 %v11042_v47, %v5075_v13  ;;  %v7984_v45 = vpack.c.bf16 %v5328_v34, %v5327_v3 }
 0xfa5   : > { %v11078_v63 = vadd.f32 %v11042_v47, %v5074_v9  ;;  %v7700_v15 = vpop.f32.mrb[114].mxu1  ;;  %v5329_v9 = vld [vmem:[%s8916_s24 + $0x10] sm:$0xff] }
 0xfa6   : > { %v5077_v57 = vadd.f32 %v8663_v18, %v7700_v15  ;;  %v5039_v38 = vpop.f32.mrb[115].mxu1  ;;  %v5126_v0 = vsel %vm1165_vm4, %v11075_v5, 0.0  ;;  %7985 = vmatprep.subr.bf16.mxu0 %v7984_v45  ;;  %v5330_v15 = vld [vmem:[%s8916_s24 + $0x18] sm:$0xff] }
 0xfa7   : > { %v5076_v36 = vadd.f32 %v8664_v50, %v5039_v38  ;;  %5127 = vadd.xlane.f32.xlu0 %v5126_v0  ;;  %v5123_v56 = vsel %vm1165_vm4, %v11078_v63, 0.0  ;;  %7987 = vmatpush3.bf16.msra.mxu0 %v7984_v45  ;;  %v7988_v18 = vpack.c.bf16 %v5330_v15, %v5329_v9 }
 0xfa8   : > { %v11085_v55 = vadd.f32 %v11042_v47, %v5077_v57  ;;  %5124 = vadd.xlane.f32.xlu1 %v5123_v56 }
 0xfa9   : > { %v11088_v26 = vadd.f32 %v11042_v47, %v5076_v36  ;;  %7989 = vmatprep.subr.bf16.mxu0 %v7988_v18 }
 0xfaa   : > { %v7703_v61 = vpop.f32.mrb[116].mxu1  ;;  %v5132_v33 = vsel %vm1165_vm4, %v11085_v55, 0.0 }
 0xfab   : > { %v5079_v58 = vadd.f32 %v8665_v40, %v7703_v61  ;;  %v5049_v41 = vpop.f32.mrb[117].mxu1  ;;  %5133 = vadd.xlane.f32.xlu0 %v5132_v33  ;;  %v5129_v51 = vsel %vm1165_vm4, %v11088_v26, 0.0  ;;  %7991 = vmatpush3.bf16.msra.mxu0 %v7988_v18 }
 0xfac   : > { %v5078_v35 = vadd.f32 %v8666_v20, %v5049_v41  ;;  %5130 = vadd.xlane.f32.xlu1 %v5129_v51 }
 0xfad   : > { %v11095_v31 = vadd.f32 %v11042_v47, %v5079_v58 }
 0xfae   : > { %v11098_v27 = vadd.f32 %v11042_v47, %v5078_v35 }
 0xfaf   : > { %v5138_v17 = vsel %vm1165_vm4, %v11095_v31, 0.0 }
 0xfb0   : > { %5139 = vadd.xlane.f32.xlu0 %v5138_v17  ;;  %v5135_v44 = vsel %vm1165_vm4, %v11098_v27, 0.0 }
 0xfb1   : > { %5136 = vadd.xlane.f32.xlu1 %v5135_v44 }
 0xfcd   : > { %v7706_v60 = vpop.f32.mrb[118].mxu1 }
 0xfce   : > { %v5081_v62 = vadd.f32 %v8667_v21, %v7706_v60  ;;  %v5059_v29 = vpop.f32.mrb[119].mxu1 }
 0xfcf   : > { %v5080_v16 = vadd.f32 %v8668_v11, %v5059_v29 }
 0xfd0   : > { %v11105_v12 = vadd.f32 %v11042_v47, %v5081_v62 }
 0xfd1   : > { %v11108_v22 = vadd.f32 %v11042_v47, %v5080_v16 }
 0xfd2   : > { %v5144_v30 = vsel %vm1165_vm4, %v11105_v12, 0.0 }
 0xfd3   : > { %5145 = vadd.xlane.f32.xlu0 %v5144_v30  ;;  %v5141_v2 = vsel %vm1165_vm4, %v11108_v22, 0.0 }
 0xfd4   : > { %5142 = vadd.xlane.f32.xlu1 %v5141_v2 }
 0xff7   : > { %v5110_v23 = vpop.xlane.xlu1 %5109 }
 0xff8   : > { %v5148_v7 = vmul.f32 0.03125, %v5110_v23  ;;  %v5107_v24 = vpop.xlane.xlu0 %5106 }
 0xff9   : > { %v5147_v14 = vmul.f32 0.03125, %v5107_v24 }
 0xffa   : > { %v11115_v59 = vsub.f32 %v11045_v54, %v5148_v7 }
 0xffb   : > { %v11118_v49 = vsub.f32 %v11048_v19, %v5147_v14 }
 0xffc   : > { %v5176_v47 = vmul.f32 %v11115_v59, %v11115_v59 }
 0xffd   : > { %v5175_v25 = vmul.f32 %v11118_v49, %v11118_v49 }
 0xffe   : > { %v5192_v53 = vsel %vm1165_vm4, %v5176_v47, 0.0 }
 0xfff   : > { %5193 = vadd.xlane.f32.xlu0 %v5192_v53  ;;  %v5189_v4 = vsel %vm1165_vm4, %v5175_v25, 0.0 }
0x1000   : > { %v5113_v43 = vpop.xlane.xlu0 %5112  ;;  %5190 = vadd.xlane.f32.xlu1 %v5189_v4 }
0x1001   : > { %v5149_v10 = vmul.f32 0.03125, %v5113_v43 }
0x1003   : > { %v11127_v32 = vsub.f32 %v11055_v37, %v5149_v10 }
0x1004   : > { %v5116_v39 = vpop.xlane.xlu0 %5115 }
0x1005   : > { %v5150_v52 = vmul.f32 0.03125, %v5116_v39  ;;  %v5177_v48 = vmul.f32 %v11127_v32, %v11127_v32 }
0x1007   : > { %v11132_v1 = vsub.f32 %v11058_v28, %v5150_v52  ;;  %v5195_v8 = vsel %vm1165_vm4, %v5177_v48, 0.0 }
0x1008   : > { %5196 = vadd.xlane.f32.xlu1 %v5195_v8 }
0x1009   : > { %v5178_v6 = vmul.f32 %v11132_v1, %v11132_v1 }
0x100b   : > { %v5198_v13 = vsel %vm1165_vm4, %v5178_v6, 0.0 }
0x100c   : > { %5199 = vadd.xlane.f32.xlu0 %v5198_v13 }
0x102f   : > { %v5122_v57 = vpop.xlane.xlu0 %5121 }
0x1030   : > { %v5152_v38 = vmul.f32 0.03125, %v5122_v57  ;;  %v5119_v0 = vpop.xlane.xlu1 %5118 }
0x1031   : > { %v5151_v50 = vmul.f32 0.03125, %v5119_v0 }
0x1032   : > { %v11143_v36 = vsub.f32 %v11065_v46, %v5152_v38 }
0x1033   : > { %v11146_v56 = vsub.f32 %v11068_v42, %v5151_v50 }
0x1034   : > { %v5128_v61 = vpop.xlane.xlu0 %5127  ;;  %v5180_v33 = vmul.f32 %v11143_v36, %v11143_v36 }
0x1035   : > { %v5154_v40 = vmul.f32 0.03125, %v5128_v61  ;;  %v5125_v58 = vpop.xlane.xlu1 %5124  ;;  %v5179_v41 = vmul.f32 %v11146_v56, %v11146_v56 }
0x1036   : > { %v5153_v51 = vmul.f32 0.03125, %v5125_v58  ;;  %v5204_v20 = vsel %vm1165_vm4, %v5180_v33, 0.0 }
0x1037   : > { %v11154_v35 = vsub.f32 %v11075_v5, %v5154_v40  ;;  %5205 = vadd.xlane.f32.xlu0 %v5204_v20  ;;  %v5201_v17 = vsel %vm1165_vm4, %v5179_v41, 0.0 }
0x1038   : > { %v11158_v44 = vsub.f32 %v11078_v63, %v5153_v51  ;;  %v5134_v60 = vpop.xlane.xlu0 %5133  ;;  %5202 = vadd.xlane.f32.xlu1 %v5201_v17 }
0x1039   : > { %v5156_v21 = vmul.f32 0.03125, %v5134_v60  ;;  %v5131_v62 = vpop.xlane.xlu1 %5130  ;;  %v5182_v29 = vmul.f32 %v11154_v35, %v11154_v35 }
0x103a   : > { %v5155_v11 = vmul.f32 0.03125, %v5131_v62  ;;  %v5181_v16 = vmul.f32 %v11158_v44, %v11158_v44 }
0x103b   : > { %v11165_v30 = vsub.f32 %v11085_v55, %v5156_v21  ;;  %v5210_v2 = vsel %vm1165_vm4, %v5182_v29, 0.0 }
0x103c   : > { %v11169_v23 = vsub.f32 %v11088_v26, %v5155_v11  ;;  %5211 = vadd.xlane.f32.xlu0 %v5210_v2  ;;  %v5207_v7 = vsel %vm1165_vm4, %v5181_v16, 0.0  ;;  %v11207_v11 = vld [vmem:[%s11696_s4] ss:$0 sm:$0xff] }
0x103d   : > { %v5140_v24 = vpop.xlane.xlu0 %5139  ;;  %5208 = vadd.xlane.f32.xlu1 %v5207_v7  ;;  %v5184_v14 = vmul.f32 %v11165_v30, %v11165_v30 }
0x103e   : > { %v5158_v47 = vmul.f32 0.03125, %v5140_v24  ;;  %v5137_v25 = vpop.xlane.xlu1 %5136  ;;  %v5183_v53 = vmul.f32 %v11169_v23, %v11169_v23 }
0x103f   : > { %v5157_v4 = vmul.f32 0.03125, %v5137_v25  ;;  %v5216_v43 = vsel %vm1165_vm4, %v5184_v14, 0.0  ;;  %v11216_v14 = vld [vmem:[%s799_s17] ss:$0 sm:$0xff] }
0x1040   : > { %v11178_v10 = vsub.f32 %v11095_v31, %v5158_v47  ;;  %5217 = vadd.xlane.f32.xlu0 %v5216_v43  ;;  %v5213_v39 = vsel %vm1165_vm4, %v5183_v53, 0.0 }
0x1041   : > { %v11182_v52 = vsub.f32 %v11098_v27, %v5157_v4  ;;  %5214 = vadd.xlane.f32.xlu1 %v5213_v39 }
0x1042   : > { %v5186_v48 = vmul.f32 %v11178_v10, %v11178_v10 }
0x1043   : > { %v5185_v8 = vmul.f32 %v11182_v52, %v11182_v52 }
0x1044   : > { %v5222_v6 = vsel %vm1165_vm4, %v5186_v48, 0.0 }
0x1045   : > { %5223 = vadd.xlane.f32.xlu0 %v5222_v6  ;;  %v5219_v13 = vsel %vm1165_vm4, %v5185_v8, 0.0 }
0x1046   : > { %5220 = vadd.xlane.f32.xlu1 %v5219_v13 }
0x1060   : > { %v5146_v3 = vpop.xlane.xlu0 %5145 }
0x1061   : > { %v5160_v34 = vmul.f32 0.03125, %v5146_v3  ;;  %v5143_v45 = vpop.xlane.xlu1 %5142 }
0x1062   : > { %v5159_v9 = vmul.f32 0.03125, %v5143_v45 }
0x1063   : > { %v11191_v15 = vsub.f32 %v11105_v12, %v5160_v34 }
0x1064   : > { %v11194_v18 = vsub.f32 %v11108_v22, %v5159_v9 }
0x1065   : > { %v5188_v57 = vmul.f32 %v11191_v15, %v11191_v15 }
0x1066   : > { %v5187_v38 = vmul.f32 %v11194_v18, %v11194_v18 }
0x1067   : > { %v5228_v0 = vsel %vm1165_vm4, %v5188_v57, 0.0 }
0x1068   : > { %5229 = vadd.xlane.f32.xlu0 %v5228_v0  ;;  %v5225_v50 = vsel %vm1165_vm4, %v5187_v38, 0.0 }
0x1069   : > { %5226 = vadd.xlane.f32.xlu1 %v5225_v50 }
0x108c   : > { %v5194_v61 = vpop.xlane.xlu0 %5193 }
0x108d   : > { %v5232_v33 = vmul.f32 0.03125, %v5194_v61  ;;  %v5191_v40 = vpop.xlane.xlu1 %5190 }
0x108e   : > { %v5231_v58 = vmul.f32 0.03125, %v5191_v40 }
0x108f   : > { %v5246_v41 = vadd.f32 1e-05, %v5232_v33 }
0x1090   : > { %v5245_v51 = vadd.f32 1e-05, %v5231_v58 }
0x1091   : > { %8571 = vrsqrt.f32 %v5246_v41 }
0x1092   : > { %8573 = vrsqrt.f32 %v5245_v51 }
0x1095   : > { %v5197_v20 = vpop.xlane.xlu1 %5196 }
0x1096   : > { %v5233_v17 = vmul.f32 0.03125, %v5197_v20 }
0x1098   : > { %v5247_v60 = vadd.f32 1e-05, %v5233_v17 }
0x1099   : > { %v5200_v21 = vpop.xlane.xlu0 %5199 }
0x109a   : > { %8575 = vrsqrt.f32 %v5247_v60  ;;  %v5234_v62 = vmul.f32 0.03125, %v5200_v21 }
0x109b   : > { %v8572_v29 = vpop.eup %8571 }
0x109c   : > { %v8574_v16 = vpop.eup %8573  ;;  %v5274_v2 = vmul.f32 %v8572_v29, %v11115_v59  ;;  %v5248_v7 = vadd.f32 1e-05, %v5234_v62 }
0x109d   : > { %v5273_v24 = vmul.f32 %v8574_v16, %v11118_v49 }
0x109e   : > { %v5294_v47 = vmul.f32 %v11207_v11, %v5274_v2  ;;  %8577 = vrsqrt.f32 %v5248_v7 }
0x109f   : > { %v5293_v25 = vmul.f32 %v11207_v11, %v5273_v24 }
0x10a0   : > { %v5314_v4 = vadd.f32 %v11216_v14, %v5294_v47 }
0x10a1   : > { %v5313_v53 = vadd.f32 %v11216_v14, %v5293_v25 }
0x10a3   : > { %7715 = vmatprep.mubr.msk.f32.mxu0 %vm1165_vm4, %v5313_v53 }
0x10a4   : > { %v8576_v59 = vpop.eup %8575  ;;  %7716 = vmatmul.mubr.msk.f32.vlgmr.msra.gmra.mrb[132].mxu0 %vm1165_vm4, %v5314_v4 }
0x10a5   : > { %v5275_v49 = vmul.f32 %v8576_v59, %v11127_v32 }
0x10a7   : > { %v5295_v43 = vmul.f32 %v11207_v11, %v5275_v49 }
0x10a8   : > { %v8578_v39 = vpop.eup %8577 }
0x10a9   : > { %v5315_v48 = vadd.f32 %v11216_v14, %v5295_v43  ;;  %v5276_v8 = vmul.f32 %v8578_v39, %v11132_v1 }
0x10ab   : > { %7718 = vmatprep.mubr.msk.f32.mxu0 %vm1165_vm4, %v5315_v48  ;;  %v5296_v6 = vmul.f32 %v11207_v11, %v5276_v8 }
0x10ad   : > { %v5316_v13 = vadd.f32 %v11216_v14, %v5296_v6 }
0x10af   : > { %7719 = vmatmul.mubr.msk.f32.gmra.mrb[134].mxu0 %vm1165_vm4, %v5316_v13 }
0x10c4   : > { %v5206_v3 = vpop.xlane.xlu0 %5205 }
0x10c5   : > { %v5236_v34 = vmul.f32 0.03125, %v5206_v3  ;;  %v5203_v45 = vpop.xlane.xlu1 %5202 }
0x10c6   : > { %v5235_v9 = vmul.f32 0.03125, %v5203_v45 }
0x10c7   : > { %v5250_v32 = vadd.f32 1e-05, %v5236_v34 }
0x10c8   : > { %v5249_v57 = vadd.f32 1e-05, %v5235_v9 }
0x10c9   : > { %8579 = vrsqrt.f32 %v5250_v32  ;;  %v5212_v38 = vpop.xlane.xlu0 %5211 }
0x10ca   : > { %8581 = vrsqrt.f32 %v5249_v57  ;;  %v5238_v0 = vmul.f32 0.03125, %v5212_v38  ;;  %v5209_v50 = vpop.xlane.xlu1 %5208 }
0x10cb   : > { %v5237_v1 = vmul.f32 0.03125, %v5209_v50 }
0x10cc   : > { %v5252_v61 = vadd.f32 1e-05, %v5238_v0 }
0x10cd   : > { %v5251_v33 = vadd.f32 1e-05, %v5237_v1  ;;  %v5218_v40 = vpop.xlane.xlu0 %5217 }
0x10ce   : > { %8583 = vrsqrt.f32 %v5252_v61  ;;  %v5240_v58 = vmul.f32 0.03125, %v5218_v40  ;;  %v5215_v41 = vpop.xlane.xlu1 %5214 }
0x10cf   : > { %8585 = vrsqrt.f32 %v5251_v33  ;;  %v5239_v51 = vmul.f32 0.03125, %v5215_v41 }
0x10d0   : > { %v5254_v20 = vadd.f32 1e-05, %v5240_v58 }
0x10d1   : > { %v5253_v17 = vadd.f32 1e-05, %v5239_v51 }
0x10d2   : > { %8587 = vrsqrt.f32 %v5254_v20  ;;  %v5224_v60 = vpop.xlane.xlu0 %5223 }
0x10d3   : > { %v8580_v21 = vpop.eup %8579  ;;  %8589 = vrsqrt.f32 %v5253_v17  ;;  %v5242_v62 = vmul.f32 0.03125, %v5224_v60  ;;  %v5221_v29 = vpop.xlane.xlu1 %5220 }
0x10d4   : > { %v8582_v16 = vpop.eup %8581  ;;  %v5241_v2 = vmul.f32 0.03125, %v5221_v29  ;;  %v5278_v7 = vmul.f32 %v8580_v21, %v11143_v36 }
0x10d5   : > { %v5256_v24 = vadd.f32 1e-05, %v5242_v62  ;;  %v5277_v47 = vmul.f32 %v8582_v16, %v11146_v56 }
0x10d6   : > { %v5255_v25 = vadd.f32 1e-05, %v5241_v2  ;;  %v5298_v53 = vmul.f32 %v11207_v11, %v5278_v7  ;;  %v5893_v7 = vld [vmem:[%s8930_s29] sm:$0xff] }
0x10d7   : > { %8591 = vrsqrt.f32 %v5256_v24  ;;  %v5297_v4 = vmul.f32 %v11207_v11, %v5277_v47  ;;  %v5896_v47 = vld [vmem:[%s8930_s29 + $0x18] sm:$0xff] }
0x10d8   : > { %v8584_v59 = vpop.eup %8583  ;;  %8593 = vrsqrt.f32 %v5255_v25  ;;  %v5318_v48 = vadd.f32 %v11216_v14, %v5298_v53  ;;  %v5897_v25 = vld [vmem:[%s8930_s29 + $0x20] sm:$0xff]  ;;  %v5898_v53 = vld [vmem:[%s8930_s29 + $0x28] sm:$0xff] }
0x10d9   : > { %v8586_v49 = vpop.eup %8585  ;;  %v5317_v43 = vadd.f32 %v11216_v14, %v5297_v4  ;;  %v5280_v39 = vmul.f32 %v8584_v59, %v11154_v35  ;;  %v5899_v4 = vld [vmem:[%s8930_s29 + $0x30] sm:$0xff]  ;;  %v5900_v59 = vld [vmem:[%s8930_s29 + $0x38] sm:$0xff] }
0x10da   : > { %v5279_v36 = vmul.f32 %v8586_v49, %v11158_v44  ;;  %v8004_v49 = vpack.c.bf16 %v5900_v59, %v5899_v4 }
0x10db   : > { %7721 = vmatprep.mubr.msk.f32.mxu0 %vm1165_vm4, %v5317_v43  ;;  %v5300_v56 = vmul.f32 %v11207_v11, %v5280_v39  ;;  %v11285_v43 = vld [vmem:[%s807_s7] ss:$0 sm:$0xff]  ;;  %s11699_s7 = sld [smem:[#allocation40_spill]] (!%p6709_p6) }
0x10dc   : > { %v8588_v8 = vpop.eup %8587  ;;  %7722 = vmatmul.mubr.msk.f32.gmra.mrb[136].mxu0 %vm1165_vm4, %v5318_v48  ;;  %v5299_v6 = vmul.f32 %v11207_v11, %v5279_v36 }
0x10dd   : > { %v8590_v13 = vpop.eup %8589  ;;  %v5282_v3 = vmul.f32 %v8588_v8, %v11165_v30  ;;  %v5320_v45 = vadd.f32 %v11216_v14, %v5300_v56 }
0x10de   : > { %v5319_v34 = vadd.f32 %v11216_v14, %v5299_v6  ;;  %v5281_v35 = vmul.f32 %v8590_v13, %v11169_v23 }
0x10df   : > { %v5302_v44 = vmul.f32 %v11207_v11, %v5282_v3 }
0x10e0   : > { %7724 = vmatprep.mubr.msk.f32.mxu0 %vm1165_vm4, %v5319_v34  ;;  %v5301_v9 = vmul.f32 %v11207_v11, %v5281_v35 }
0x10e1   : > { %v8592_v32 = vpop.eup %8591  ;;  %7725 = vmatmul.mubr.msk.f32.gmra.mrb[138].mxu0 %vm1165_vm4, %v5320_v45  ;;  %v5322_v0 = vadd.f32 %v11216_v14, %v5302_v44 }
0x10e2   : > { %v8594_v57 = vpop.eup %8593  ;;  %v5321_v38 = vadd.f32 %v11216_v14, %v5301_v9  ;;  %v5284_v30 = vmul.f32 %v8592_v32, %v11178_v10 }
0x10e3   : > { %v5283_v23 = vmul.f32 %v8594_v57, %v11182_v52 }
0x10e4   : > { %7727 = vmatprep.mubr.msk.f32.mxu0 %vm1165_vm4, %v5321_v38  ;;  %v5304_v50 = vmul.f32 %v11207_v11, %v5284_v30 }
0x10e5   : > { %7728 = vmatmul.mubr.msk.f32.gmra.mrb[140].mxu0 %vm1165_vm4, %v5322_v0  ;;  %v5303_v1 = vmul.f32 %v11207_v11, %v5283_v23 }
0x10e6   : > { %v5324_v33 = vadd.f32 %v11216_v14, %v5304_v50 }
0x10e7   : > { %v5323_v61 = vadd.f32 %v11216_v14, %v5303_v1 }
0x10e9   : > { %7730 = vmatprep.mubr.msk.f32.mxu0 %vm1165_vm4, %v5323_v61 }
0x10ea   : > { %7731 = vmatmul.mubr.msk.f32.gmra.mrb[142].mxu0 %vm1165_vm4, %v5324_v33 }
0x10f5   : > { %v5230_v10 = vpop.xlane.xlu0 %5229 }
0x10f6   : > { %v5244_v40 = vmul.f32 0.03125, %v5230_v10  ;;  %v5227_v58 = vpop.xlane.xlu1 %5226 }
0x10f7   : > { %v5243_v52 = vmul.f32 0.03125, %v5227_v58 }
0x10f8   : > { %v5258_v41 = vadd.f32 1e-05, %v5244_v40 }
0x10f9   : > { %v5257_v51 = vadd.f32 1e-05, %v5243_v52 }
0x10fa   : > { %8595 = vrsqrt.f32 %v5258_v41 }
0x10fb   : > { %8597 = vrsqrt.f32 %v5257_v51 }
0x1104   : > { %v8596_v20 = vpop.eup %8595 }
0x1105   : > { %v8598_v17 = vpop.eup %8597  ;;  %v5286_v60 = vmul.f32 %v8596_v20, %v11191_v15  ;;  %v5894_v15 = vld [vmem:[%s8930_s29 + $0x8] sm:$0xff] }
0x1106   : > { %v5285_v21 = vmul.f32 %v8598_v17, %v11194_v18  ;;  %v7992_v24 = vpack.c.bf16 %v5894_v15, %v5893_v7  ;;  %v5895_v18 = vld [vmem:[%s8930_s29 + $0x10] sm:$0xff] }
0x1107   : > { %v5306_v62 = vmul.f32 %v11207_v11, %v5286_v60 }
0x1108   : > { %v5305_v29 = vmul.f32 %v11207_v11, %v5285_v21  ;;  %7993 = vmatprep.subr.bf16.mxu1 %v7992_v24  ;;  %v7996_v11 = vpack.c.bf16 %v5896_v47, %v5895_v18 }
0x1109   : > { %v5326_v2 = vadd.f32 %v11216_v14, %v5306_v62  ;;  %7995 = vmatpush3.bf16.msra.mxu1 %v7992_v24 }
0x110a   : > { %v5325_v16 = vadd.f32 %v11216_v14, %v5305_v29  ;;  %7997 = vmatprep.subr.bf16.mxu1 %v7996_v11  ;;  %v8000_v14 = vpack.c.bf16 %v5898_v53, %v5897_v25 }
0x110c   : > { %7733 = vmatprep.mubr.msk.f32.mxu0 %vm1165_vm4, %v5325_v16 }
0x110d   : > { %7734 = vmatmul.mubr.msk.f32.gmra.mrb[144].mxu0 %vm1165_vm4, %v5326_v2  ;;  %7999 = vmatpush3.bf16.msra.mxu1 %v7996_v11 }
0x110e   : > { %8001 = vmatprep.subr.bf16.mxu1 %v8000_v14 }
0x1111   : > { %8003 = vmatpush3.bf16.msra.mxu1 %v8000_v14 }
0x1112   : > { %8005 = vmatprep.subr.bf16.mxu1 %v8004_v49 }
0x1115   : > { %8007 = vmatpush3.bf16.msra.mxu1 %v8004_v49 }
0x1177   : > { %v7717_v39 = vpop.f32.mrb[132].mxu0 }
0x1178   : > { %v11288_v48 = vadd.f32 %v7717_v39, %v11285_v43  ;;  %v5446_v36 = vpop.f32.mrb[133].mxu0 }
0x1179   : > { %v11291_v56 = vadd.f32 %v11285_v43, %v5446_v36 }
0x117a   : > { %v11294_v8 = vmul.f32 0.70710677, %v11288_v48 }
0x117b   : > { %v11297_v6 = vmul.f32 0.70710677, %v11291_v56 }
0x117c   : > { %v5544_v13 = vand.u32 2147483647, %v11294_v8  ;;  %vm5824_vm12 = vcmp.ge.f32.partialorder %v11294_v8, 0.0 }
0x117d   : > { %v5543_v3 = vand.u32 2147483647, %v11297_v6  ;;  %vm5823_vm13 = vcmp.ge.f32.partialorder %v11297_v6, 0.0 }
0x117e   : > { %v5558_v34 = vmul.f32 0.3275911, %v5544_v13  ;;  %v5740_v50 = vsub.f32 0.0, %v5544_v13 }
0x117f   : > { %v5557_v35 = vmul.f32 0.3275911, %v5543_v3  ;;  %v5739_v61 = vsub.f32 0.0, %v5543_v3 }
0x1180   : > { %v5572_v45 = vadd.f32 1.0, %v5558_v34  ;;  %v5754_v52 = vmul.f32 %v5740_v50, %v5544_v13 }
0x1181   : > { %v5571_v44 = vadd.f32 1.0, %v5557_v35  ;;  %v5753_v17 = vmul.f32 %v5739_v61, %v5543_v3 }
0x1182   : > { %8599 = vrcp.f32 %v5572_v45  ;;  %v7720_v9 = vpop.f32.mrb[134].mxu0  ;;  %v5769_v62 = vmul.f32 1.442695, %v5754_v52 }
0x1183   : > { %8601 = vrcp.f32 %v5571_v44  ;;  %v11302_v32 = vadd.f32 %v7720_v9, %v11285_v43  ;;  %v5456_v57 = vpop.f32.mrb[135].mxu0  ;;  %v5767_v2 = vmul.f32 1.442695, %v5753_v17 }
0x1184   : > { %v11305_v38 = vadd.f32 %v11285_v43, %v5456_v57 }
0x1185   : > { %v11308_v30 = vmul.f32 0.70710677, %v11302_v32 }
0x1186   : > { %v11311_v0 = vmul.f32 0.70710677, %v11305_v38 }
0x1187   : > { %v5546_v23 = vand.u32 2147483647, %v11308_v30  ;;  %vm5826_vm15 = vcmp.ge.f32.partialorder %v11308_v30, 0.0  ;;  %v5518_v30 = vmul.f32 0.5, %v11302_v32 }
0x1188   : > { %v5545_v1 = vand.u32 2147483647, %v11311_v0  ;;  %vm5825_vm0 = vcmp.ge.f32.partialorder %v11311_v0, 0.0 }
0x1189   : > { %v5560_v33 = vmul.f32 0.3275911, %v5546_v23  ;;  %v5742_v24 = vsub.f32 0.0, %v5546_v23 }
0x118a   : > { %v5559_v10 = vmul.f32 0.3275911, %v5545_v1  ;;  %v5741_v47 = vsub.f32 0.0, %v5545_v1 }
0x118b   : > { %v5574_v40 = vadd.f32 1.0, %v5560_v33  ;;  %v5756_v4 = vmul.f32 %v5742_v24, %v5546_v23 }
0x118c   : > { %v8600_v58 = vpop.eup %8599  ;;  %v5573_v41 = vadd.f32 1.0, %v5559_v10  ;;  %v5755_v36 = vmul.f32 %v5741_v47, %v5545_v1 }
0x118d   : > { %v8602_v51 = vpop.eup %8601  ;;  %v5614_v20 = vmul.f32 1.0614054, %v8600_v58  ;;  %8603 = vrcp.f32 %v5574_v40  ;;  %v5773_v44 = vmul.f32 1.442695, %v5756_v4 }
0x118e   : > { %v5613_v60 = vmul.f32 1.0614054, %v8602_v51  ;;  %8605 = vrcp.f32 %v5573_v41  ;;  %v5771_v61 = vmul.f32 1.442695, %v5755_v36 }
0x118f   : > { %v5628_v21 = vadd.f32 -1.4531521, %v5614_v20  ;;  %8607 = vpow2.f32 %v5769_v62 }
0x1190   : > { %v5627_v29 = vadd.f32 -1.4531521, %v5613_v60  ;;  %8609 = vpow2.f32 %v5767_v2 }
0x1191   : > { %v5642_v16 = vmul.f32 %v8600_v58, %v5628_v21  ;;  %8611 = vpow2.f32 %v5773_v44 }
0x1192   : > { %v5641_v7 = vmul.f32 %v8602_v51, %v5627_v29  ;;  %8613 = vpow2.f32 %v5771_v61 }
0x1193   : > { %v5656_v15 = vadd.f32 1.4214138, %v5642_v16 }
0x1194   : > { %v5655_v18 = vadd.f32 1.4214138, %v5641_v7 }
0x1195   : > { %v5670_v11 = vmul.f32 %v8600_v58, %v5656_v15 }
0x1196   : > { %v5669_v25 = vmul.f32 %v8602_v51, %v5655_v18 }
0x1197   : > { %v8604_v53 = vpop.eup %8603  ;;  %v5684_v14 = vadd.f32 -0.28449672, %v5670_v11 }
0x1198   : > { %v8606_v59 = vpop.eup %8605  ;;  %v5683_v49 = vadd.f32 -0.28449672, %v5669_v25  ;;  %v5616_v39 = vmul.f32 1.0614054, %v8604_v53  ;;  %v5515_v25 = vmul.f32 0.5, %v11291_v56 }
0x1199   : > { %v5698_v13 = vmul.f32 %v8600_v58, %v5684_v14  ;;  %v5615_v3 = vmul.f32 1.0614054, %v8606_v59  ;;  %v8608_v40 = vpop.eup %8607 }
0x119a   : > { %v5697_v34 = vmul.f32 %v8602_v51, %v5683_v49  ;;  %v5630_v35 = vadd.f32 -1.4531521, %v5616_v39  ;;  %v8610_v23 = vpop.eup %8609  ;;  %v5516_v49 = vmul.f32 0.5, %v11288_v48 }
0x119b   : > { %v5712_v45 = vadd.f32 0.2548296, %v5698_v13  ;;  %v5629_v9 = vadd.f32 -1.4531521, %v5615_v3  ;;  %v8612_v36 = vpop.eup %8611 }
0x119c   : > { %v5711_v57 = vadd.f32 0.2548296, %v5697_v34  ;;  %v5644_v50 = vmul.f32 %v8604_v53, %v5630_v35  ;;  %v8614_v3 = vpop.eup %8613 }
0x119d   : > { %v5726_v33 = vmul.f32 %v8600_v58, %v5712_v45  ;;  %v5643_v10 = vmul.f32 %v8606_v59, %v5629_v9 }
0x119e   : > { %v5725_v52 = vmul.f32 %v8602_v51, %v5711_v57  ;;  %v5658_v41 = vadd.f32 1.4214138, %v5644_v50 }
0x119f   : > { %v5796_v20 = vmul.f32 %v8608_v40, %v5726_v33  ;;  %v5657_v17 = vadd.f32 1.4214138, %v5643_v10  ;;  %v5517_v10 = vmul.f32 0.5, %v11305_v38 }
0x11a0   : > { %v5795_v1 = vmul.f32 %v8610_v23, %v5725_v52  ;;  %v5672_v60 = vmul.f32 %v8604_v53, %v5658_v41 }
0x11a1   : > { %v5810_v21 = vsub.f32 1.0, %v5796_v20  ;;  %v5671_v62 = vmul.f32 %v8606_v59, %v5657_v17 }
0x11a2   : > { %v5809_v29 = vsub.f32 1.0, %v5795_v1  ;;  %v5686_v16 = vadd.f32 -0.28449672, %v5672_v60 }
0x11a3   : > { %v5838_v2 = vsub.f32 0.0, %v5810_v21  ;;  %v5685_v7 = vadd.f32 -0.28449672, %v5671_v62 }
0x11a4   : > { %v5837_v58 = vsub.f32 0.0, %v5809_v29  ;;  %v5700_v15 = vmul.f32 %v8604_v53, %v5686_v16 }
0x11a5   : > { %v5852_v24 = vsel %vm5824_vm12, %v5810_v21, %v5838_v2  ;;  %v5699_v51 = vmul.f32 %v8606_v59, %v5685_v7  ;;  %vm6137_vm12 = vcmask (!%p6709_p6), 1041409  }
0x11a6   : > { %v5866_v18 = vadd.f32 1.0, %v5852_v24  ;;  %v5851_v47 = vsel %vm5823_vm13, %v5809_v29, %v5837_v58  ;;  %v5714_v11 = vadd.f32 0.2548296, %v5700_v15  ;;  %vm6140_vm13 = vcmask (!%p6709_p6), 254976  }
0x11a7   : > { %v5865_v14 = vadd.f32 1.0, %v5851_v47  ;;  %v5713_v4 = vadd.f32 0.2548296, %v5699_v51 }
0x11a8   : > { %v5728_v39 = vmul.f32 %v8604_v53, %v5714_v11  ;;  %v5880_v34 = vmul.f32 %v5866_v18, %v5516_v49 }
0x11a9   : > { %v5879_v13 = vmul.f32 %v5865_v14, %v5515_v25  ;;  %v5727_v8 = vmul.f32 %v8606_v59, %v5713_v4 }
0x11aa   : > { %v5798_v35 = vmul.f32 %v8612_v36, %v5728_v39 }
0x11ab   : > { %v5797_v45 = vmul.f32 %v8614_v3, %v5727_v8  ;;  %7752 = vmatprep.mubr.msk.f32.mxu1 %vm5901_vm14, %v5879_v13 }
0x11ac   : > { %v5812_v6 = vsub.f32 1.0, %v5798_v35  ;;  %7753 = vmatmul.mubr.msk.f32.vlgmr.msra.gmra.mrb[120].mxu1 %vm5901_vm14, %v5880_v34 }
0x11ad   : > { %v5811_v44 = vsub.f32 1.0, %v5797_v45 }
0x11ae   : > { %v5840_v56 = vsub.f32 0.0, %v5812_v6 }
0x11af   : > { %v5839_v9 = vsub.f32 0.0, %v5811_v44  ;;  %v7723_v48 = vpop.f32.mrb[136].mxu0 }
0x11b0   : > { %v5854_v53 = vsel %vm5826_vm15, %v5812_v6, %v5840_v56  ;;  %v11324_v59 = vadd.f32 %v7723_v48, %v11285_v43  ;;  %v5466_v57 = vpop.f32.mrb[137].mxu0  ;;  %vm6273_vm15 = vcmask (!%p6709_p6), 33792  }
0x11b1   : > { %v5868_v50 = vadd.f32 1.0, %v5854_v53  ;;  %v5853_v61 = vsel %vm5825_vm0, %v5811_v44, %v5839_v9  ;;  %v11327_v33 = vadd.f32 %v11285_v43, %v5466_v57 }
0x11b2   : > { %v5867_v40 = vadd.f32 1.0, %v5853_v61  ;;  %v11331_v52 = vmul.f32 0.70710677, %v11324_v59 }
0x11b3   : > { %v11335_v41 = vmul.f32 0.70710677, %v11327_v33  ;;  %v5882_v17 = vmul.f32 %v5868_v50, %v5518_v30 }
0x11b4   : > { %v5881_v0 = vmul.f32 %v5867_v40, %v5517_v10  ;;  %v5548_v23 = vand.u32 2147483647, %v11331_v52  ;;  %v7726_v20 = vpop.f32.mrb[138].mxu0  ;;  %vm5828_vm1 = vcmp.ge.f32.partialorder %v11331_v52, 0.0 }
0x11b5   : > { %v5547_v1 = vand.u32 2147483647, %v11335_v41  ;;  %v11340_v60 = vadd.f32 %v7726_v20, %v11285_v43  ;;  %v5476_v38 = vpop.f32.mrb[139].mxu0  ;;  %vm5827_vm2 = vcmp.ge.f32.partialorder %v11335_v41, 0.0 }
0x11b6   : > { %v5562_v21 = vmul.f32 0.3275911, %v5548_v23  ;;  %v11343_v62 = vadd.f32 %v11285_v43, %v5476_v38  ;;  %7755 = vmatprep.mubr.msk.f32.mxu1 %vm5901_vm14, %v5881_v0  ;;  %v5744_v2 = vsub.f32 0.0, %v5548_v23 }
0x11b7   : > { %v5561_v32 = vmul.f32 0.3275911, %v5547_v1  ;;  %v11347_v29 = vmul.f32 0.70710677, %v11340_v60  ;;  %7756 = vmatmul.mubr.msk.f32.gmra.mrb[122].mxu1 %vm5901_vm14, %v5882_v17  ;;  %v5743_v47 = vsub.f32 0.0, %v5547_v1 }
0x11b8   : > { %v5576_v16 = vadd.f32 1.0, %v5562_v21  ;;  %v11351_v7 = vmul.f32 0.70710677, %v11343_v62  ;;  %v7729_v58 = vpop.f32.mrb[140].mxu0  ;;  %v5758_v25 = vmul.f32 %v5744_v2, %v5548_v23  ;;  %v11388_v21 = vmul.f32 0.5, %v11324_v59 }
0x11b9   : > { %v5575_v15 = vadd.f32 1.0, %v5561_v32  ;;  %v5550_v24 = vand.u32 2147483647, %v11347_v29  ;;  %v5486_v51 = vpop.f32.mrb[141].mxu0  ;;  %v11356_v4 = vadd.f32 %v7729_v58, %v11285_v43  ;;  %v5757_v34 = vmul.f32 %v5743_v47, %v5547_v1 }
0x11ba   : > { %8615 = vrcp.f32 %v5576_v16  ;;  %v5549_v18 = vand.u32 2147483647, %v11351_v7  ;;  %v11359_v39 = vadd.f32 %v11285_v43, %v5486_v51  ;;  %v5777_v45 = vmul.f32 1.442695, %v5758_v25 }
0x11bb   : > { %8617 = vrcp.f32 %v5575_v15  ;;  %v5564_v11 = vmul.f32 0.3275911, %v5550_v24  ;;  %v11362_v8 = vmul.f32 0.70710677, %v11356_v4  ;;  %v5746_v44 = vsub.f32 0.0, %v5550_v24 }
0x11bc   : > { %v5563_v14 = vmul.f32 0.3275911, %v5549_v18  ;;  %v11365_v35 = vmul.f32 0.70710677, %v11359_v39  ;;  %v5775_v57 = vmul.f32 1.442695, %v5757_v34 }
0x11bd   : > { %v5578_v49 = vadd.f32 1.0, %v5564_v11  ;;  %v7732_v36 = vpop.f32.mrb[142].mxu0  ;;  %v5552_v6 = vand.u32 2147483647, %v11362_v8  ;;  %v5745_v40 = vsub.f32 0.0, %v5549_v18  ;;  %v5760_v17 = vmul.f32 %v5746_v44, %v5550_v24 }
0x11be   : > { %v5577_v13 = vadd.f32 1.0, %v5563_v14  ;;  %v5496_v3 = vpop.f32.mrb[143].mxu0  ;;  %v5551_v56 = vand.u32 2147483647, %v11365_v35  ;;  %v11370_v9 = vadd.f32 %v7732_v36, %v11285_v43  ;;  %v11392_v58 = vmul.f32 0.5, %v11327_v33 }
0x11bf   : > { %8619 = vrcp.f32 %v5578_v49  ;;  %v5566_v48 = vmul.f32 0.3275911, %v5552_v6  ;;  %v11373_v53 = vadd.f32 %v11285_v43, %v5496_v3  ;;  %v5748_v16 = vsub.f32 0.0, %v5552_v6 }
0x11c0   : > { %8621 = vrcp.f32 %v5577_v13  ;;  %v5565_v50 = vmul.f32 0.3275911, %v5551_v56  ;;  %v11376_v61 = vmul.f32 0.70710677, %v11370_v9  ;;  %v5759_v47 = vmul.f32 %v5745_v40, %v5549_v18 }
0x11c1   : > { %8623 = vpow2.f32 %v5777_v45  ;;  %v5580_v30 = vadd.f32 1.0, %v5566_v48  ;;  %v11381_v0 = vmul.f32 0.70710677, %v11373_v53  ;;  %v5747_v11 = vsub.f32 0.0, %v5551_v56 }
0x11c2   : > { %v5579_v1 = vadd.f32 1.0, %v5565_v50  ;;  %v5554_v38 = vand.u32 2147483647, %v11376_v61  ;;  %v5781_v14 = vmul.f32 1.442695, %v5760_v17  ;;  %v5762_v3 = vmul.f32 %v5748_v16, %v5552_v6 }
0x11c3   : > { %8625 = vrcp.f32 %v5580_v30  ;;  %v5553_v24 = vand.u32 2147483647, %v11381_v0  ;;  %v5779_v40 = vmul.f32 1.442695, %v5759_v47  ;;  %v5761_v30 = vmul.f32 %v5747_v11, %v5551_v56 }
0x11c4   : > { %v11378_v10 = vpop.eup %8615  ;;  %8627 = vrcp.f32 %v5579_v1  ;;  %v5568_v15 = vmul.f32 0.3275911, %v5554_v38  ;;  %v5750_v44 = vsub.f32 0.0, %v5554_v38  ;;  %v5785_v16 = vmul.f32 1.442695, %v5762_v3 }
0x11c5   : > { %v11383_v23 = vpop.eup %8617  ;;  %v5618_v20 = vmul.f32 1.0614054, %v11378_v10  ;;  %8629 = vpow2.f32 %v5775_v57  ;;  %v5567_v34 = vmul.f32 0.3275911, %v5553_v24  ;;  %v5749_v1 = vsub.f32 0.0, %v5553_v24 }
0x11c6   : > { %v5617_v32 = vmul.f32 1.0614054, %v11383_v23  ;;  %v5582_v49 = vadd.f32 1.0, %v5568_v15  ;;  %v5783_v11 = vmul.f32 1.442695, %v5761_v30  ;;  %vm5830_vm3 = vcmp.ge.f32.partialorder %v11347_v29, 0.0 }
0x11c7   : > { %v5632_v2 = vadd.f32 -1.4531521, %v5618_v20  ;;  %v5581_v17 = vadd.f32 1.0, %v5567_v34  ;;  %vm5829_vm5 = vcmp.ge.f32.partialorder %v11351_v7, 0.0  ;;  %vm5832_vm6 = vcmp.ge.f32.partialorder %v11362_v8, 0.0 }
0x11c8   : > { %v5631_v51 = vadd.f32 -1.4531521, %v5617_v32  ;;  %8631 = vrcp.f32 %v5582_v49  ;;  %vm5831_vm7 = vcmp.ge.f32.partialorder %v11365_v35, 0.0  ;;  %vm5834_vm8 = vcmp.ge.f32.partialorder %v11376_v61, 0.0 }
0x11c9   : > { %v11395_v25 = vpop.eup %8619  ;;  %v5646_v59 = vmul.f32 %v11378_v10, %v5632_v2  ;;  %8633 = vpow2.f32 %v5781_v14  ;;  %v5763_v14 = vmul.f32 %v5749_v1, %v5553_v24  ;;  %vm5833_vm9 = vcmp.ge.f32.partialorder %v11381_v0, 0.0 }
0x11ca   : > { %v11398_v36 = vpop.eup %8621  ;;  %v5645_v13 = vmul.f32 %v11383_v23, %v5631_v51  ;;  %v5620_v33 = vmul.f32 1.0614054, %v11395_v25  ;;  %8635 = vrcp.f32 %v5581_v17 }
0x11cb   : > { %v5660_v45 = vadd.f32 1.4214138, %v5646_v59  ;;  %v5619_v18 = vmul.f32 1.0614054, %v11398_v36  ;;  %v8624_v32 = vpop.eup %8623  ;;  %v5764_v59 = vmul.f32 %v5750_v44, %v5554_v38  ;;  %8637 = vpow2.f32 %v5779_v40 }
0x11cc   : > { %v5659_v48 = vadd.f32 1.4214138, %v5645_v13  ;;  %v5634_v50 = vadd.f32 -1.4531521, %v5620_v33  ;;  %8639 = vpow2.f32 %v5785_v16  ;;  %v5787_v16 = vmul.f32 1.442695, %v5763_v14 }
0x11cd   : > { %v5674_v57 = vmul.f32 %v11378_v10, %v5660_v45  ;;  %v5633_v20 = vadd.f32 -1.4531521, %v5619_v18  ;;  %v11407_v49 = vpop.eup %8625  ;;  %v5789_v30 = vmul.f32 1.442695, %v5764_v59  ;;  %8641 = vpow2.f32 %v5783_v11 }
0x11ce   : > { %v5673_v2 = vmul.f32 %v11383_v23, %v5659_v48  ;;  %v5648_v6 = vmul.f32 %v11395_v25, %v5634_v50  ;;  %v11409_v13 = vpop.eup %8627  ;;  %v5622_v45 = vmul.f32 1.0614054, %v11407_v49 }
0x11cf   : > { %v5688_v15 = vadd.f32 -0.28449672, %v5674_v57  ;;  %v5647_v51 = vmul.f32 %v11398_v36, %v5633_v20  ;;  %v5621_v38 = vmul.f32 1.0614054, %v11409_v13  ;;  %v8630_v44 = vpop.eup %8629  ;;  %8643 = vpow2.f32 %v5789_v30 }
0x11d0   : > { %v5687_v56 = vadd.f32 -0.28449672, %v5673_v2  ;;  %v5662_v47 = vadd.f32 1.4214138, %v5648_v6  ;;  %v5636_v40 = vadd.f32 -1.4531521, %v5622_v45  ;;  %8645 = vpow2.f32 %v5787_v16 }
0x11d1   : > { %v5702_v33 = vmul.f32 %v11378_v10, %v5688_v15  ;;  %v5661_v34 = vadd.f32 1.4214138, %v5647_v51  ;;  %v5635_v17 = vadd.f32 -1.4531521, %v5621_v38 }
0x11d2   : > { %v5701_v3 = vmul.f32 %v11383_v23, %v5687_v56  ;;  %v5676_v18 = vmul.f32 %v11395_v25, %v5662_v47  ;;  %v11418_v24 = vpop.eup %8631  ;;  %v5650_v6 = vmul.f32 %v11407_v49, %v5636_v40 }
0x11d3   : > { %v5716_v48 = vadd.f32 0.2548296, %v5702_v33  ;;  %v5675_v50 = vmul.f32 %v11398_v36, %v5661_v34  ;;  %v5649_v59 = vmul.f32 %v11409_v13, %v5635_v17  ;;  %v5624_v56 = vmul.f32 1.0614054, %v11418_v24 }
0x11d4   : > { %v5715_v57 = vadd.f32 0.2548296, %v5701_v3  ;;  %v5690_v20 = vadd.f32 -0.28449672, %v5676_v18  ;;  %v5664_v33 = vadd.f32 1.4214138, %v5650_v6 }
0x11d5   : > { %v5730_v1 = vmul.f32 %v11378_v10, %v5716_v48  ;;  %v5689_v2 = vadd.f32 -0.28449672, %v5675_v50  ;;  %v8634_v10 = vpop.eup %8633  ;;  %v5663_v3 = vadd.f32 1.4214138, %v5649_v59  ;;  %v5638_v18 = vadd.f32 -1.4531521, %v5624_v56 }
0x11d6   : > { %v5729_v15 = vmul.f32 %v11383_v23, %v5715_v57  ;;  %v5704_v51 = vmul.f32 %v11395_v25, %v5690_v20  ;;  %v11428_v38 = vpop.eup %8635  ;;  %v5678_v48 = vmul.f32 %v11407_v49, %v5664_v33 }
0x11d7   : > { %v5800_v47 = vmul.f32 %v8624_v32, %v5730_v1  ;;  %v5703_v11 = vmul.f32 %v11398_v36, %v5689_v2  ;;  %v8638_v50 = vpop.eup %8637  ;;  %v5652_v30 = vmul.f32 %v11418_v24, %v5638_v18  ;;  %v5623_v1 = vmul.f32 1.0614054, %v11428_v38 }
0x11d8   : > { %v5799_v34 = vmul.f32 %v8630_v44, %v5729_v15  ;;  %v5718_v45 = vadd.f32 0.2548296, %v5704_v51  ;;  %v5677_v44 = vmul.f32 %v11409_v13, %v5663_v3  ;;  %v5692_v17 = vadd.f32 -0.28449672, %v5678_v48  ;;  %v8640_v2 = vpop.eup %8639 }
0x11d9   : > { %v5814_v14 = vsub.f32 1.0, %v5800_v47  ;;  %v5717_v23 = vadd.f32 0.2548296, %v5703_v11  ;;  %v5666_v51 = vadd.f32 1.4214138, %v5652_v30  ;;  %v8642_v11 = vpop.eup %8641 }
0x11da   : > { %v5813_v32 = vsub.f32 1.0, %v5799_v34  ;;  %v5732_v40 = vmul.f32 %v11395_v25, %v5718_v45  ;;  %v5691_v16 = vadd.f32 -0.28449672, %v5677_v44  ;;  %v5706_v56 = vmul.f32 %v11407_v49, %v5692_v17  ;;  %v8644_v44 = vpop.eup %8643 }
0x11db   : > { %v5842_v57 = vsub.f32 0.0, %v5814_v14  ;;  %v5731_v20 = vmul.f32 %v11398_v36, %v5717_v23  ;;  %v5637_v47 = vadd.f32 -1.4531521, %v5623_v1  ;;  %v5680_v23 = vmul.f32 %v11418_v24, %v5666_v51 }
0x11dc   : > { %v5841_v6 = vsub.f32 0.0, %v5813_v32  ;;  %v5802_v15 = vmul.f32 %v8634_v10, %v5732_v40  ;;  %v5705_v45 = vmul.f32 %v11409_v13, %v5691_v16  ;;  %v5720_v10 = vadd.f32 0.2548296, %v5706_v56 }
0x11dd   : > { %v5856_v25 = vsel %vm5828_vm1, %v5814_v14, %v5842_v57  ;;  %v5801_v59 = vmul.f32 %v8638_v50, %v5731_v20  ;;  %v5651_v50 = vmul.f32 %v11428_v38, %v5637_v47  ;;  %v5694_v57 = vadd.f32 -0.28449672, %v5680_v23 }
0x11de   : > { %v5870_v33 = vadd.f32 1.0, %v5856_v25  ;;  %v5855_v36 = vsel %vm5827_vm2, %v5813_v32, %v5841_v6  ;;  %v5816_v34 = vsub.f32 1.0, %v5802_v15  ;;  %v5719_v48 = vadd.f32 0.2548296, %v5705_v45  ;;  %v8646_v15 = vpop.eup %8645 }
0x11df   : > { %v5869_v3 = vadd.f32 1.0, %v5855_v36  ;;  %v5815_v18 = vsub.f32 1.0, %v5801_v59  ;;  %v5734_v32 = vmul.f32 %v11407_v49, %v5720_v10  ;;  %v5665_v6 = vadd.f32 1.4214138, %v5651_v50 }
0x11e0   : > { %v5884_v52 = vmul.f32 %v5870_v33, %v11388_v21  ;;  %v5844_v14 = vsub.f32 0.0, %v5816_v34  ;;  %v7735_v40 = vpop.f32.mrb[144].mxu0  ;;  %v5733_v1 = vmul.f32 %v11409_v13, %v5719_v48  ;;  %v5708_v25 = vmul.f32 %v11418_v24, %v5694_v57 }
0x11e1   : > { %v5883_v30 = vmul.f32 %v5869_v3, %v11392_v58  ;;  %v5843_v41 = vsub.f32 0.0, %v5815_v18  ;;  %v5506_v20 = vpop.f32.mrb[145].mxu0  ;;  %v11453_v21 = vadd.f32 %v7735_v40, %v11285_v43  ;;  %v5804_v58 = vmul.f32 %v8640_v2, %v5734_v32 }
0x11e2   : > { %v5858_v17 = vsel %vm5830_vm3, %v5816_v34, %v5844_v14  ;;  %v5521_v49 = vmul.f32 0.5, %v11343_v62  ;;  %v5803_v59 = vmul.f32 %v8642_v11, %v5733_v1  ;;  %v5679_v13 = vmul.f32 %v11428_v38, %v5665_v6 }
0x11e3   : > { %v5872_v16 = vadd.f32 1.0, %v5858_v17  ;;  %v5857_v51 = vsel %vm5829_vm5, %v5815_v18, %v5843_v41  ;;  %7758 = vmatprep.mubr.msk.f32.mxu1 %vm5901_vm14, %v5883_v30  ;;  %v5522_v56 = vmul.f32 0.5, %v11340_v60  ;;  %v5818_v47 = vsub.f32 1.0, %v5804_v58 }
0x11e4   : > { %v5871_v29 = vadd.f32 1.0, %v5857_v51  ;;  %7759 = vmatmul.mubr.msk.f32.gmra.mrb[124].mxu1 %vm5901_vm14, %v5884_v52  ;;  %v5722_v33 = vadd.f32 0.2548296, %v5708_v25  ;;  %v11464_v7 = vmul.f32 0.70710677, %v11453_v21  ;;  %v5817_v36 = vsub.f32 1.0, %v5803_v59 }
0x11e5   : > { %v5693_v34 = vadd.f32 -0.28449672, %v5679_v13  ;;  %v11467_v45 = vadd.f32 %v11285_v43, %v5506_v20  ;;  %v5886_v62 = vmul.f32 %v5872_v16, %v5522_v56  ;;  %v5846_v3 = vsub.f32 0.0, %v5818_v47 }
0x11e6   : > { %v5885_v2 = vmul.f32 %v5871_v29, %v5521_v49  ;;  %v5736_v11 = vmul.f32 %v11418_v24, %v5722_v33  ;;  %v5556_v18 = vand.u32 2147483647, %v11464_v7  ;;  %v5845_v60 = vsub.f32 0.0, %v5817_v36 }
0x11e7   : > { %v5707_v10 = vmul.f32 %v11428_v38, %v5693_v34  ;;  %v11474_v23 = vmul.f32 0.70710677, %v11467_v45  ;;  %v5860_v52 = vsel %vm5832_vm6, %v5818_v47, %v5846_v3  ;;  %v5523_v40 = vmul.f32 0.5, %v11359_v39 }
0x11e8   : > { %7761 = vmatprep.mubr.msk.f32.mxu1 %vm5901_vm14, %v5885_v2  ;;  %v5806_v43 = vmul.f32 %v8644_v44, %v5736_v11  ;;  %v5570_v14 = vmul.f32 0.3275911, %v5556_v18  ;;  %v5874_v24 = vadd.f32 1.0, %v5860_v52  ;;  %v5859_v48 = vsel %vm5831_vm7, %v5817_v36, %v5845_v60 }
0x11e9   : > { %7762 = vmatmul.mubr.msk.f32.gmra.mrb[126].mxu1 %vm5901_vm14, %v5886_v62  ;;  %v5721_v50 = vadd.f32 0.2548296, %v5707_v10  ;;  %v5555_v8 = vand.u32 2147483647, %v11474_v23  ;;  %v5873_v30 = vadd.f32 1.0, %v5859_v48  ;;  %v5524_v57 = vmul.f32 0.5, %v11356_v4 }
0x11ea   : > { %v5820_v41 = vsub.f32 1.0, %v5806_v43  ;;  %v5584_v32 = vadd.f32 1.0, %v5570_v14  ;;  %v5752_v4 = vsub.f32 0.0, %v5556_v18  ;;  %v5525_v49 = vmul.f32 0.5, %v11373_v53 }
0x11eb   : > { %v5735_v20 = vmul.f32 %v11428_v38, %v5721_v50  ;;  %v5569_v17 = vmul.f32 0.3275911, %v5555_v8  ;;  %v5887_v35 = vmul.f32 %v5873_v30, %v5523_v40  ;;  %v5888_v1 = vmul.f32 %v5874_v24, %v5524_v57 }
0x11ec   : > { %v5848_v44 = vsub.f32 0.0, %v5820_v41  ;;  %8647 = vrcp.f32 %v5584_v32  ;;  %v5751_v59 = vsub.f32 0.0, %v5555_v8  ;;  %v5766_v61 = vmul.f32 %v5752_v4, %v5556_v18 }
0x11ed   : > { %v5805_v6 = vmul.f32 %v8646_v15, %v5735_v20  ;;  %v5583_v16 = vadd.f32 1.0, %v5569_v17  ;;  %7764 = vmatprep.mubr.msk.f32.mxu1 %vm5901_vm14, %v5887_v35  ;;  %v5526_v15 = vmul.f32 0.5, %v11370_v9  ;;  %vm5836_vm10 = vcmp.ge.f32.partialorder %v11464_v7, 0.0  ;;  %v6708_v7 = vld [vmem:[%s815_s16] ss:$0 sm:$0xff] }
0x11ee   : > { %7765 = vmatmul.mubr.msk.f32.gmra.mrb[128].mxu1 %vm5901_vm14, %v5888_v1  ;;  %v5862_v39 = vsel %vm5834_vm8, %v5820_v41, %v5848_v44  ;;  %v5765_v34 = vmul.f32 %v5751_v59, %v5555_v8  ;;  %v5793_v0 = vmul.f32 1.442695, %v5766_v61  ;;  %vm5835_vm11 = vcmp.ge.f32.partialorder %v11474_v23, 0.0 }
0x11ef   : > { %v5819_v51 = vsub.f32 1.0, %v5805_v6  ;;  %8649 = vrcp.f32 %v5583_v16  ;;  %v5876_v38 = vadd.f32 1.0, %v5862_v39  ;;  %v5527_v39 = vmul.f32 0.5, %v11467_v45 }
0x11f0   : > { %v5791_v60 = vmul.f32 1.442695, %v5765_v34  ;;  %8651 = vpow2.f32 %v5793_v0  ;;  %v5528_v4 = vmul.f32 0.5, %v11453_v21 }
0x11f1   : > { %v5847_v58 = vsub.f32 0.0, %v5819_v51  ;;  %v5890_v47 = vmul.f32 %v5876_v38, %v5526_v15 }
0x11f2   : > { %8653 = vpow2.f32 %v5791_v60 }
0x11f3   : > { %v5861_v25 = vsel %vm5833_vm9, %v5819_v51, %v5847_v58 }
0x11f4   : > { %v5875_v29 = vadd.f32 1.0, %v5861_v25 }
0x11f6   : > { %v8648_v13 = vpop.eup %8647  ;;  %v5889_v56 = vmul.f32 %v5875_v29, %v5525_v49 }
0x11f7   : > { %v5626_v33 = vmul.f32 1.0614054, %v8648_v13 }
0x11f8   : > { %7767 = vmatprep.mubr.msk.f32.mxu1 %vm5901_vm14, %v5889_v56 }
0x11f9   : > { %v8650_v2 = vpop.eup %8649  ;;  %v5640_v36 = vadd.f32 -1.4531521, %v5626_v33  ;;  %7768 = vmatmul.mubr.msk.f32.gmra.mrb[130].mxu1 %vm5901_vm14, %v5890_v47 }
0x11fa   : > { %v5625_v62 = vmul.f32 1.0614054, %v8650_v2  ;;  %v8652_v40 = vpop.eup %8651 }
0x11fb   : > { %v5654_v3 = vmul.f32 %v8648_v13, %v5640_v36 }
0x11fc   : > { %v5639_v53 = vadd.f32 -1.4531521, %v5625_v62  ;;  %v8654_v57 = vpop.eup %8653 }
0x11fd   : > { %v5668_v11 = vadd.f32 1.4214138, %v5654_v3 }
0x11fe   : > { %v5653_v9 = vmul.f32 %v8650_v2, %v5639_v53 }
0x11ff   : > { %v5682_v10 = vmul.f32 %v8648_v13, %v5668_v11 }
0x1200   : > { %v5667_v52 = vadd.f32 1.4214138, %v5653_v9 }
0x1201   : > { %v5696_v18 = vadd.f32 -0.28449672, %v5682_v10 }
0x1202   : > { %v5681_v43 = vmul.f32 %v8650_v2, %v5667_v52 }
0x1203   : > { %v5710_v14 = vmul.f32 %v8648_v13, %v5696_v18 }
0x1204   : > { %v5695_v24 = vadd.f32 -0.28449672, %v5681_v43 }
0x1205   : > { %v5724_v48 = vadd.f32 0.2548296, %v5710_v14 }
0x1206   : > { %v5709_v50 = vmul.f32 %v8650_v2, %v5695_v24 }
0x1207   : > { %v5738_v8 = vmul.f32 %v8648_v13, %v5724_v48 }
0x1208   : > { %v5723_v30 = vadd.f32 0.2548296, %v5709_v50 }
0x1209   : > { %v5808_v41 = vmul.f32 %v8652_v40, %v5738_v8 }
0x120a   : > { %v5737_v32 = vmul.f32 %v8650_v2, %v5723_v30 }
0x120b   : > { %v5822_v20 = vsub.f32 1.0, %v5808_v41 }
0x120c   : > { %v5807_v17 = vmul.f32 %v8654_v57, %v5737_v32 }
0x120d   : > { %v5850_v35 = vsub.f32 0.0, %v5822_v20 }
0x120e   : > { %v5821_v44 = vsub.f32 1.0, %v5807_v17 }
0x120f   : > { %v5864_v1 = vsel %vm5836_vm10, %v5822_v20, %v5850_v35 }
0x1210   : > { %v5849_v6 = vsub.f32 0.0, %v5821_v44  ;;  %v5878_v16 = vadd.f32 1.0, %v5864_v1 }
0x1212   : > { %v5863_v51 = vsel %vm5835_vm11, %v5821_v44, %v5849_v6  ;;  %v5892_v25 = vmul.f32 %v5878_v16, %v5528_v4  ;;  %v6186_v6 = vld [vmem:[%s11611_s18] sm:$0xff] (!%p6709_p6)  ;;  %v6187_v16 = vld [vmem:[%s11611_s18 + $0x8] sm:$0xff] (!%p6709_p6)  ;;  %v6189_v4 = vld [vmem:[%s11611_s18 + $0x18] sm:$0xff] (!%p6709_p6) }
0x1213   : > { %v5877_v58 = vadd.f32 1.0, %v5863_v51  ;;  %v6188_v51 = vld [vmem:[%s11611_s18 + $0x10] sm:$0xff] (!%p6709_p6) }
0x1215   : > { %v5891_v38 = vmul.f32 %v5877_v58, %v5527_v39  ;;  %v8742_v39 = vmov (!%p6709_p6), 0.0|0.0   ;;  %v8009_v58 = vpack.c.bf16 (!%p6709_p6), %v6187_v16, %v6186_v6 }
0x1216   : > { %8008 = vmatprep.subr.bf16.mxu0 (!%p6709_p6), %v8742_v39 }
0x1217   : > { %7770 = vmatprep.mubr.msk.f32.mxu1 %vm5901_vm14, %v5891_v38  ;;  %v8744_v38 = vmov (!%p6709_p6), 0.0   ;;  %8010 = vmatpush3.bf16.msra.mxu0 (!%p6709_p6), %v8009_v58 }
0x1218   : > { %7771 = vmatmul.mubr.msk.f32.gmra.mrb[132].mxu1 %vm5901_vm14, %v5892_v25  ;;  %vm8743_vm14 = vmmov (!%p6709_p6), 0   ;;  %v8012_v25 = vpack.c.bf16 (!%p6709_p6), %v6189_v4, %v6188_v51  ;;  %8011 = vmatprep.subr.bf16.mxu0 (!%p6709_p6), %v8742_v39 }
0x1219   : > { %7781 = vmatprep.mubr.msk.f32.mxu0 (!%p6709_p6), %vm8743_vm14, %v8744_v38 }
0x121b   : > { %8013 = vmatpush3.bf16.msra.mxu0 (!%p6709_p6), %v8012_v25 }
0x127f   : > { %v7754_v49 = vpop.f32.mrb[120].mxu1 }
0x1280   : > { %v6080_v23 = vadd.f32 %v7754_v49, %v11045_v54  ;;  %v6010_v29 = vpop.f32.mrb[121].mxu1 }
0x1281   : > { %v6079_v45 = vadd.f32 %v6010_v29, %v11048_v19 }
0x1282   : > { %v6101_v15 = vadd.f32 %v6708_v7, %v6080_v23 }
0x1283   : > { %v6100_v59 = vadd.f32 %v6708_v7, %v6079_v45 }
0x1284   : > { %6115 = vst.msk [vmem:[#allocation2 + $0x8] sm:$0xff] %vm1165_vm4, %v6101_v15 }
0x1285   : > { %6114 = vst.msk [vmem:[#allocation2] sm:$0xff] %vm1165_vm4, %v6100_v59 }
0x128a   : > { %v7757_v21 = vpop.f32.mrb[122].mxu1 }
0x128b   : > { %v6082_v13 = vadd.f32 %v7757_v21, %v11058_v28  ;;  %v6020_v56 = vpop.f32.mrb[123].mxu1 }
0x128c   : > { %v6081_v61 = vadd.f32 %v6020_v56, %v11055_v37 }
0x128d   : > { %v6103_v47 = vadd.f32 %v6708_v7, %v6082_v13 }
0x128e   : > { %v6102_v33 = vadd.f32 %v6708_v7, %v6081_v61  ;;  %v6711_v61 = vld [vmem:[%s11698_s0] ss:$0 sm:$0xff] (!%p6709_p6) }
0x128f   : > { %6117 = vst.msk [vmem:[#allocation2 + $0x18] sm:$0xff] %vm1165_vm4, %v6103_v47 }
0x1290   : > { %6116 = vst.msk [vmem:[#allocation2 + $0x10] sm:$0xff] %vm1165_vm4, %v6102_v33 }
0x12b7   : > { %v7760_v54 = vpop.f32.mrb[124].mxu1 }
0x12b8   : > { %v6084_v19 = vadd.f32 %v7760_v54, %v11065_v46  ;;  %v6030_v2 = vpop.f32.mrb[125].mxu1 }
0x12b9   : > { %v6083_v36 = vadd.f32 %v6030_v2, %v11068_v42  ;;  %v6712_v2 = vld [vmem:[%s11699_s7] ss:$0 sm:$0xff] (!%p6709_p6) }
0x12ba   : > { %v6105_v34 = vadd.f32 %v6708_v7, %v6084_v19 }
0x12bb   : > { %v6104_v0 = vadd.f32 %v6708_v7, %v6083_v36 }
0x12bc   : > { %6119 = vst.msk [vmem:[#allocation2 + $0x28] sm:$0xff] %vm1165_vm4, %v6105_v34  ;;  %v7763_v28 = vpop.f32.mrb[126].mxu1 }
0x12bd   : > { %6118 = vst.msk [vmem:[#allocation2 + $0x20] sm:$0xff] %vm1165_vm4, %v6104_v0  ;;  %v6086_v37 = vadd.f32 %v7763_v28, %v11075_v5  ;;  %v6040_v62 = vpop.f32.mrb[127].mxu1 }
0x12be   : > { %v6085_v3 = vadd.f32 %v6040_v62, %v11078_v63 }
0x12bf   : > { %v6107_v53 = vadd.f32 %v6708_v7, %v6086_v37 }
0x12c0   : > { %v6106_v11 = vadd.f32 %v6708_v7, %v6085_v3 }
0x12c1   : > { %6121 = vst.msk [vmem:[#allocation2 + $0x38] sm:$0xff] %vm1165_vm4, %v6107_v53  ;;  %v7766_v46 = vpop.f32.mrb[128].mxu1 }
0x12c2   : > { %6120 = vst.msk [vmem:[#allocation2 + $0x30] sm:$0xff] %vm1165_vm4, %v6106_v11  ;;  %v6088_v42 = vadd.f32 %v7766_v46, %v11085_v55  ;;  %v6050_v60 = vpop.f32.mrb[129].mxu1 }
0x12c3   : > { %v6087_v9 = vadd.f32 %v6050_v60, %v11088_v26 }
0x12c4   : > { %v6109_v10 = vadd.f32 %v6708_v7, %v6088_v42 }
0x12c5   : > { %v6108_v52 = vadd.f32 %v6708_v7, %v6087_v9 }
0x12c6   : > { %6123 = vst.msk [vmem:[#allocation2 + $0x48] sm:$0xff] %vm1165_vm4, %v6109_v10 }
0x12c7   : > { %6122 = vst.msk [vmem:[#allocation2 + $0x40] sm:$0xff] %vm1165_vm4, %v6108_v52 }
0x12cc   : > { %v7769_v5 = vpop.f32.mrb[130].mxu1 }
0x12cd   : > { %v6090_v63 = vadd.f32 %v7769_v5, %v11095_v31  ;;  %v6060_v18 = vpop.f32.mrb[131].mxu1  ;;  %v6136_v31 = vrot.slane (!%p6709_p6), %v6107_v53, 7 }
0x12ce   : > { %v6089_v43 = vadd.f32 %v6060_v18, %v11098_v27 }
0x12cf   : > { %v6111_v14 = vadd.f32 %v6708_v7, %v6090_v63  ;;  %v6138_v27 = vsel (!%p6709_p6), %vm6137_vm12, %v6136_v31, %v6100_v59 }
0x12d0   : > { %v6110_v24 = vadd.f32 %v6708_v7, %v6089_v43  ;;  %v6141_v30 = vsel (!%p6709_p6), %vm6140_vm13, %v6138_v27, 0.0 }
0x12d1   : > { %6125 = vst.msk [vmem:[#allocation2 + $0x58] sm:$0xff] %vm1165_vm4, %v6111_v14  ;;  %6142 = vadd.xlane.f32.xlu0 (!%p6709_p6), %v6141_v30 }
0x12d2   : > { %6124 = vst.msk [vmem:[#allocation2 + $0x50] sm:$0xff] %vm1165_vm4, %v6110_v24 }
0x12eb   : > { %v7772_v55 = vpop.f32.mrb[132].mxu1  ;;  %6131 = sbr.rel (%p6709_p6) target bundleno = 5354 (0x14ea), region = 108 }
0x12ec   : > { %v6092_v26 = vadd.f32 %v7772_v55, %v11105_v12  ;;  %v6070_v48 = vpop.f32.mrb[133].mxu1 }
0x12ed   : > { %v6091_v50 = vadd.f32 %v6070_v48, %v11108_v22 }
0x12ee   : > { %v6113_v8 = vadd.f32 %v6708_v7, %v6092_v26 }
0x12ef   : > { %v6112_v40 = vadd.f32 %v6708_v7, %v6091_v50 }
0x12f0   : > { %6127 = vst.msk [vmem:[#allocation2 + $0x68] sm:$0xff] %vm1165_vm4, %v6113_v8 }
0x12f1   : > { %6126 = vst.msk [vmem:[#allocation2 + $0x60] sm:$0xff] %vm1165_vm4, %v6112_v40 }
0x135e   : > { %v6143_v12 = vpop.xlane.xlu0 %6142 }
0x135f   : > { %v6144_v41 = vmul.f32 0.03125, %v6143_v12 }
0x1361   : > { %v6146_v32 = vrot.slane %v6144_v41, 1  ;;  %v6149_v22 = vsub.f32 %v6100_v59, %v6144_v41  ;;  %v6710_v59 = vld [vmem:[%s11697_s28] ss:$0 sm:$0xff] }
0x1363   : > { %v6150_v57 = vsub.f32 %v6107_v53, %v6146_v32  ;;  %v6151_v17 = vmul.f32 %v6149_v22, %v6149_v22 }
0x1365   : > { %v6152_v20 = vmul.f32 %v6150_v57, %v6150_v57 }
0x1367   : > { %v6155_v35 = vrot.slane %v6152_v20, 7 }
0x1369   : > { %v6156_v44 = vsel %vm6137_vm12, %v6155_v35, %v6151_v17 }
0x136a   : > { %v6158_v1 = vsel %vm6140_vm13, %v6156_v44, 0.0 }
0x136b   : > { %6159 = vadd.xlane.f32.xlu0 %v6158_v1 }
0x13f8   : > { %v6160_v49 = vpop.xlane.xlu0 %6159 }
0x13f9   : > { %v6161_v7 = vmul.f32 0.03125, %v6160_v49 }
0x13fb   : > { %v6162_v23 = vadd.f32 1e-05, %v6161_v7 }
0x13fd   : > { %8669 = vrsqrt.f32 %v6162_v23 }
0x1407   : > { %v8670_v29 = vpop.eup %8669 }
0x1408   : > { %v6165_v45 = vrot.slane %v8670_v29, 1  ;;  %v6168_v15 = vmul.f32 %v8670_v29, %v6149_v22 }
0x140a   : > { %v6169_v21 = vmul.f32 %v6165_v45, %v6150_v57  ;;  %v6176_v13 = vmul.f32 %v6710_v59, %v6168_v15 }
0x140c   : > { %v6177_v56 = vmul.f32 %v6710_v59, %v6169_v21  ;;  %v6184_v33 = vadd.f32 %v6711_v61, %v6176_v13 }
0x140e   : > { %v6185_v47 = vadd.f32 %v6711_v61, %v6177_v56 }
0x1410   : > { %v6199_v54 = vrot.slane %v6185_v47, 7 }
0x1412   : > { %v6200_v19 = vsel %vm6137_vm12, %v6199_v54, %v6184_v33 }
0x1413   : > { %7782 = vmatmul.mubr.msk.f32.vlgmr.msra.gmra.mrb[0].mxu0 %vm1165_vm4, %v6200_v19 }
0x14e6   : > { %v6269_v36 = vpop.f32.mrb[0].mxu0 }
0x14e7   : > { %v6270_v34 = vadd.f32 %v6712_v2, %v6269_v36  ;;  %v7783_v0 = vpop.f32.mrb[1].mxu0 }
0x14e9   : > { %6274 = vst.msk [vmem:[#allocation3] sm:$0x3] %vm6273_vm15, %v6270_v34 }
0x14ea PF: > { %s11700_s29 = sld [smem:[#allocation7_spill]]  ;;  %s8745_s25 = smov [#allocation3]  }
0x14eb   : > { %s6284_s2 = sshll.u32 %s8745_s25, 4  ;;  %s6285_s2 = int_to_ptr.vmem [resolvable:$true] %s6284_s2 }
0x14ec   : > { %s8671_s8 = scalar_lea.vmem %s6285_s2, 32  ;;  %p8678_p11 = scmp.lt.s32.totalorder %s6285_s2, %s6285_s2 }
0x14ed   : > { %p8672_p8 = scmp.ne.s32.totalorder %s6285_s2, %s8671_s8  ;;  %p8679_p12 = scmp.lt.s32.totalorder %s8671_s8, %s8671_s8 }
0x14ef   : > { %p8680_p13 = por %p8679_p12, %p8678_p11 }
0x14f0   : > { %s11701_s16 = sadd.s32 4294967295, %s11700_s29  }
0x14f1   : > { %p11558_p7 = scmp.eq.s32.totalorder %s11701_s16, 1 }
0x14f3   : > { %p8673_p9 = pnand %p8672_p8, %p11558_p7 }
0x14f5   : > { %p8674_p10 = pneg %p8673_p9 }
0x14f7   : > { %p8681_p0 = pnand %p8680_p13, %p8674_p10 }
0x14f9   : > { %8684 = shalt.err (!%p8681_p0)
}
0x14fa   : > { %s11703_s20 = sld [smem:[#allocation41_spill]] }
0x1500   : > { %s8685_s23 = scalar_lea.hbm %s11703_s20, 32 }
0x1501   : > { %p8686_p1 = scmp.ne.s32.totalorder %s11703_s20, %s8685_s23  ;;  %p8691_p4 = scmp.lt.u32.totalorder %s8685_s23, %s11703_s20 }
0x1503   : > { %p8687_p2 = pnand %p8686_p1, %p11558_p7 }
0x1505   : > { %p8688_p3 = pneg %p8687_p2 }
0x1507   : > { %p8693_p5 = pnand %p8691_p4, %p8688_p3 }
0x1509   : > { %8696 = shalt.err (!%p8693_p5)
}
0x150a   : > { %8029 = dma.vmem_to_hbm [thread:$0]  (%p11558_p7), %s6285_s2, 32, %s11703_s20, [#allocation4]  }
0x150b   : > { %8710 = dma.done.wait (%p11558_p7), [#allocation4], 32  }
0x150c   : > { %8712 = vsyncadd (%p11558_p7), [#allocation4], 4294967264 }
0x150d PF: > { %s11704_s22 = sld [smem:[#allocation7_spill]]  ;;  %s11705_s1 = sld [smem:[#allocation6_spill]] }
0x1513   : > { %s31_s23 = sadd.s32 1, %s11704_s22   ;;  %s11706_s22 = sld [smem:[#allocation8_spill]] }
0x1514   : > { %p28_p6 = scmp.ge.s32.totalorder %s31_s23, 4  }
0x1516   :  { %30 = sbr.rel (!%p28_p6) target bundleno = 14 (0xe), region = 169 }
0x151d   :  { %6297 = vsyncpa [#allocation4], 1 }
0x151e   :  { %6299 = vsyncpa [#allocation4 + $0x1], 1 }

</bundles_post_ra>
